<compile_context>
chip_gen: v7x
topology: tpu7x:2x2x1
jax: 0.10.0
libtpu: 0.0.40
codegen_flags: <defaults>
</compile_context>

<pallas_src>
import functools

import jax
import jax.numpy as jnp
from jax.experimental import pallas as pl
from jax.experimental.pallas import tpu as pltpu


# ----------------------------------------------------------------------------
# small helpers
# ----------------------------------------------------------------------------

def _round_up(x, m):
    return ((x + m - 1) // m) * m


def _pad2(x, rows, cols):
    pr, pc = rows - x.shape[0], cols - x.shape[1]
    if pr == 0 and pc == 0:
        return x
    return jnp.pad(x, ((0, pr), (0, pc)))


# ----------------------------------------------------------------------------
# tile planning
# ----------------------------------------------------------------------------

_TM_MAX = 512
_TK_MAX = 512
_TN_MAX = 256                 # 256-wide N tiles feed the v6e/v7x 256-lane MXU
_W_RESIDENT_BYTES = 6 << 20   # weights below this stay VMEM-resident
_VMEM_SOFT_BYTES = 24 << 20   # soft cap on per-kernel VMEM footprint


def _pick_tile(dim, t_max, unit=128):
    """Largest tile (multiple of `unit`, <= t_max) minimizing padding of dim."""
    d = _round_up(dim, unit)
    if d <= t_max:
        return d
    best_t, best_waste = unit, None
    t = (t_max // unit) * unit
    while t >= unit:
        waste = _round_up(d, t) - d
        if best_waste is None or waste < best_waste:
            best_t, best_waste = t, waste
        t -= unit
    return best_t


def _plan_kn(K, N):
    """Tile plan for a (K, N) weight matrix -> (tk, tn, Kp, Np)."""
    K128, N128 = _round_up(K, 128), _round_up(N, 128)
    if K128 * N128 * 2 <= _W_RESIDENT_BYTES:
        # Weight fits VMEM: keep it resident, grid collapses to (Mi, 1, 1).
        tk, tn = K128, N128
    else:
        tk = _pick_tile(K128, _TK_MAX)
        tn = _pick_tile(N128, _TN_MAX)
    return tk, tn, _round_up(K128, tk), _round_up(N128, tn)


def _vmem_estimate(tm, tk, tn, has_res, out_bytes):
    a = 2 * tm * tk * 2              # A, bf16, double-buffered
    b = 2 * tk * tn * 2              # W, bf16, double-buffered
    ss = 2 * 2 * tn * 4              # scale + shift rows, f32
    o = 2 * tm * tn * out_bytes      # output tile
    acc = tm * tn * 4                # f32 accumulator scratch
    r = (2 * tm * tn * 2) if has_res else 0
    return a + b + ss + o + acc + r


def _plan_m(M, tk, tn, n_tiles_n, has_res, out_bytes):
    Mr = _round_up(M, 8)
    tm = Mr if Mr <= 128 else _pick_tile(Mr, _TM_MAX)
    while tm > 128 and _vmem_estimate(tm, tk, tn, has_res, out_bytes) > _VMEM_SOFT_BYTES:
        tm //= 2
    Mp = _round_up(Mr, tm)
    # Give the second TensorCore (v7x) / megacore half something to do when
    # the grid would otherwise be (1, 1, K).
    if Mp // tm == 1 and n_tiles_n == 1 and Mr >= 16:
        tm = _round_up((Mr + 1) // 2, 8)
        Mp = 2 * tm
    return tm, Mp


def _vmem_limit(est):
    return int(min(max(est + (8 << 20), 32 << 20), 64 << 20))


# ----------------------------------------------------------------------------
# Pallas kernel: tiled matmul + fused BN affine / residual / ReLU epilogue
# ----------------------------------------------------------------------------

def _matmul_kernel(*refs, relu, has_res):
    if has_res:
        a_ref, b_ref, s_ref, t_ref, r_ref, o_ref, acc_ref = refs
    else:
        a_ref, b_ref, s_ref, t_ref, o_ref, acc_ref = refs
        r_ref = None

    k = pl.program_id(2)

    @pl.when(k == 0)
    def _():
        acc_ref[...] = jnp.zeros_like(acc_ref)

    acc_ref[...] += jnp.dot(a_ref[...], b_ref[...],
                            preferred_element_type=jnp.float32)

    @pl.when(k == pl.num_programs(2) - 1)
    def _():
        y = acc_ref[...] * s_ref[...] + t_ref[...]
        if has_res:
            y = y + r_ref[...].astype(jnp.float32)
        if relu:
            y = jnp.maximum(y, 0.0)
        o_ref[...] = y.astype(o_ref.dtype)


def matmul_bn_act(a, w_p, scale, shift, *, relu, residual=None,
                  out_dtype=jnp.bfloat16):
    """y = relu?( (a @ w) * scale + shift [+ residual] ).

    a: (M, K) activations; w_p: (Kp, Np) weight PRE-padded at init to the
    deterministic tile plan for (K, N); scale/shift: (N,); residual (M, N)
    bf16.  Output (M, N) in `out_dtype` (bf16 by default).
    """
    M, K = a.shape
    N = scale.shape[-1]
    tk, tn, Kp, Np = _plan_kn(K, N)
    assert w_p.shape == (Kp, Np), (w_p.shape, (Kp, Np))

    has_res = residual is not None
    out_bytes = 4 if out_dtype == jnp.float32 else 2
    tm, Mp = _plan_m(M, tk, tn, Np // tn, has_res, out_bytes)

    a_p = _pad2(a.astype(jnp.bfloat16), Mp, Kp)
    s_p = _pad2(scale.reshape(1, N).astype(jnp.float32), 1, Np)
    t_p = _pad2(shift.reshape(1, N).astype(jnp.float32), 1, Np)

    in_specs = [
        pl.BlockSpec((tm, tk), lambda i, j, k: (i, k)),
        pl.BlockSpec((tk, tn), lambda i, j, k: (k, j)),
        pl.BlockSpec((1, tn), lambda i, j, k: (0, j)),
        pl.BlockSpec((1, tn), lambda i, j, k: (0, j)),
    ]
    args = [a_p, w_p, s_p, t_p]
    if has_res:
        r_p = _pad2(residual.astype(jnp.bfloat16), Mp, Np)
        in_specs.append(pl.BlockSpec((tm, tn), lambda i, j, k: (i, j)))
        args.append(r_p)

    est = _vmem_estimate(tm, tk, tn, has_res, out_bytes)
    kernel = functools.partial(_matmul_kernel, relu=relu, has_res=has_res)
    out = pl.pallas_call(
        kernel,
        out_shape=jax.ShapeDtypeStruct((Mp, Np), out_dtype),
        grid=(Mp // tm, Np // tn, Kp // tk),
        in_specs=in_specs,
        out_specs=pl.BlockSpec((tm, tn), lambda i, j, k: (i, j)),
        scratch_shapes=[pltpu.VMEM((tm, tn), jnp.float32)],
        compiler_params=pltpu.CompilerParams(
            dimension_semantics=("parallel", "parallel", "arbitrary"),
            vmem_limit_bytes=_vmem_limit(est)),
    )(*args)
    return out[:M, :N]


def grouped_matmul_bn_act(a, wc, scale, shift, *, relu=True,
                          out_dtype=jnp.bfloat16):
    """Grouped 3x3 conv as a matmul with a per-N-tile restricted K range.

    a : (M, T*width) standard im2col activations (tap-major, channel-minor).
    wc: (T*tn, width) compacted weight (see _prep_grouped_conv_tiled); for
        output tile j and tap t the tk(=tn)-wide K window of `a` is
        [t*width + j*tn, t*width + (j+1)*tn) -- only the groups owned by that
        tile are visited, so MXU work is inflated by (tn/Ng) instead of
        `groups`.
    """
    M, K = a.shape
    width = wc.shape[1]
    T = K // width
    tn = wc.shape[0] // T
    tk = tn
    kpb = width // tk                       # K blocks (of size tk) per tap
    n_tiles_n = width // tn
    out_bytes = 4 if out_dtype == jnp.float32 else 2
    tm, Mp = _plan_m(M, tk, tn, n_tiles_n, False, out_bytes)

    a_p = a.astype(jnp.bfloat16)
    if Mp != M:
        a_p = jnp.pad(a_p, ((0, Mp - M), (0, 0)))
    s_p = scale.reshape(1, width).astype(jnp.float32)
    t_p = shift.reshape(1, width).astype(jnp.float32)

    est = _vmem_estimate(tm, tk, tn, False, out_bytes)
    kernel = functools.partial(_matmul_kernel, relu=relu, has_res=False)
    out = pl.pallas_call(
        kernel,
        out_shape=jax.ShapeDtypeStruct((Mp, width), out_dtype),
        grid=(Mp // tm, n_tiles_n, T),
        in_specs=[
            pl.BlockSpec((tm, tk), lambda i, j, t, kpb=kpb: (i, t * kpb + j)),
            pl.BlockSpec((tk, tn), lambda i, j, t: (t, j)),
            pl.BlockSpec((1, tn), lambda i, j, t: (0, j)),
            pl.BlockSpec((1, tn), lambda i, j, t: (0, j)),
        ],
        out_specs=pl.BlockSpec((tm, tn), lambda i, j, t: (i, j)),
        scratch_shapes=[pltpu.VMEM((tm, tn), jnp.float32)],
        compiler_params=pltpu.CompilerParams(
            dimension_semantics=("parallel", "parallel", "arbitrary"),
            vmem_limit_bytes=_vmem_limit(est)),
    )(a_p, wc, s_p, t_p)
    return out[:M]


# ----------------------------------------------------------------------------
# JAX glue: im2col and conv wrappers
# ----------------------------------------------------------------------------

def extract_patches(x, kh, kw, stride, pad):
    """x: (B,H,W,C) NHWC (bf16) -> patches (B,Ho,Wo,kh*kw,C)."""
    B, H, W, C = x.shape
    xp = jnp.pad(x, ((0, 0), (pad, pad), (pad, pad), (0, 0)))
    Ho = (H + 2 * pad - kh) // stride + 1
    Wo = (W + 2 * pad - kw) // stride + 1
    cols = []
    for i in range(kh):
        for j in range(kw):
            cols.append(xp[:, i:i + stride * Ho:stride,
                           j:j + stride * Wo:stride, :])
    patches = jnp.stack(cols, axis=3)  # (B, Ho, Wo, kh*kw, C)
    return patches, Ho, Wo


def conv1x1_bn(x, layer, *, relu, stride=1, residual=None):
    """1x1 conv (no im2col) + folded BN (+ optional residual) + optional ReLU."""
    if stride != 1:
        x = x[:, ::stride, ::stride, :]
    B, H, W, Cin = x.shape
    a = x.reshape(B * H * W, Cin)
    y = matmul_bn_act(a, layer["w"], layer["scale"], layer["shift"],
                      relu=relu, residual=residual)
    return y.reshape(B, H, W, -1)


def convkxk_bn(x, layer, kh, kw, stride, pad, *, relu):
    """k x k dense conv via im2col + tiled matmul."""
    B = x.shape[0]
    Cin = x.shape[-1]
    patches, Ho, Wo = extract_patches(x, kh, kw, stride, pad)
    a = patches.reshape(B * Ho * Wo, kh * kw * Cin)
    y = matmul_bn_act(a, layer["w"], layer["scale"], layer["shift"], relu=relu)
    return y.reshape(B, Ho, Wo, -1)


# ----------------------------------------------------------------------------
# Parameter construction + one-time preprocessing (BN fold, weight matrices)
# ----------------------------------------------------------------------------

EXPANSION = 4

CONFIGS = {
    # torchvision-equivalent configs (same code path):
    "resnext50_32x4d": dict(layers=[3, 4, 6, 3], groups=32, width_per_group=4,
                            stem=64, planes=[64, 128, 256, 512]),
    "resnext101_32x8d": dict(layers=[3, 4, 23, 3], groups=32, width_per_group=8,
                             stem=64, planes=[64, 128, 256, 512]),
    "resnext101_64x4d": dict(layers=[3, 4, 23, 3], groups=64, width_per_group=4,
                             stem=64, planes=[64, 128, 256, 512]),
    "resnext_extra": dict(layers=[3, 4, 25, 3], groups=48, width_per_group=16,
                          stem=64, planes=[64, 128, 256, 512]),
    # scaled-down config used for the runnable demo (exercises both grouped
    # conv code paths: block-diagonal for width<128, restricted-K otherwise):
    "resnext_tiny_4x32d": dict(layers=[1, 1, 1, 1], groups=4, width_per_group=32,
                               stem=16, planes=[16, 32, 64, 128]),
}


class _KeyGen:
    def __init__(self, key):
        self._key = key
        self._n = 0

    def __call__(self):
        self._n += 1
        return jax.random.fold_in(self._key, self._n)


def _conv_init(kg, cout, cin, kh, kw):
    fan_in = cin * kh * kw
    return (jax.random.normal(kg(), (cout, cin, kh, kw), jnp.float32)
            * jnp.sqrt(2.0 / fan_in))


def _bn_init(kg, c):
    return dict(
        gamma=jax.random.uniform(kg(), (c,), jnp.float32, 0.5, 1.5),
        beta=0.1 * jax.random.normal(kg(), (c,), jnp.float32),
        mean=0.1 * jax.random.normal(kg(), (c,), jnp.float32),
        var=jax.random.uniform(kg(), (c,), jnp.float32, 0.5, 1.5),
    )


def _grouped_conv_tile(width, groups):
    """Lane-aligned N tile for the restricted grouped lowering, else None."""
    ng = width // groups
    if width // groups != width / groups:
        return None
    for tn in (256, 128):
        if width % tn == 0 and tn % ng == 0:
            return tn
    return None


def make_resnext_params(key, model_name, num_classes):
    """Returns (raw params pytree, cfg dict, static arch structure)."""
    if model_name not in CONFIGS:
        raise NotImplementedError(model_name)
    cfg = dict(CONFIGS[model_name])
    kg = _KeyGen(key)
    groups, base_width = cfg["groups"], cfg["width_per_group"]

    params = {"stem": {"conv_w": _conv_init(kg, cfg["stem"], 3, 7, 7),
                       "bn": _bn_init(kg, cfg["stem"])},
              "stages": []}
    arch = []

    inplanes = cfg["stem"]
    for stage_idx, (planes, n_blocks) in enumerate(zip(cfg["planes"],
                                                       cfg["layers"])):
        stage_stride = 1 if stage_idx == 0 else 2
        blocks, blocks_arch = [], []
        for b in range(n_blocks):
            stride = stage_stride if b == 0 else 1
            width = int(planes * (base_width / 64.0)) * groups
            out_c = planes * EXPANSION
            blk = {
                "conv1_w": _conv_init(kg, width, inplanes, 1, 1),
                "bn1": _bn_init(kg, width),
                "conv2_w": _conv_init(kg, width, width // groups, 3, 3),
                "bn2": _bn_init(kg, width),
                "conv3_w": _conv_init(kg, out_c, width, 1, 1),
                "bn3": _bn_init(kg, out_c),
            }
            has_ds = (stride != 1 or inplanes != out_c)
            if has_ds:
                blk["ds_w"] = _conv_init(kg, out_c, inplanes, 1, 1)
                blk["ds_bn"] = _bn_init(kg, out_c)
            blocks.append(blk)
            blocks_arch.append({"stride": stride, "has_ds": has_ds,
                                "c2_tn": _grouped_conv_tile(width, groups)})
            inplanes = out_c
        params["stages"].append(blocks)
        arch.append(blocks_arch)

    params["fc_w"] = (jax.random.normal(kg(), (inplanes, num_classes),
                                        jnp.float32)
                      * jnp.sqrt(1.0 / inplanes))
    params["fc_b"] = jnp.zeros((num_classes,), jnp.float32)
    return params, cfg, arch


def fold_bn(bn, eps=1e-5):
    scale = bn["gamma"] / jnp.sqrt(bn["var"] + eps)
    shift = bn["beta"] - bn["mean"] * scale
    return scale, shift


def _pad_weight(wm):
    """Pad a (K, N) weight to its tile plan once, at init, and cast to bf16."""
    K, N = wm.shape
    _, _, Kp, Np = _plan_kn(K, N)
    return _pad2(wm, Kp, Np).astype(jnp.bfloat16)


def _prep_dense_conv(w, bn):
    """PyTorch (Cout,Cin,kh,kw) -> pre-padded (Kp,Np) bf16 matmul weight + BN."""
    Cout, Cin, kh, kw = w.shape
    wm = jnp.transpose(w, (2, 3, 1, 0)).reshape(kh * kw * Cin, Cout)
    scale, shift = fold_bn(bn)
    return {"w": _pad_weight(wm), "scale": scale, "shift": shift}


def _prep_grouped_conv_blockdiag(w, bn, groups):
    """Fallback (width < 128): exact dense block-diagonal (Kp, Np) weight."""
    Cout, Cg, kh, kw = w.shape
    Ng = Cout // groups
    w_t = jnp.transpose(w, (2, 3, 1, 0)).reshape(kh, kw, Cg, groups, Ng)
    eye = jnp.eye(groups, dtype=w.dtype)
    wd = jnp.einsum("ijcgn,hg->ijhcgn", w_t, eye)
    wd = wd.reshape(kh * kw * groups * Cg, groups * Ng)
    scale, shift = fold_bn(bn)
    return {"w": _pad_weight(wd), "scale": scale, "shift": shift}


def _prep_grouped_conv_tiled(w, bn, groups, tn):
    """Restricted-K grouped lowering: (T*tn, width) compacted weight.

    wc[t*tn + r, o] = w[o, c_abs % Cg, ti, tj] if group(c_abs) == group(o)
    else 0, with c_abs = (o // tn) * tn + r, t = ti*kw + tj (matches the
    im2col tap order of extract_patches)."""
    Cout, Cg, kh, kw = w.shape
    width = Cout
    Ng = width // groups
    assert Cg == Ng and width % tn == 0 and tn % Ng == 0
    T = kh * kw
    wt = jnp.transpose(w, (2, 3, 1, 0)).reshape(T, Cg, width)   # wt[t, cg, o]
    o_idx = jnp.arange(width)
    r_idx = jnp.arange(tn)
    c_abs = (o_idx[None, :] // tn) * tn + r_idx[:, None]         # (tn, width)
    mask = (c_abs // Cg) == (o_idx[None, :] // Ng)               # (tn, width)
    cg_idx = c_abs % Cg                                          # (tn, width)
    idx = jnp.broadcast_to(cg_idx[None], (T, tn, width))
    wc = jnp.take_along_axis(wt, idx, axis=1)                    # (T, tn, width)
    wc = jnp.where(mask[None], wc, 0.0).reshape(T * tn, width)
    scale, shift = fold_bn(bn)
    return {"w": wc.astype(jnp.bfloat16), "scale": scale, "shift": shift}


def preprocess_params(raw, cfg, arch):
    """One-time (outside jit) BN folding + weight-matrix construction/padding."""
    groups = cfg["groups"]
    prep = {
        "stem": _prep_dense_conv(raw["stem"]["conv_w"], raw["stem"]["bn"]),
        "stages": [],
        "fc_w": _pad_weight(raw["fc_w"]),
        "fc_scale": jnp.ones_like(raw["fc_b"]),
        "fc_b": raw["fc_b"],
    }
    for stage, stage_a in zip(raw["stages"], arch):
        blocks = []
        for blk, blk_a in zip(stage, stage_a):
            d = {
                "c1": _prep_dense_conv(blk["conv1_w"], blk["bn1"]),
                "c3": _prep_dense_conv(blk["conv3_w"], blk["bn3"]),
            }
            if blk_a["c2_tn"] is not None:
                d["c2"] = _prep_grouped_conv_tiled(blk["conv2_w"], blk["bn2"],
                                                   groups, blk_a["c2_tn"])
            else:
                d["c2"] = _prep_grouped_conv_blockdiag(blk["conv2_w"],
                                                       blk["bn2"], groups)
            if "ds_w" in blk:
                d["ds"] = _prep_dense_conv(blk["ds_w"], blk["ds_bn"])
            blocks.append(d)
        prep["stages"].append(blocks)
    return prep


# ----------------------------------------------------------------------------
# Forward pass
# ----------------------------------------------------------------------------

def bottleneck_forward(x, p, blk_arch):
    stride = blk_arch["stride"]

    out = conv1x1_bn(x, p["c1"], relu=True)

    # grouped 3x3 conv (+BN+ReLU)
    B = out.shape[0]
    Cin = out.shape[-1]
    patches, Ho, Wo = extract_patches(out, 3, 3, stride, 1)
    a = patches.reshape(B * Ho * Wo, 9 * Cin)
    if blk_arch["c2_tn"] is not None:
        y2 = grouped_matmul_bn_act(a, p["c2"]["w"], p["c2"]["scale"],
                                   p["c2"]["shift"], relu=True)
    else:
        y2 = matmul_bn_act(a, p["c2"]["w"], p["c2"]["scale"],
                           p["c2"]["shift"], relu=True)
    out = y2.reshape(B, Ho, Wo, -1)

    if blk_arch["has_ds"]:
        identity = conv1x1_bn(x, p["ds"], relu=False, stride=stride)
    else:
        identity = x

    # conv3 (1x1) with residual add + ReLU fused into the matmul epilogue.
    B, H, W, Cmid = out.shape
    Cout = identity.shape[-1]
    a3 = out.reshape(B * H * W, Cmid)
    res = identity.reshape(B * H * W, Cout)
    y = matmul_bn_act(a3, p["c3"]["w"], p["c3"]["scale"], p["c3"]["shift"],
                      relu=True, residual=res)
    return y.reshape(B, H, W, Cout)


def resnext_forward(prep, x_nchw, *, arch):
    """x_nchw: (B, 3, H, W) like the PyTorch module; returns (B, num_classes).
    BatchNorm evaluated in inference mode (folded into conv epilogues)."""
    x = jnp.transpose(x_nchw, (0, 2, 3, 1)).astype(jnp.bfloat16)   # -> NHWC

    # stem: 7x7/2 conv + BN + ReLU, then 3x3/2 maxpool (pad=1, fused glue).
    x = convkxk_bn(x, prep["stem"], 7, 7, 2, 3, relu=True)
    x = jax.lax.reduce_window(
        x, jnp.asarray(jnp.finfo(x.dtype).min, x.dtype), jax.lax.max,
        (1, 3, 3, 1), (1, 2, 2, 1),
        [(0, 0), (1, 1), (1, 1), (0, 0)])

    for stage_p, stage_a in zip(prep["stages"], arch):
        for blk_p, blk_a in zip(stage_p, stage_a):
            x = bottleneck_forward(x, blk_p, blk_a)

    # global average pool (glue) + fc (Pallas matmul, f32 logits).
    pooled = jnp.mean(x.astype(jnp.float32), axis=(1, 2))          # (B, C)
    logits = matmul_bn_act(pooled, prep["fc_w"], prep["fc_scale"],
                           prep["fc_b"], relu=False, out_dtype=jnp.float32)
    return logits


class ResNextModulePallas:
    """Pallas counterpart of ResNextModule(model_name, num_classes=...)."""

    def __init__(self, model_name, num_classes=10, key=None):
        key = jax.random.PRNGKey(0) if key is None else key
        raw, cfg, arch = make_resnext_params(key, model_name, num_classes)
        self.cfg = cfg
        self.arch = arch
        # BN folding + weight-matrix prep + tile-plan padding done once here.
        self.params = preprocess_params(raw, cfg, arch)
        self._fwd = jax.jit(functools.partial(resnext_forward, arch=arch))

    def __call__(self, x):
        return self._fwd(self.params, x)


if __name__ == "__main__":
    key = jax.random.PRNGKey(0)
    k_param, k_in = jax.random.split(key)

    # Small, structurally-faithful ResNeXt (grouped bottlenecks, same builder
    # path as resnext50_32x4d / resnext101_*); exercises both the restricted-K
    # and block-diagonal grouped-conv lowerings.
    model = ResNextModulePallas("resnext_tiny_4x32d", num_classes=10,
                                key=k_param)

    x = jax.random.normal(k_in, (2, 3, 32, 32), jnp.float32)  # NCHW like torch
    logits = model(x)
    logits = jax.block_until_ready(logits)

    assert logits.shape == (2, 10), logits.shape
    assert bool(jnp.all(jnp.isfinite(logits)))
    print("KERNEL_OK")
</pallas_src>

<mosaic_0001>
module attributes {stable_mosaic.version = 11 : i64} {
  func.func @_matmul_kernel(%arg0: i32, %arg1: i32, %arg2: i32, %arg3: memref<256x256xbf16, #tpu.memory_space<vmem>>, %arg4: memref<256x128xbf16, #tpu.memory_space<vmem>>, %arg5: memref<1x128xf32, #tpu.memory_space<vmem>>, %arg6: memref<1x128xf32, #tpu.memory_space<vmem>>, %arg7: memref<256x128xbf16, #tpu.memory_space<vmem>>, %arg8: memref<256x128xf32, #tpu.memory_space<vmem>>) attributes {dimension_semantics = [#tpu.dimension_semantics<parallel>, #tpu.dimension_semantics<parallel>, #tpu.dimension_semantics<arbitrary>], iteration_bounds = array<i64: 2, 1, 1>, scalar_prefetch = 0 : i64, scratch_operands = 1 : i64, tpu.core_type = #tpu.core_type<tc>, window_params = [{transform_indices = @transform_0, window_bounds = array<i64: 256, 256>}, {transform_indices = @transform_1, window_bounds = array<i64: 256, 128>}, {transform_indices = @transform_2, window_bounds = array<i64: 1, 128>}, {transform_indices = @transform_3, window_bounds = array<i64: 1, 128>}, {transform_indices = @transform_4, window_bounds = array<i64: 256, 128>}]} {
    %c0_i32 = arith.constant 0 : i32
    %0 = arith.cmpi eq, %arg2, %c0_i32 : i32
    %1 = arith.extui %0 : i1 to i32
    %c0_i32_0 = arith.constant 0 : i32
    %2 = arith.cmpi ne, %1, %c0_i32_0 : i32
    scf.if %2 {
      %cst_10 = arith.constant 0.000000e+00 : f32
      %12 = vector.broadcast %cst_10 : f32 to vector<256x128xf32>
      %c0_11 = arith.constant 0 : index
      %c0_12 = arith.constant 0 : index
      %13 = vector.load %arg8[%c0_11, %c0_12] : memref<256x128xf32, #tpu.memory_space<vmem>>, vector<256x128xf32>
      tpu.vector_store %arg8[%c0_11, %c0_12], %12 {strides = array<i32>} : memref<256x128xf32, #tpu.memory_space<vmem>>, vector<256x128xf32>,
    } else {
    }
    %c0 = arith.constant 0 : index
    %c0_1 = arith.constant 0 : index
    %3 = vector.load %arg8[%c0, %c0_1] : memref<256x128xf32, #tpu.memory_space<vmem>>, vector<256x128xf32>
    %c0_2 = arith.constant 0 : index
    %c0_3 = arith.constant 0 : index
    %4 = vector.load %arg3[%c0_2, %c0_3] : memref<256x256xbf16, #tpu.memory_space<vmem>>, vector<256x256xbf16>
    %c0_4 = arith.constant 0 : index
    %c0_5 = arith.constant 0 : index
    %5 = vector.load %arg4[%c0_4, %c0_5] : memref<256x128xbf16, #tpu.memory_space<vmem>>, vector<256x128xbf16>
    %cst = arith.constant dense<0.000000e+00> : vector<256x128xf32>
    %6 = tpu.matmul %4, %5, %cst {dimension_numbers = #tpu.dot_dimension_numbers<[1], [0], [0], [1], [0, 0, 1, 1], [], []>} : vector<256x256xbf16>, vector<256x128xbf16>, vector<256x128xf32> -> vector<256x128xf32>
    %7 = arith.addf %3, %6 : vector<256x128xf32>
    %c0_6 = arith.constant 0 : index
    %c0_7 = arith.constant 0 : index
    %8 = vector.load %arg8[%c0_6, %c0_7] : memref<256x128xf32, #tpu.memory_space<vmem>>, vector<256x128xf32>
    tpu.vector_store %arg8[%c0_6, %c0_7], %7 {strides = array<i32>} : memref<256x128xf32, #tpu.memory_space<vmem>>, vector<256x128xf32>,
    %c0_i32_8 = arith.constant 0 : i32
    %9 = arith.cmpi eq, %arg2, %c0_i32_8 : i32
    %10 = arith.extui %9 : i1 to i32
    %c0_i32_9 = arith.constant 0 : i32
    %11 = arith.cmpi ne, %10, %c0_i32_9 : i32
    scf.if %11 {
      %c0_10 = arith.constant 0 : index
      %c0_11 = arith.constant 0 : index
      %12 = vector.load %arg8[%c0_10, %c0_11] : memref<256x128xf32, #tpu.memory_space<vmem>>, vector<256x128xf32>
      %c0_12 = arith.constant 0 : index
      %c0_13 = arith.constant 0 : index
      %13 = vector.load %arg5[%c0_12, %c0_13] : memref<1x128xf32, #tpu.memory_space<vmem>>, vector<1x128xf32>
      %14 = vector.broadcast %13 : vector<1x128xf32> to vector<256x128xf32>
      %15 = arith.mulf %12, %14 : vector<256x128xf32>
      %c0_14 = arith.constant 0 : index
      %c0_15 = arith.constant 0 : index
      %16 = vector.load %arg6[%c0_14, %c0_15] : memref<1x128xf32, #tpu.memory_space<vmem>>, vector<1x128xf32>
      %17 = vector.broadcast %16 : vector<1x128xf32> to vector<256x128xf32>
      %18 = arith.addf %15, %17 : vector<256x128xf32>
      %cst_16 = arith.constant 0.000000e+00 : f32
      %19 = vector.broadcast %cst_16 : f32 to vector<256x128xf32>
      %20 = arith.maximumf %18, %19 : vector<256x128xf32>
      %21 = arith.truncf %20 : vector<256x128xf32> to vector<256x128xbf16>
      %c0_17 = arith.constant 0 : index
      %c0_18 = arith.constant 0 : index
      %22 = vector.load %arg7[%c0_17, %c0_18] : memref<256x128xbf16, #tpu.memory_space<vmem>>, vector<256x128xbf16>
      tpu.vector_store %arg7[%c0_17, %c0_18], %21 {strides = array<i32>} : memref<256x128xbf16, #tpu.memory_space<vmem>>, vector<256x128xbf16>,
    } else {
    }
    return
  }
  func.func @transform_0(%arg0: i32, %arg1: i32, %arg2: i32) -> (i32, i32) {
    %c0_i32 = arith.constant 0 : i32
    return %arg0, %arg2 : i32, i32
  }
  func.func @transform_1(%arg0: i32, %arg1: i32, %arg2: i32) -> (i32, i32) {
    %c0_i32 = arith.constant 0 : i32
    return %arg2, %arg1 : i32, i32
  }
  func.func @transform_2(%arg0: i32, %arg1: i32, %arg2: i32) -> (i32, i32) {
    %c0_i32 = arith.constant 0 : i32
    %c0_i32_0 = arith.constant 0 : i32
    return %c0_i32, %arg1 : i32, i32
  }
  func.func @transform_3(%arg0: i32, %arg1: i32, %arg2: i32) -> (i32, i32) {
    %c0_i32 = arith.constant 0 : i32
    %c0_i32_0 = arith.constant 0 : i32
    return %c0_i32, %arg1 : i32, i32
  }
  func.func @transform_4(%arg0: i32, %arg1: i32, %arg2: i32) -> (i32, i32) {
    %c0_i32 = arith.constant 0 : i32
    return %arg0, %arg1 : i32, i32
  }
}

module attributes {stable_mosaic.version = 11 : i64} {
  func.func @_matmul_kernel(%arg0: i32, %arg1: i32, %arg2: i32, %arg3: memref<64x128xbf16, #tpu.memory_space<vmem>>, %arg4: memref<128x128xbf16, #tpu.memory_space<vmem>>, %arg5: memref<1x128xf32, #tpu.memory_space<vmem>>, %arg6: memref<1x128xf32, #tpu.memory_space<vmem>>, %arg7: memref<64x128xbf16, #tpu.memory_space<vmem>>, %arg8: memref<64x128xf32, #tpu.memory_space<vmem>>) attributes {dimension_semantics = [#tpu.dimension_semantics<parallel>, #tpu.dimension_semantics<parallel>, #tpu.dimension_semantics<arbitrary>], iteration_bounds = array<i64: 2, 1, 1>, scalar_prefetch = 0 : i64, scratch_operands = 1 : i64, tpu.core_type = #tpu.core_type<tc>, window_params = [{transform_indices = @transform_0, window_bounds = array<i64: 64, 128>}, {transform_indices = @transform_1, window_bounds = array<i64: 128, 128>}, {transform_indices = @transform_2, window_bounds = array<i64: 1, 128>}, {transform_indices = @transform_3, window_bounds = array<i64: 1, 128>}, {transform_indices = @transform_4, window_bounds = array<i64: 64, 128>}]} {
    %c0_i32 = arith.constant 0 : i32
    %0 = arith.cmpi eq, %arg2, %c0_i32 : i32
    %1 = arith.extui %0 : i1 to i32
    %c0_i32_0 = arith.constant 0 : i32
    %2 = arith.cmpi ne, %1, %c0_i32_0 : i32
    scf.if %2 {
      %cst_10 = arith.constant 0.000000e+00 : f32
      %12 = vector.broadcast %cst_10 : f32 to vector<64x128xf32>
      %c0_11 = arith.constant 0 : index
      %c0_12 = arith.constant 0 : index
      %13 = vector.load %arg8[%c0_11, %c0_12] : memref<64x128xf32, #tpu.memory_space<vmem>>, vector<64x128xf32>
      tpu.vector_store %arg8[%c0_11, %c0_12], %12 {strides = array<i32>} : memref<64x128xf32, #tpu.memory_space<vmem>>, vector<64x128xf32>,
    } else {
    }
    %c0 = arith.constant 0 : index
    %c0_1 = arith.constant 0 : index
    %3 = vector.load %arg8[%c0, %c0_1] : memref<64x128xf32, #tpu.memory_space<vmem>>, vector<64x128xf32>
    %c0_2 = arith.constant 0 : index
    %c0_3 = arith.constant 0 : index
    %4 = vector.load %arg3[%c0_2, %c0_3] : memref<64x128xbf16, #tpu.memory_space<vmem>>, vector<64x128xbf16>
    %c0_4 = arith.constant 0 : index
    %c0_5 = arith.constant 0 : index
    %5 = vector.load %arg4[%c0_4, %c0_5] : memref<128x128xbf16, #tpu.memory_space<vmem>>, vector<128x128xbf16>
    %cst = arith.constant dense<0.000000e+00> : vector<64x128xf32>
    %6 = tpu.matmul %4, %5, %cst {dimension_numbers = #tpu.dot_dimension_numbers<[1], [0], [0], [1], [0, 0, 1, 1], [], []>} : vector<64x128xbf16>, vector<128x128xbf16>, vector<64x128xf32> -> vector<64x128xf32>
    %7 = arith.addf %3, %6 : vector<64x128xf32>
    %c0_6 = arith.constant 0 : index
    %c0_7 = arith.constant 0 : index
    %8 = vector.load %arg8[%c0_6, %c0_7] : memref<64x128xf32, #tpu.memory_space<vmem>>, vector<64x128xf32>
    tpu.vector_store %arg8[%c0_6, %c0_7], %7 {strides = array<i32>} : memref<64x128xf32, #tpu.memory_space<vmem>>, vector<64x128xf32>,
    %c0_i32_8 = arith.constant 0 : i32
    %9 = arith.cmpi eq, %arg2, %c0_i32_8 : i32
    %10 = arith.extui %9 : i1 to i32
    %c0_i32_9 = arith.constant 0 : i32
    %11 = arith.cmpi ne, %10, %c0_i32_9 : i32
    scf.if %11 {
      %c0_10 = arith.constant 0 : index
      %c0_11 = arith.constant 0 : index
      %12 = vector.load %arg8[%c0_10, %c0_11] : memref<64x128xf32, #tpu.memory_space<vmem>>, vector<64x128xf32>
      %c0_12 = arith.constant 0 : index
      %c0_13 = arith.constant 0 : index
      %13 = vector.load %arg5[%c0_12, %c0_13] : memref<1x128xf32, #tpu.memory_space<vmem>>, vector<1x128xf32>
      %14 = vector.broadcast %13 : vector<1x128xf32> to vector<64x128xf32>
      %15 = arith.mulf %12, %14 : vector<64x128xf32>
      %c0_14 = arith.constant 0 : index
      %c0_15 = arith.constant 0 : index
      %16 = vector.load %arg6[%c0_14, %c0_15] : memref<1x128xf32, #tpu.memory_space<vmem>>, vector<1x128xf32>
      %17 = vector.broadcast %16 : vector<1x128xf32> to vector<64x128xf32>
      %18 = arith.addf %15, %17 : vector<64x128xf32>
      %cst_16 = arith.constant 0.000000e+00 : f32
      %19 = vector.broadcast %cst_16 : f32 to vector<64x128xf32>
      %20 = arith.maximumf %18, %19 : vector<64x128xf32>
      %21 = arith.truncf %20 : vector<64x128xf32> to vector<64x128xbf16>
      %c0_17 = arith.constant 0 : index
      %c0_18 = arith.constant 0 : index
      %22 = vector.load %arg7[%c0_17, %c0_18] : memref<64x128xbf16, #tpu.memory_space<vmem>>, vector<64x128xbf16>
      tpu.vector_store %arg7[%c0_17, %c0_18], %21 {strides = array<i32>} : memref<64x128xbf16, #tpu.memory_space<vmem>>, vector<64x128xbf16>,
    } else {
    }
    return
  }
  func.func @transform_0(%arg0: i32, %arg1: i32, %arg2: i32) -> (i32, i32) {
    %c0_i32 = arith.constant 0 : i32
    return %arg0, %arg2 : i32, i32
  }
  func.func @transform_1(%arg0: i32, %arg1: i32, %arg2: i32) -> (i32, i32) {
    %c0_i32 = arith.constant 0 : i32
    return %arg2, %arg1 : i32, i32
  }
  func.func @transform_2(%arg0: i32, %arg1: i32, %arg2: i32) -> (i32, i32) {
    %c0_i32 = arith.constant 0 : i32
    %c0_i32_0 = arith.constant 0 : i32
    return %c0_i32, %arg1 : i32, i32
  }
  func.func @transform_3(%arg0: i32, %arg1: i32, %arg2: i32) -> (i32, i32) {
    %c0_i32 = arith.constant 0 : i32
    %c0_i32_0 = arith.constant 0 : i32
    return %c0_i32, %arg1 : i32, i32
  }
  func.func @transform_4(%arg0: i32, %arg1: i32, %arg2: i32) -> (i32, i32) {
    %c0_i32 = arith.constant 0 : i32
    return %arg0, %arg1 : i32, i32
  }
}

module attributes {stable_mosaic.version = 11 : i64} {
  func.func @_matmul_kernel(%arg0: i32, %arg1: i32, %arg2: i32, %arg3: memref<64x384xbf16, #tpu.memory_space<vmem>>, %arg4: memref<384x128xbf16, #tpu.memory_space<vmem>>, %arg5: memref<1x128xf32, #tpu.memory_space<vmem>>, %arg6: memref<1x128xf32, #tpu.memory_space<vmem>>, %arg7: memref<64x128xbf16, #tpu.memory_space<vmem>>, %arg8: memref<64x128xf32, #tpu.memory_space<vmem>>) attributes {dimension_semantics = [#tpu.dimension_semantics<parallel>, #tpu.dimension_semantics<parallel>, #tpu.dimension_semantics<arbitrary>], iteration_bounds = array<i64: 2, 1, 1>, scalar_prefetch = 0 : i64, scratch_operands = 1 : i64, tpu.core_type = #tpu.core_type<tc>, window_params = [{transform_indices = @transform_0, window_bounds = array<i64: 64, 384>}, {transform_indices = @transform_1, window_bounds = array<i64: 384, 128>}, {transform_indices = @transform_2, window_bounds = array<i64: 1, 128>}, {transform_indices = @transform_3, window_bounds = array<i64: 1, 128>}, {transform_indices = @transform_4, window_bounds = array<i64: 64, 128>}]} {
    %c0_i32 = arith.constant 0 : i32
    %0 = arith.cmpi eq, %arg2, %c0_i32 : i32
    %1 = arith.extui %0 : i1 to i32
    %c0_i32_0 = arith.constant 0 : i32
    %2 = arith.cmpi ne, %1, %c0_i32_0 : i32
    scf.if %2 {
      %cst_10 = arith.constant 0.000000e+00 : f32
      %12 = vector.broadcast %cst_10 : f32 to vector<64x128xf32>
      %c0_11 = arith.constant 0 : index
      %c0_12 = arith.constant 0 : index
      %13 = vector.load %arg8[%c0_11, %c0_12] : memref<64x128xf32, #tpu.memory_space<vmem>>, vector<64x128xf32>
      tpu.vector_store %arg8[%c0_11, %c0_12], %12 {strides = array<i32>} : memref<64x128xf32, #tpu.memory_space<vmem>>, vector<64x128xf32>,
    } else {
    }
    %c0 = arith.constant 0 : index
    %c0_1 = arith.constant 0 : index
    %3 = vector.load %arg8[%c0, %c0_1] : memref<64x128xf32, #tpu.memory_space<vmem>>, vector<64x128xf32>
    %c0_2 = arith.constant 0 : index
    %c0_3 = arith.constant 0 : index
    %4 = vector.load %arg3[%c0_2, %c0_3] : memref<64x384xbf16, #tpu.memory_space<vmem>>, vector<64x384xbf16>
    %c0_4 = arith.constant 0 : index
    %c0_5 = arith.constant 0 : index
    %5 = vector.load %arg4[%c0_4, %c0_5] : memref<384x128xbf16, #tpu.memory_space<vmem>>, vector<384x128xbf16>
    %cst = arith.constant dense<0.000000e+00> : vector<64x128xf32>
    %6 = tpu.matmul %4, %5, %cst {dimension_numbers = #tpu.dot_dimension_numbers<[1], [0], [0], [1], [0, 0, 1, 1], [], []>} : vector<64x384xbf16>, vector<384x128xbf16>, vector<64x128xf32> -> vector<64x128xf32>
    %7 = arith.addf %3, %6 : vector<64x128xf32>
    %c0_6 = arith.constant 0 : index
    %c0_7 = arith.constant 0 : index
    %8 = vector.load %arg8[%c0_6, %c0_7] : memref<64x128xf32, #tpu.memory_space<vmem>>, vector<64x128xf32>
    tpu.vector_store %arg8[%c0_6, %c0_7], %7 {strides = array<i32>} : memref<64x128xf32, #tpu.memory_space<vmem>>, vector<64x128xf32>,
    %c0_i32_8 = arith.constant 0 : i32
    %9 = arith.cmpi eq, %arg2, %c0_i32_8 : i32
    %10 = arith.extui %9 : i1 to i32
    %c0_i32_9 = arith.constant 0 : i32
    %11 = arith.cmpi ne, %10, %c0_i32_9 : i32
    scf.if %11 {
      %c0_10 = arith.constant 0 : index
      %c0_11 = arith.constant 0 : index
      %12 = vector.load %arg8[%c0_10, %c0_11] : memref<64x128xf32, #tpu.memory_space<vmem>>, vector<64x128xf32>
      %c0_12 = arith.constant 0 : index
      %c0_13 = arith.constant 0 : index
      %13 = vector.load %arg5[%c0_12, %c0_13] : memref<1x128xf32, #tpu.memory_space<vmem>>, vector<1x128xf32>
      %14 = vector.broadcast %13 : vector<1x128xf32> to vector<64x128xf32>
      %15 = arith.mulf %12, %14 : vector<64x128xf32>
      %c0_14 = arith.constant 0 : index
      %c0_15 = arith.constant 0 : index
      %16 = vector.load %arg6[%c0_14, %c0_15] : memref<1x128xf32, #tpu.memory_space<vmem>>, vector<1x128xf32>
      %17 = vector.broadcast %16 : vector<1x128xf32> to vector<64x128xf32>
      %18 = arith.addf %15, %17 : vector<64x128xf32>
      %cst_16 = arith.constant 0.000000e+00 : f32
      %19 = vector.broadcast %cst_16 : f32 to vector<64x128xf32>
      %20 = arith.maximumf %18, %19 : vector<64x128xf32>
      %21 = arith.truncf %20 : vector<64x128xf32> to vector<64x128xbf16>
      %c0_17 = arith.constant 0 : index
      %c0_18 = arith.constant 0 : index
      %22 = vector.load %arg7[%c0_17, %c0_18] : memref<64x128xbf16, #tpu.memory_space<vmem>>, vector<64x128xbf16>
      tpu.vector_store %arg7[%c0_17, %c0_18], %21 {strides = array<i32>} : memref<64x128xbf16, #tpu.memory_space<vmem>>, vector<64x128xbf16>,
    } else {
    }
    return
  }
  func.func @transform_0(%arg0: i32, %arg1: i32, %arg2: i32) -> (i32, i32) {
    %c0_i32 = arith.constant 0 : i32
    return %arg0, %arg2 : i32, i32
  }
  func.func @transform_1(%arg0: i32, %arg1: i32, %arg2: i32) -> (i32, i32) {
    %c0_i32 = arith.constant 0 : i32
    return %arg2, %arg1 : i32, i32
  }
  func.func @transform_2(%arg0: i32, %arg1: i32, %arg2: i32) -> (i32, i32) {
    %c0_i32 = arith.constant 0 : i32
    %c0_i32_0 = arith.constant 0 : i32
    return %c0_i32, %arg1 : i32, i32
  }
  func.func @transform_3(%arg0: i32, %arg1: i32, %arg2: i32) -> (i32, i32) {
    %c0_i32 = arith.constant 0 : i32
    %c0_i32_0 = arith.constant 0 : i32
    return %c0_i32, %arg1 : i32, i32
  }
  func.func @transform_4(%arg0: i32, %arg1: i32, %arg2: i32) -> (i32, i32) {
    %c0_i32 = arith.constant 0 : i32
    return %arg0, %arg1 : i32, i32
  }
}

module attributes {stable_mosaic.version = 11 : i64} {
  func.func @_matmul_kernel(%arg0: i32, %arg1: i32, %arg2: i32, %arg3: memref<64x128xbf16, #tpu.memory_space<vmem>>, %arg4: memref<128x128xbf16, #tpu.memory_space<vmem>>, %arg5: memref<1x128xf32, #tpu.memory_space<vmem>>, %arg6: memref<1x128xf32, #tpu.memory_space<vmem>>, %arg7: memref<64x128xbf16, #tpu.memory_space<vmem>>, %arg8: memref<64x128xf32, #tpu.memory_space<vmem>>) attributes {dimension_semantics = [#tpu.dimension_semantics<parallel>, #tpu.dimension_semantics<parallel>, #tpu.dimension_semantics<arbitrary>], iteration_bounds = array<i64: 2, 1, 1>, scalar_prefetch = 0 : i64, scratch_operands = 1 : i64, tpu.core_type = #tpu.core_type<tc>, window_params = [{transform_indices = @transform_0, window_bounds = array<i64: 64, 128>}, {transform_indices = @transform_1, window_bounds = array<i64: 128, 128>}, {transform_indices = @transform_2, window_bounds = array<i64: 1, 128>}, {transform_indices = @transform_3, window_bounds = array<i64: 1, 128>}, {transform_indices = @transform_4, window_bounds = array<i64: 64, 128>}]} {
    %c0_i32 = arith.constant 0 : i32
    %0 = arith.cmpi eq, %arg2, %c0_i32 : i32
    %1 = arith.extui %0 : i1 to i32
    %c0_i32_0 = arith.constant 0 : i32
    %2 = arith.cmpi ne, %1, %c0_i32_0 : i32
    scf.if %2 {
      %cst_10 = arith.constant 0.000000e+00 : f32
      %12 = vector.broadcast %cst_10 : f32 to vector<64x128xf32>
      %c0_11 = arith.constant 0 : index
      %c0_12 = arith.constant 0 : index
      %13 = vector.load %arg8[%c0_11, %c0_12] : memref<64x128xf32, #tpu.memory_space<vmem>>, vector<64x128xf32>
      tpu.vector_store %arg8[%c0_11, %c0_12], %12 {strides = array<i32>} : memref<64x128xf32, #tpu.memory_space<vmem>>, vector<64x128xf32>,
    } else {
    }
    %c0 = arith.constant 0 : index
    %c0_1 = arith.constant 0 : index
    %3 = vector.load %arg8[%c0, %c0_1] : memref<64x128xf32, #tpu.memory_space<vmem>>, vector<64x128xf32>
    %c0_2 = arith.constant 0 : index
    %c0_3 = arith.constant 0 : index
    %4 = vector.load %arg3[%c0_2, %c0_3] : memref<64x128xbf16, #tpu.memory_space<vmem>>, vector<64x128xbf16>
    %c0_4 = arith.constant 0 : index
    %c0_5 = arith.constant 0 : index
    %5 = vector.load %arg4[%c0_4, %c0_5] : memref<128x128xbf16, #tpu.memory_space<vmem>>, vector<128x128xbf16>
    %cst = arith.constant dense<0.000000e+00> : vector<64x128xf32>
    %6 = tpu.matmul %4, %5, %cst {dimension_numbers = #tpu.dot_dimension_numbers<[1], [0], [0], [1], [0, 0, 1, 1], [], []>} : vector<64x128xbf16>, vector<128x128xbf16>, vector<64x128xf32> -> vector<64x128xf32>
    %7 = arith.addf %3, %6 : vector<64x128xf32>
    %c0_6 = arith.constant 0 : index
    %c0_7 = arith.constant 0 : index
    %8 = vector.load %arg8[%c0_6, %c0_7] : memref<64x128xf32, #tpu.memory_space<vmem>>, vector<64x128xf32>
    tpu.vector_store %arg8[%c0_6, %c0_7], %7 {strides = array<i32>} : memref<64x128xf32, #tpu.memory_space<vmem>>, vector<64x128xf32>,
    %c0_i32_8 = arith.constant 0 : i32
    %9 = arith.cmpi eq, %arg2, %c0_i32_8 : i32
    %10 = arith.extui %9 : i1 to i32
    %c0_i32_9 = arith.constant 0 : i32
    %11 = arith.cmpi ne, %10, %c0_i32_9 : i32
    scf.if %11 {
      %c0_10 = arith.constant 0 : index
      %c0_11 = arith.constant 0 : index
      %12 = vector.load %arg8[%c0_10, %c0_11] : memref<64x128xf32, #tpu.memory_space<vmem>>, vector<64x128xf32>
      %c0_12 = arith.constant 0 : index
      %c0_13 = arith.constant 0 : index
      %13 = vector.load %arg5[%c0_12, %c0_13] : memref<1x128xf32, #tpu.memory_space<vmem>>, vector<1x128xf32>
      %14 = vector.broadcast %13 : vector<1x128xf32> to vector<64x128xf32>
      %15 = arith.mulf %12, %14 : vector<64x128xf32>
      %c0_14 = arith.constant 0 : index
      %c0_15 = arith.constant 0 : index
      %16 = vector.load %arg6[%c0_14, %c0_15] : memref<1x128xf32, #tpu.memory_space<vmem>>, vector<1x128xf32>
      %17 = vector.broadcast %16 : vector<1x128xf32> to vector<64x128xf32>
      %18 = arith.addf %15, %17 : vector<64x128xf32>
      %19 = arith.truncf %18 : vector<64x128xf32> to vector<64x128xbf16>
      %c0_16 = arith.constant 0 : index
      %c0_17 = arith.constant 0 : index
      %20 = vector.load %arg7[%c0_16, %c0_17] : memref<64x128xbf16, #tpu.memory_space<vmem>>, vector<64x128xbf16>
      tpu.vector_store %arg7[%c0_16, %c0_17], %19 {strides = array<i32>} : memref<64x128xbf16, #tpu.memory_space<vmem>>, vector<64x128xbf16>,
    } else {
    }
    return
  }
  func.func @transform_0(%arg0: i32, %arg1: i32, %arg2: i32) -> (i32, i32) {
    %c0_i32 = arith.constant 0 : i32
    return %arg0, %arg2 : i32, i32
  }
  func.func @transform_1(%arg0: i32, %arg1: i32, %arg2: i32) -> (i32, i32) {
    %c0_i32 = arith.constant 0 : i32
    return %arg2, %arg1 : i32, i32
  }
  func.func @transform_2(%arg0: i32, %arg1: i32, %arg2: i32) -> (i32, i32) {
    %c0_i32 = arith.constant 0 : i32
    %c0_i32_0 = arith.constant 0 : i32
    return %c0_i32, %arg1 : i32, i32
  }
  func.func @transform_3(%arg0: i32, %arg1: i32, %arg2: i32) -> (i32, i32) {
    %c0_i32 = arith.constant 0 : i32
    %c0_i32_0 = arith.constant 0 : i32
    return %c0_i32, %arg1 : i32, i32
  }
  func.func @transform_4(%arg0: i32, %arg1: i32, %arg2: i32) -> (i32, i32) {
    %c0_i32 = arith.constant 0 : i32
    return %arg0, %arg1 : i32, i32
  }
}

module attributes {stable_mosaic.version = 11 : i64} {
  func.func @_matmul_kernel(%arg0: i32, %arg1: i32, %arg2: i32, %arg3: memref<64x128xbf16, #tpu.memory_space<vmem>>, %arg4: memref<128x128xbf16, #tpu.memory_space<vmem>>, %arg5: memref<1x128xf32, #tpu.memory_space<vmem>>, %arg6: memref<1x128xf32, #tpu.memory_space<vmem>>, %arg7: memref<64x128xbf16, #tpu.memory_space<vmem>>, %arg8: memref<64x128xbf16, #tpu.memory_space<vmem>>, %arg9: memref<64x128xf32, #tpu.memory_space<vmem>>) attributes {dimension_semantics = [#tpu.dimension_semantics<parallel>, #tpu.dimension_semantics<parallel>, #tpu.dimension_semantics<arbitrary>], iteration_bounds = array<i64: 2, 1, 1>, scalar_prefetch = 0 : i64, scratch_operands = 1 : i64, tpu.core_type = #tpu.core_type<tc>, window_params = [{transform_indices = @transform_0, window_bounds = array<i64: 64, 128>}, {transform_indices = @transform_1, window_bounds = array<i64: 128, 128>}, {transform_indices = @transform_2, window_bounds = array<i64: 1, 128>}, {transform_indices = @transform_3, window_bounds = array<i64: 1, 128>}, {transform_indices = @transform_4, window_bounds = array<i64: 64, 128>}, {transform_indices = @transform_5, window_bounds = array<i64: 64, 128>}]} {
    %c0_i32 = arith.constant 0 : i32
    %0 = arith.cmpi eq, %arg2, %c0_i32 : i32
    %1 = arith.extui %0 : i1 to i32
    %c0_i32_0 = arith.constant 0 : i32
    %2 = arith.cmpi ne, %1, %c0_i32_0 : i32
    scf.if %2 {
      %cst_10 = arith.constant 0.000000e+00 : f32
      %12 = vector.broadcast %cst_10 : f32 to vector<64x128xf32>
      %c0_11 = arith.constant 0 : index
      %c0_12 = arith.constant 0 : index
      %13 = vector.load %arg9[%c0_11, %c0_12] : memref<64x128xf32, #tpu.memory_space<vmem>>, vector<64x128xf32>
      tpu.vector_store %arg9[%c0_11, %c0_12], %12 {strides = array<i32>} : memref<64x128xf32, #tpu.memory_space<vmem>>, vector<64x128xf32>,
    } else {
    }
    %c0 = arith.constant 0 : index
    %c0_1 = arith.constant 0 : index
    %3 = vector.load %arg9[%c0, %c0_1] : memref<64x128xf32, #tpu.memory_space<vmem>>, vector<64x128xf32>
    %c0_2 = arith.constant 0 : index
    %c0_3 = arith.constant 0 : index
    %4 = vector.load %arg3[%c0_2, %c0_3] : memref<64x128xbf16, #tpu.memory_space<vmem>>, vector<64x128xbf16>
    %c0_4 = arith.constant 0 : index
    %c0_5 = arith.constant 0 : index
    %5 = vector.load %arg4[%c0_4, %c0_5] : memref<128x128xbf16, #tpu.memory_space<vmem>>, vector<128x128xbf16>
    %cst = arith.constant dense<0.000000e+00> : vector<64x128xf32>
    %6 = tpu.matmul %4, %5, %cst {dimension_numbers = #tpu.dot_dimension_numbers<[1], [0], [0], [1], [0, 0, 1, 1], [], []>} : vector<64x128xbf16>, vector<128x128xbf16>, vector<64x128xf32> -> vector<64x128xf32>
    %7 = arith.addf %3, %6 : vector<64x128xf32>
    %c0_6 = arith.constant 0 : index
    %c0_7 = arith.constant 0 : index
    %8 = vector.load %arg9[%c0_6, %c0_7] : memref<64x128xf32, #tpu.memory_space<vmem>>, vector<64x128xf32>
    tpu.vector_store %arg9[%c0_6, %c0_7], %7 {strides = array<i32>} : memref<64x128xf32, #tpu.memory_space<vmem>>, vector<64x128xf32>,
    %c0_i32_8 = arith.constant 0 : i32
    %9 = arith.cmpi eq, %arg2, %c0_i32_8 : i32
    %10 = arith.extui %9 : i1 to i32
    %c0_i32_9 = arith.constant 0 : i32
    %11 = arith.cmpi ne, %10, %c0_i32_9 : i32
    scf.if %11 {
      %c0_10 = arith.constant 0 : index
      %c0_11 = arith.constant 0 : index
      %12 = vector.load %arg9[%c0_10, %c0_11] : memref<64x128xf32, #tpu.memory_space<vmem>>, vector<64x128xf32>
      %c0_12 = arith.constant 0 : index
      %c0_13 = arith.constant 0 : index
      %13 = vector.load %arg5[%c0_12, %c0_13] : memref<1x128xf32, #tpu.memory_space<vmem>>, vector<1x128xf32>
      %14 = vector.broadcast %13 : vector<1x128xf32> to vector<64x128xf32>
      %15 = arith.mulf %12, %14 : vector<64x128xf32>
      %c0_14 = arith.constant 0 : index
      %c0_15 = arith.constant 0 : index
      %16 = vector.load %arg6[%c0_14, %c0_15] : memref<1x128xf32, #tpu.memory_space<vmem>>, vector<1x128xf32>
      %17 = vector.broadcast %16 : vector<1x128xf32> to vector<64x128xf32>
      %18 = arith.addf %15, %17 : vector<64x128xf32>
      %c0_16 = arith.constant 0 : index
      %c0_17 = arith.constant 0 : index
      %19 = vector.load %arg7[%c0_16, %c0_17] : memref<64x128xbf16, #tpu.memory_space<vmem>>, vector<64x128xbf16>
      %20 = arith.extf %19 : vector<64x128xbf16> to vector<64x128xf32>
      %21 = arith.addf %18, %20 : vector<64x128xf32>
      %cst_18 = arith.constant 0.000000e+00 : f32
      %22 = vector.broadcast %cst_18 : f32 to vector<64x128xf32>
      %23 = arith.maximumf %21, %22 : vector<64x128xf32>
      %24 = arith.truncf %23 : vector<64x128xf32> to vector<64x128xbf16>
      %c0_19 = arith.constant 0 : index
      %c0_20 = arith.constant 0 : index
      %25 = vector.load %arg8[%c0_19, %c0_20] : memref<64x128xbf16, #tpu.memory_space<vmem>>, vector<64x128xbf16>
      tpu.vector_store %arg8[%c0_19, %c0_20], %24 {strides = array<i32>} : memref<64x128xbf16, #tpu.memory_space<vmem>>, vector<64x128xbf16>,
    } else {
    }
    return
  }
  func.func @transform_0(%arg0: i32, %arg1: i32, %arg2: i32) -> (i32, i32) {
    %c0_i32 = arith.constant 0 : i32
    return %arg0, %arg2 : i32, i32
  }
  func.func @transform_1(%arg0: i32, %arg1: i32, %arg2: i32) -> (i32, i32) {
    %c0_i32 = arith.constant 0 : i32
    return %arg2, %arg1 : i32, i32
  }
  func.func @transform_2(%arg0: i32, %arg1: i32, %arg2: i32) -> (i32, i32) {
    %c0_i32 = arith.constant 0 : i32
    %c0_i32_0 = arith.constant 0 : i32
    return %c0_i32, %arg1 : i32, i32
  }
  func.func @transform_3(%arg0: i32, %arg1: i32, %arg2: i32) -> (i32, i32) {
    %c0_i32 = arith.constant 0 : i32
    %c0_i32_0 = arith.constant 0 : i32
    return %c0_i32, %arg1 : i32, i32
  }
  func.func @transform_4(%arg0: i32, %arg1: i32, %arg2: i32) -> (i32, i32) {
    %c0_i32 = arith.constant 0 : i32
    return %arg0, %arg1 : i32, i32
  }
  func.func @transform_5(%arg0: i32, %arg1: i32, %arg2: i32) -> (i32, i32) {
    %c0_i32 = arith.constant 0 : i32
    return %arg0, %arg1 : i32, i32
  }
}

module attributes {stable_mosaic.version = 11 : i64} {
  func.func @_matmul_kernel(%arg0: i32, %arg1: i32, %arg2: i32, %arg3: memref<16x640xbf16, #tpu.memory_space<vmem>>, %arg4: memref<640x128xbf16, #tpu.memory_space<vmem>>, %arg5: memref<1x128xf32, #tpu.memory_space<vmem>>, %arg6: memref<1x128xf32, #tpu.memory_space<vmem>>, %arg7: memref<16x128xbf16, #tpu.memory_space<vmem>>, %arg8: memref<16x128xf32, #tpu.memory_space<vmem>>) attributes {dimension_semantics = [#tpu.dimension_semantics<parallel>, #tpu.dimension_semantics<parallel>, #tpu.dimension_semantics<arbitrary>], iteration_bounds = array<i64: 2, 1, 1>, scalar_prefetch = 0 : i64, scratch_operands = 1 : i64, tpu.core_type = #tpu.core_type<tc>, window_params = [{transform_indices = @transform_0, window_bounds = array<i64: 16, 640>}, {transform_indices = @transform_1, window_bounds = array<i64: 640, 128>}, {transform_indices = @transform_2, window_bounds = array<i64: 1, 128>}, {transform_indices = @transform_3, window_bounds = array<i64: 1, 128>}, {transform_indices = @transform_4, window_bounds = array<i64: 16, 128>}]} {
    %c0_i32 = arith.constant 0 : i32
    %0 = arith.cmpi eq, %arg2, %c0_i32 : i32
    %1 = arith.extui %0 : i1 to i32
    %c0_i32_0 = arith.constant 0 : i32
    %2 = arith.cmpi ne, %1, %c0_i32_0 : i32
    scf.if %2 {
      %cst_10 = arith.constant 0.000000e+00 : f32
      %12 = vector.broadcast %cst_10 : f32 to vector<16x128xf32>
      %c0_11 = arith.constant 0 : index
      %c0_12 = arith.constant 0 : index
      %13 = vector.load %arg8[%c0_11, %c0_12] : memref<16x128xf32, #tpu.memory_space<vmem>>, vector<16x128xf32>
      tpu.vector_store %arg8[%c0_11, %c0_12], %12 {strides = array<i32>} : memref<16x128xf32, #tpu.memory_space<vmem>>, vector<16x128xf32>,
    } else {
    }
    %c0 = arith.constant 0 : index
    %c0_1 = arith.constant 0 : index
    %3 = vector.load %arg8[%c0, %c0_1] : memref<16x128xf32, #tpu.memory_space<vmem>>, vector<16x128xf32>
    %c0_2 = arith.constant 0 : index
    %c0_3 = arith.constant 0 : index
    %4 = vector.load %arg3[%c0_2, %c0_3] : memref<16x640xbf16, #tpu.memory_space<vmem>>, vector<16x640xbf16>
    %c0_4 = arith.constant 0 : index
    %c0_5 = arith.constant 0 : index
    %5 = vector.load %arg4[%c0_4, %c0_5] : memref<640x128xbf16, #tpu.memory_space<vmem>>, vector<640x128xbf16>
    %cst = arith.constant dense<0.000000e+00> : vector<16x128xf32>
    %6 = tpu.matmul %4, %5, %cst {dimension_numbers = #tpu.dot_dimension_numbers<[1], [0], [0], [1], [0, 0, 1, 1], [], []>} : vector<16x640xbf16>, vector<640x128xbf16>, vector<16x128xf32> -> vector<16x128xf32>
    %7 = arith.addf %3, %6 : vector<16x128xf32>
    %c0_6 = arith.constant 0 : index
    %c0_7 = arith.constant 0 : index
    %8 = vector.load %arg8[%c0_6, %c0_7] : memref<16x128xf32, #tpu.memory_space<vmem>>, vector<16x128xf32>
    tpu.vector_store %arg8[%c0_6, %c0_7], %7 {strides = array<i32>} : memref<16x128xf32, #tpu.memory_space<vmem>>, vector<16x128xf32>,
    %c0_i32_8 = arith.constant 0 : i32
    %9 = arith.cmpi eq, %arg2, %c0_i32_8 : i32
    %10 = arith.extui %9 : i1 to i32
    %c0_i32_9 = arith.constant 0 : i32
    %11 = arith.cmpi ne, %10, %c0_i32_9 : i32
    scf.if %11 {
      %c0_10 = arith.constant 0 : index
      %c0_11 = arith.constant 0 : index
      %12 = vector.load %arg8[%c0_10, %c0_11] : memref<16x128xf32, #tpu.memory_space<vmem>>, vector<16x128xf32>
      %c0_12 = arith.constant 0 : index
      %c0_13 = arith.constant 0 : index
      %13 = vector.load %arg5[%c0_12, %c0_13] : memref<1x128xf32, #tpu.memory_space<vmem>>, vector<1x128xf32>
      %14 = vector.broadcast %13 : vector<1x128xf32> to vector<16x128xf32>
      %15 = arith.mulf %12, %14 : vector<16x128xf32>
      %c0_14 = arith.constant 0 : index
      %c0_15 = arith.constant 0 : index
      %16 = vector.load %arg6[%c0_14, %c0_15] : memref<1x128xf32, #tpu.memory_space<vmem>>, vector<1x128xf32>
      %17 = vector.broadcast %16 : vector<1x128xf32> to vector<16x128xf32>
      %18 = arith.addf %15, %17 : vector<16x128xf32>
      %cst_16 = arith.constant 0.000000e+00 : f32
      %19 = vector.broadcast %cst_16 : f32 to vector<16x128xf32>
      %20 = arith.maximumf %18, %19 : vector<16x128xf32>
      %21 = arith.truncf %20 : vector<16x128xf32> to vector<16x128xbf16>
      %c0_17 = arith.constant 0 : index
      %c0_18 = arith.constant 0 : index
      %22 = vector.load %arg7[%c0_17, %c0_18] : memref<16x128xbf16, #tpu.memory_space<vmem>>, vector<16x128xbf16>
      tpu.vector_store %arg7[%c0_17, %c0_18], %21 {strides = array<i32>} : memref<16x128xbf16, #tpu.memory_space<vmem>>, vector<16x128xbf16>,
    } else {
    }
    return
  }
  func.func @transform_0(%arg0: i32, %arg1: i32, %arg2: i32) -> (i32, i32) {
    %c0_i32 = arith.constant 0 : i32
    return %arg0, %arg2 : i32, i32
  }
  func.func @transform_1(%arg0: i32, %arg1: i32, %arg2: i32) -> (i32, i32) {
    %c0_i32 = arith.constant 0 : i32
    return %arg2, %arg1 : i32, i32
  }
  func.func @transform_2(%arg0: i32, %arg1: i32, %arg2: i32) -> (i32, i32) {
    %c0_i32 = arith.constant 0 : i32
    %c0_i32_0 = arith.constant 0 : i32
    return %c0_i32, %arg1 : i32, i32
  }
  func.func @transform_3(%arg0: i32, %arg1: i32, %arg2: i32) -> (i32, i32) {
    %c0_i32 = arith.constant 0 : i32
    %c0_i32_0 = arith.constant 0 : i32
    return %c0_i32, %arg1 : i32, i32
  }
  func.func @transform_4(%arg0: i32, %arg1: i32, %arg2: i32) -> (i32, i32) {
    %c0_i32 = arith.constant 0 : i32
    return %arg0, %arg1 : i32, i32
  }
}

module attributes {stable_mosaic.version = 11 : i64} {
  func.func @_matmul_kernel(%arg0: i32, %arg1: i32, %arg2: i32, %arg3: memref<16x128xbf16, #tpu.memory_space<vmem>>, %arg4: memref<128x128xbf16, #tpu.memory_space<vmem>>, %arg5: memref<1x128xf32, #tpu.memory_space<vmem>>, %arg6: memref<1x128xf32, #tpu.memory_space<vmem>>, %arg7: memref<16x128xbf16, #tpu.memory_space<vmem>>, %arg8: memref<16x128xf32, #tpu.memory_space<vmem>>) attributes {dimension_semantics = [#tpu.dimension_semantics<parallel>, #tpu.dimension_semantics<parallel>, #tpu.dimension_semantics<arbitrary>], iteration_bounds = array<i64: 2, 1, 1>, scalar_prefetch = 0 : i64, scratch_operands = 1 : i64, tpu.core_type = #tpu.core_type<tc>, window_params = [{transform_indices = @transform_0, window_bounds = array<i64: 16, 128>}, {transform_indices = @transform_1, window_bounds = array<i64: 128, 128>}, {transform_indices = @transform_2, window_bounds = array<i64: 1, 128>}, {transform_indices = @transform_3, window_bounds = array<i64: 1, 128>}, {transform_indices = @transform_4, window_bounds = array<i64: 16, 128>}]} {
    %c0_i32 = arith.constant 0 : i32
    %0 = arith.cmpi eq, %arg2, %c0_i32 : i32
    %1 = arith.extui %0 : i1 to i32
    %c0_i32_0 = arith.constant 0 : i32
    %2 = arith.cmpi ne, %1, %c0_i32_0 : i32
    scf.if %2 {
      %cst_10 = arith.constant 0.000000e+00 : f32
      %12 = vector.broadcast %cst_10 : f32 to vector<16x128xf32>
      %c0_11 = arith.constant 0 : index
      %c0_12 = arith.constant 0 : index
      %13 = vector.load %arg8[%c0_11, %c0_12] : memref<16x128xf32, #tpu.memory_space<vmem>>, vector<16x128xf32>
      tpu.vector_store %arg8[%c0_11, %c0_12], %12 {strides = array<i32>} : memref<16x128xf32, #tpu.memory_space<vmem>>, vector<16x128xf32>,
    } else {
    }
    %c0 = arith.constant 0 : index
    %c0_1 = arith.constant 0 : index
    %3 = vector.load %arg8[%c0, %c0_1] : memref<16x128xf32, #tpu.memory_space<vmem>>, vector<16x128xf32>
    %c0_2 = arith.constant 0 : index
    %c0_3 = arith.constant 0 : index
    %4 = vector.load %arg3[%c0_2, %c0_3] : memref<16x128xbf16, #tpu.memory_space<vmem>>, vector<16x128xbf16>
    %c0_4 = arith.constant 0 : index
    %c0_5 = arith.constant 0 : index
    %5 = vector.load %arg4[%c0_4, %c0_5] : memref<128x128xbf16, #tpu.memory_space<vmem>>, vector<128x128xbf16>
    %cst = arith.constant dense<0.000000e+00> : vector<16x128xf32>
    %6 = tpu.matmul %4, %5, %cst {dimension_numbers = #tpu.dot_dimension_numbers<[1], [0], [0], [1], [0, 0, 1, 1], [], []>} : vector<16x128xbf16>, vector<128x128xbf16>, vector<16x128xf32> -> vector<16x128xf32>
    %7 = arith.addf %3, %6 : vector<16x128xf32>
    %c0_6 = arith.constant 0 : index
    %c0_7 = arith.constant 0 : index
    %8 = vector.load %arg8[%c0_6, %c0_7] : memref<16x128xf32, #tpu.memory_space<vmem>>, vector<16x128xf32>
    tpu.vector_store %arg8[%c0_6, %c0_7], %7 {strides = array<i32>} : memref<16x128xf32, #tpu.memory_space<vmem>>, vector<16x128xf32>,
    %c0_i32_8 = arith.constant 0 : i32
    %9 = arith.cmpi eq, %arg2, %c0_i32_8 : i32
    %10 = arith.extui %9 : i1 to i32
    %c0_i32_9 = arith.constant 0 : i32
    %11 = arith.cmpi ne, %10, %c0_i32_9 : i32
    scf.if %11 {
      %c0_10 = arith.constant 0 : index
      %c0_11 = arith.constant 0 : index
      %12 = vector.load %arg8[%c0_10, %c0_11] : memref<16x128xf32, #tpu.memory_space<vmem>>, vector<16x128xf32>
      %c0_12 = arith.constant 0 : index
      %c0_13 = arith.constant 0 : index
      %13 = vector.load %arg5[%c0_12, %c0_13] : memref<1x128xf32, #tpu.memory_space<vmem>>, vector<1x128xf32>
      %14 = vector.broadcast %13 : vector<1x128xf32> to vector<16x128xf32>
      %15 = arith.mulf %12, %14 : vector<16x128xf32>
      %c0_14 = arith.constant 0 : index
      %c0_15 = arith.constant 0 : index
      %16 = vector.load %arg6[%c0_14, %c0_15] : memref<1x128xf32, #tpu.memory_space<vmem>>, vector<1x128xf32>
      %17 = vector.broadcast %16 : vector<1x128xf32> to vector<16x128xf32>
      %18 = arith.addf %15, %17 : vector<16x128xf32>
      %19 = arith.truncf %18 : vector<16x128xf32> to vector<16x128xbf16>
      %c0_16 = arith.constant 0 : index
      %c0_17 = arith.constant 0 : index
      %20 = vector.load %arg7[%c0_16, %c0_17] : memref<16x128xbf16, #tpu.memory_space<vmem>>, vector<16x128xbf16>
      tpu.vector_store %arg7[%c0_16, %c0_17], %19 {strides = array<i32>} : memref<16x128xbf16, #tpu.memory_space<vmem>>, vector<16x128xbf16>,
    } else {
    }
    return
  }
  func.func @transform_0(%arg0: i32, %arg1: i32, %arg2: i32) -> (i32, i32) {
    %c0_i32 = arith.constant 0 : i32
    return %arg0, %arg2 : i32, i32
  }
  func.func @transform_1(%arg0: i32, %arg1: i32, %arg2: i32) -> (i32, i32) {
    %c0_i32 = arith.constant 0 : i32
    return %arg2, %arg1 : i32, i32
  }
  func.func @transform_2(%arg0: i32, %arg1: i32, %arg2: i32) -> (i32, i32) {
    %c0_i32 = arith.constant 0 : i32
    %c0_i32_0 = arith.constant 0 : i32
    return %c0_i32, %arg1 : i32, i32
  }
  func.func @transform_3(%arg0: i32, %arg1: i32, %arg2: i32) -> (i32, i32) {
    %c0_i32 = arith.constant 0 : i32
    %c0_i32_0 = arith.constant 0 : i32
    return %c0_i32, %arg1 : i32, i32
  }
  func.func @transform_4(%arg0: i32, %arg1: i32, %arg2: i32) -> (i32, i32) {
    %c0_i32 = arith.constant 0 : i32
    return %arg0, %arg1 : i32, i32
  }
}

module attributes {stable_mosaic.version = 11 : i64} {
  func.func @_matmul_kernel(%arg0: i32, %arg1: i32, %arg2: i32, %arg3: memref<16x128xbf16, #tpu.memory_space<vmem>>, %arg4: memref<128x128xbf16, #tpu.memory_space<vmem>>, %arg5: memref<1x128xf32, #tpu.memory_space<vmem>>, %arg6: memref<1x128xf32, #tpu.memory_space<vmem>>, %arg7: memref<16x128xbf16, #tpu.memory_space<vmem>>, %arg8: memref<16x128xbf16, #tpu.memory_space<vmem>>, %arg9: memref<16x128xf32, #tpu.memory_space<vmem>>) attributes {dimension_semantics = [#tpu.dimension_semantics<parallel>, #tpu.dimension_semantics<parallel>, #tpu.dimension_semantics<arbitrary>], iteration_bounds = array<i64: 2, 1, 1>, scalar_prefetch = 0 : i64, scratch_operands = 1 : i64, tpu.core_type = #tpu.core_type<tc>, window_params = [{transform_indices = @transform_0, window_bounds = array<i64: 16, 128>}, {transform_indices = @transform_1, window_bounds = array<i64: 128, 128>}, {transform_indices = @transform_2, window_bounds = array<i64: 1, 128>}, {transform_indices = @transform_3, window_bounds = array<i64: 1, 128>}, {transform_indices = @transform_4, window_bounds = array<i64: 16, 128>}, {transform_indices = @transform_5, window_bounds = array<i64: 16, 128>}]} {
    %c0_i32 = arith.constant 0 : i32
    %0 = arith.cmpi eq, %arg2, %c0_i32 : i32
    %1 = arith.extui %0 : i1 to i32
    %c0_i32_0 = arith.constant 0 : i32
    %2 = arith.cmpi ne, %1, %c0_i32_0 : i32
    scf.if %2 {
      %cst_10 = arith.constant 0.000000e+00 : f32
      %12 = vector.broadcast %cst_10 : f32 to vector<16x128xf32>
      %c0_11 = arith.constant 0 : index
      %c0_12 = arith.constant 0 : index
      %13 = vector.load %arg9[%c0_11, %c0_12] : memref<16x128xf32, #tpu.memory_space<vmem>>, vector<16x128xf32>
      tpu.vector_store %arg9[%c0_11, %c0_12], %12 {strides = array<i32>} : memref<16x128xf32, #tpu.memory_space<vmem>>, vector<16x128xf32>,
    } else {
    }
    %c0 = arith.constant 0 : index
    %c0_1 = arith.constant 0 : index
    %3 = vector.load %arg9[%c0, %c0_1] : memref<16x128xf32, #tpu.memory_space<vmem>>, vector<16x128xf32>
    %c0_2 = arith.constant 0 : index
    %c0_3 = arith.constant 0 : index
    %4 = vector.load %arg3[%c0_2, %c0_3] : memref<16x128xbf16, #tpu.memory_space<vmem>>, vector<16x128xbf16>
    %c0_4 = arith.constant 0 : index
    %c0_5 = arith.constant 0 : index
    %5 = vector.load %arg4[%c0_4, %c0_5] : memref<128x128xbf16, #tpu.memory_space<vmem>>, vector<128x128xbf16>
    %cst = arith.constant dense<0.000000e+00> : vector<16x128xf32>
    %6 = tpu.matmul %4, %5, %cst {dimension_numbers = #tpu.dot_dimension_numbers<[1], [0], [0], [1], [0, 0, 1, 1], [], []>} : vector<16x128xbf16>, vector<128x128xbf16>, vector<16x128xf32> -> vector<16x128xf32>
    %7 = arith.addf %3, %6 : vector<16x128xf32>
    %c0_6 = arith.constant 0 : index
    %c0_7 = arith.constant 0 : index
    %8 = vector.load %arg9[%c0_6, %c0_7] : memref<16x128xf32, #tpu.memory_space<vmem>>, vector<16x128xf32>
    tpu.vector_store %arg9[%c0_6, %c0_7], %7 {strides = array<i32>} : memref<16x128xf32, #tpu.memory_space<vmem>>, vector<16x128xf32>,
    %c0_i32_8 = arith.constant 0 : i32
    %9 = arith.cmpi eq, %arg2, %c0_i32_8 : i32
    %10 = arith.extui %9 : i1 to i32
    %c0_i32_9 = arith.constant 0 : i32
    %11 = arith.cmpi ne, %10, %c0_i32_9 : i32
    scf.if %11 {
      %c0_10 = arith.constant 0 : index
      %c0_11 = arith.constant 0 : index
      %12 = vector.load %arg9[%c0_10, %c0_11] : memref<16x128xf32, #tpu.memory_space<vmem>>, vector<16x128xf32>
      %c0_12 = arith.constant 0 : index
      %c0_13 = arith.constant 0 : index
      %13 = vector.load %arg5[%c0_12, %c0_13] : memref<1x128xf32, #tpu.memory_space<vmem>>, vector<1x128xf32>
      %14 = vector.broadcast %13 : vector<1x128xf32> to vector<16x128xf32>
      %15 = arith.mulf %12, %14 : vector<16x128xf32>
      %c0_14 = arith.constant 0 : index
      %c0_15 = arith.constant 0 : index
      %16 = vector.load %arg6[%c0_14, %c0_15] : memref<1x128xf32, #tpu.memory_space<vmem>>, vector<1x128xf32>
      %17 = vector.broadcast %16 : vector<1x128xf32> to vector<16x128xf32>
      %18 = arith.addf %15, %17 : vector<16x128xf32>
      %c0_16 = arith.constant 0 : index
      %c0_17 = arith.constant 0 : index
      %19 = vector.load %arg7[%c0_16, %c0_17] : memref<16x128xbf16, #tpu.memory_space<vmem>>, vector<16x128xbf16>
      %20 = arith.extf %19 : vector<16x128xbf16> to vector<16x128xf32>
      %21 = arith.addf %18, %20 : vector<16x128xf32>
      %cst_18 = arith.constant 0.000000e+00 : f32
      %22 = vector.broadcast %cst_18 : f32 to vector<16x128xf32>
      %23 = arith.maximumf %21, %22 : vector<16x128xf32>
      %24 = arith.truncf %23 : vector<16x128xf32> to vector<16x128xbf16>
      %c0_19 = arith.constant 0 : index
      %c0_20 = arith.constant 0 : index
      %25 = vector.load %arg8[%c0_19, %c0_20] : memref<16x128xbf16, #tpu.memory_space<vmem>>, vector<16x128xbf16>
      tpu.vector_store %arg8[%c0_19, %c0_20], %24 {strides = array<i32>} : memref<16x128xbf16, #tpu.memory_space<vmem>>, vector<16x128xbf16>,
    } else {
    }
    return
  }
  func.func @transform_0(%arg0: i32, %arg1: i32, %arg2: i32) -> (i32, i32) {
    %c0_i32 = arith.constant 0 : i32
    return %arg0, %arg2 : i32, i32
  }
  func.func @transform_1(%arg0: i32, %arg1: i32, %arg2: i32) -> (i32, i32) {
    %c0_i32 = arith.constant 0 : i32
    return %arg2, %arg1 : i32, i32
  }
  func.func @transform_2(%arg0: i32, %arg1: i32, %arg2: i32) -> (i32, i32) {
    %c0_i32 = arith.constant 0 : i32
    %c0_i32_0 = arith.constant 0 : i32
    return %c0_i32, %arg1 : i32, i32
  }
  func.func @transform_3(%arg0: i32, %arg1: i32, %arg2: i32) -> (i32, i32) {
    %c0_i32 = arith.constant 0 : i32
    %c0_i32_0 = arith.constant 0 : i32
    return %c0_i32, %arg1 : i32, i32
  }
  func.func @transform_4(%arg0: i32, %arg1: i32, %arg2: i32) -> (i32, i32) {
    %c0_i32 = arith.constant 0 : i32
    return %arg0, %arg1 : i32, i32
  }
  func.func @transform_5(%arg0: i32, %arg1: i32, %arg2: i32) -> (i32, i32) {
    %c0_i32 = arith.constant 0 : i32
    return %arg0, %arg1 : i32, i32
  }
}

module attributes {stable_mosaic.version = 11 : i64} {
  func.func @_matmul_kernel(%arg0: i32, %arg1: i32, %arg2: i32, %arg3: memref<16x128xbf16, #tpu.memory_space<vmem>>, %arg4: memref<128x128xbf16, #tpu.memory_space<vmem>>, %arg5: memref<1x128xf32, #tpu.memory_space<vmem>>, %arg6: memref<1x128xf32, #tpu.memory_space<vmem>>, %arg7: memref<16x128xbf16, #tpu.memory_space<vmem>>, %arg8: memref<16x128xf32, #tpu.memory_space<vmem>>) attributes {dimension_semantics = [#tpu.dimension_semantics<parallel>, #tpu.dimension_semantics<parallel>, #tpu.dimension_semantics<arbitrary>], iteration_bounds = array<i64: 2, 1, 1>, scalar_prefetch = 0 : i64, scratch_operands = 1 : i64, tpu.core_type = #tpu.core_type<tc>, window_params = [{transform_indices = @transform_0, window_bounds = array<i64: 16, 128>}, {transform_indices = @transform_1, window_bounds = array<i64: 128, 128>}, {transform_indices = @transform_2, window_bounds = array<i64: 1, 128>}, {transform_indices = @transform_3, window_bounds = array<i64: 1, 128>}, {transform_indices = @transform_4, window_bounds = array<i64: 16, 128>}]} {
    %c0_i32 = arith.constant 0 : i32
    %0 = arith.cmpi eq, %arg2, %c0_i32 : i32
    %1 = arith.extui %0 : i1 to i32
    %c0_i32_0 = arith.constant 0 : i32
    %2 = arith.cmpi ne, %1, %c0_i32_0 : i32
    scf.if %2 {
      %cst_10 = arith.constant 0.000000e+00 : f32
      %12 = vector.broadcast %cst_10 : f32 to vector<16x128xf32>
      %c0_11 = arith.constant 0 : index
      %c0_12 = arith.constant 0 : index
      %13 = vector.load %arg8[%c0_11, %c0_12] : memref<16x128xf32, #tpu.memory_space<vmem>>, vector<16x128xf32>
      tpu.vector_store %arg8[%c0_11, %c0_12], %12 {strides = array<i32>} : memref<16x128xf32, #tpu.memory_space<vmem>>, vector<16x128xf32>,
    } else {
    }
    %c0 = arith.constant 0 : index
    %c0_1 = arith.constant 0 : index
    %3 = vector.load %arg8[%c0, %c0_1] : memref<16x128xf32, #tpu.memory_space<vmem>>, vector<16x128xf32>
    %c0_2 = arith.constant 0 : index
    %c0_3 = arith.constant 0 : index
    %4 = vector.load %arg3[%c0_2, %c0_3] : memref<16x128xbf16, #tpu.memory_space<vmem>>, vector<16x128xbf16>
    %c0_4 = arith.constant 0 : index
    %c0_5 = arith.constant 0 : index
    %5 = vector.load %arg4[%c0_4, %c0_5] : memref<128x128xbf16, #tpu.memory_space<vmem>>, vector<128x128xbf16>
    %cst = arith.constant dense<0.000000e+00> : vector<16x128xf32>
    %6 = tpu.matmul %4, %5, %cst {dimension_numbers = #tpu.dot_dimension_numbers<[1], [0], [0], [1], [0, 0, 1, 1], [], []>} : vector<16x128xbf16>, vector<128x128xbf16>, vector<16x128xf32> -> vector<16x128xf32>
    %7 = arith.addf %3, %6 : vector<16x128xf32>
    %c0_6 = arith.constant 0 : index
    %c0_7 = arith.constant 0 : index
    %8 = vector.load %arg8[%c0_6, %c0_7] : memref<16x128xf32, #tpu.memory_space<vmem>>, vector<16x128xf32>
    tpu.vector_store %arg8[%c0_6, %c0_7], %7 {strides = array<i32>} : memref<16x128xf32, #tpu.memory_space<vmem>>, vector<16x128xf32>,
    %c0_i32_8 = arith.constant 0 : i32
    %9 = arith.cmpi eq, %arg2, %c0_i32_8 : i32
    %10 = arith.extui %9 : i1 to i32
    %c0_i32_9 = arith.constant 0 : i32
    %11 = arith.cmpi ne, %10, %c0_i32_9 : i32
    scf.if %11 {
      %c0_10 = arith.constant 0 : index
      %c0_11 = arith.constant 0 : index
      %12 = vector.load %arg8[%c0_10, %c0_11] : memref<16x128xf32, #tpu.memory_space<vmem>>, vector<16x128xf32>
      %c0_12 = arith.constant 0 : index
      %c0_13 = arith.constant 0 : index
      %13 = vector.load %arg5[%c0_12, %c0_13] : memref<1x128xf32, #tpu.memory_space<vmem>>, vector<1x128xf32>
      %14 = vector.broadcast %13 : vector<1x128xf32> to vector<16x128xf32>
      %15 = arith.mulf %12, %14 : vector<16x128xf32>
      %c0_14 = arith.constant 0 : index
      %c0_15 = arith.constant 0 : index
      %16 = vector.load %arg6[%c0_14, %c0_15] : memref<1x128xf32, #tpu.memory_space<vmem>>, vector<1x128xf32>
      %17 = vector.broadcast %16 : vector<1x128xf32> to vector<16x128xf32>
      %18 = arith.addf %15, %17 : vector<16x128xf32>
      %cst_16 = arith.constant 0.000000e+00 : f32
      %19 = vector.broadcast %cst_16 : f32 to vector<16x128xf32>
      %20 = arith.maximumf %18, %19 : vector<16x128xf32>
      %21 = arith.truncf %20 : vector<16x128xf32> to vector<16x128xbf16>
      %c0_17 = arith.constant 0 : index
      %c0_18 = arith.constant 0 : index
      %22 = vector.load %arg7[%c0_17, %c0_18] : memref<16x128xbf16, #tpu.memory_space<vmem>>, vector<16x128xbf16>
      tpu.vector_store %arg7[%c0_17, %c0_18], %21 {strides = array<i32>} : memref<16x128xbf16, #tpu.memory_space<vmem>>, vector<16x128xbf16>,
    } else {
    }
    return
  }
  func.func @transform_0(%arg0: i32, %arg1: i32, %arg2: i32) -> (i32, i32) {
    %c0_i32 = arith.constant 0 : i32
    return %arg0, %arg2 : i32, i32
  }
  func.func @transform_1(%arg0: i32, %arg1: i32, %arg2: i32) -> (i32, i32) {
    %c0_i32 = arith.constant 0 : i32
    return %arg2, %arg1 : i32, i32
  }
  func.func @transform_2(%arg0: i32, %arg1: i32, %arg2: i32) -> (i32, i32) {
    %c0_i32 = arith.constant 0 : i32
    %c0_i32_0 = arith.constant 0 : i32
    return %c0_i32, %arg1 : i32, i32
  }
  func.func @transform_3(%arg0: i32, %arg1: i32, %arg2: i32) -> (i32, i32) {
    %c0_i32 = arith.constant 0 : i32
    %c0_i32_0 = arith.constant 0 : i32
    return %c0_i32, %arg1 : i32, i32
  }
  func.func @transform_4(%arg0: i32, %arg1: i32, %arg2: i32) -> (i32, i32) {
    %c0_i32 = arith.constant 0 : i32
    return %arg0, %arg1 : i32, i32
  }
}

module attributes {stable_mosaic.version = 11 : i64} {
  func.func @_matmul_kernel(%arg0: i32, %arg1: i32, %arg2: i32, %arg3: memref<8x128xbf16, #tpu.memory_space<vmem>>, %arg4: memref<128x128xbf16, #tpu.memory_space<vmem>>, %arg5: memref<1x128xf32, #tpu.memory_space<vmem>>, %arg6: memref<1x128xf32, #tpu.memory_space<vmem>>, %arg7: memref<8x128xbf16, #tpu.memory_space<vmem>>, %arg8: memref<8x128xf32, #tpu.memory_space<vmem>>) attributes {dimension_semantics = [#tpu.dimension_semantics<parallel>, #tpu.dimension_semantics<parallel>, #tpu.dimension_semantics<arbitrary>], iteration_bounds = array<i64: 1, 1, 9>, scalar_prefetch = 0 : i64, scratch_operands = 1 : i64, tpu.core_type = #tpu.core_type<tc>, window_params = [{transform_indices = @transform_0, window_bounds = array<i64: 8, 128>}, {transform_indices = @transform_1, window_bounds = array<i64: 128, 128>}, {transform_indices = @transform_2, window_bounds = array<i64: 1, 128>}, {transform_indices = @transform_3, window_bounds = array<i64: 1, 128>}, {transform_indices = @transform_4, window_bounds = array<i64: 8, 128>}]} {
    %c0_i32 = arith.constant 0 : i32
    %0 = arith.cmpi eq, %arg2, %c0_i32 : i32
    %1 = arith.extui %0 : i1 to i32
    %c0_i32_0 = arith.constant 0 : i32
    %2 = arith.cmpi ne, %1, %c0_i32_0 : i32
    scf.if %2 {
      %cst_9 = arith.constant 0.000000e+00 : f32
      %12 = vector.broadcast %cst_9 : f32 to vector<8x128xf32>
      %c0_10 = arith.constant 0 : index
      %c0_11 = arith.constant 0 : index
      %13 = vector.load %arg8[%c0_10, %c0_11] : memref<8x128xf32, #tpu.memory_space<vmem>>, vector<8x128xf32>
      tpu.vector_store %arg8[%c0_10, %c0_11], %12 {strides = array<i32>} : memref<8x128xf32, #tpu.memory_space<vmem>>, vector<8x128xf32>,
    } else {
    }
    %c0 = arith.constant 0 : index
    %c0_1 = arith.constant 0 : index
    %3 = vector.load %arg8[%c0, %c0_1] : memref<8x128xf32, #tpu.memory_space<vmem>>, vector<8x128xf32>
    %c0_2 = arith.constant 0 : index
    %c0_3 = arith.constant 0 : index
    %4 = vector.load %arg3[%c0_2, %c0_3] : memref<8x128xbf16, #tpu.memory_space<vmem>>, vector<8x128xbf16>
    %c0_4 = arith.constant 0 : index
    %c0_5 = arith.constant 0 : index
    %5 = vector.load %arg4[%c0_4, %c0_5] : memref<128x128xbf16, #tpu.memory_space<vmem>>, vector<128x128xbf16>
    %cst = arith.constant dense<0.000000e+00> : vector<8x128xf32>
    %6 = tpu.matmul %4, %5, %cst {dimension_numbers = #tpu.dot_dimension_numbers<[1], [0], [0], [1], [0, 0, 1, 1], [], []>} : vector<8x128xbf16>, vector<128x128xbf16>, vector<8x128xf32> -> vector<8x128xf32>
    %7 = arith.addf %3, %6 : vector<8x128xf32>
    %c0_6 = arith.constant 0 : index
    %c0_7 = arith.constant 0 : index
    %8 = vector.load %arg8[%c0_6, %c0_7] : memref<8x128xf32, #tpu.memory_space<vmem>>, vector<8x128xf32>
    tpu.vector_store %arg8[%c0_6, %c0_7], %7 {strides = array<i32>} : memref<8x128xf32, #tpu.memory_space<vmem>>, vector<8x128xf32>,
    %c8_i32 = arith.constant 8 : i32
    %9 = arith.cmpi eq, %arg2, %c8_i32 : i32
    %10 = arith.extui %9 : i1 to i32
    %c0_i32_8 = arith.constant 0 : i32
    %11 = arith.cmpi ne, %10, %c0_i32_8 : i32
    scf.if %11 {
      %c0_9 = arith.constant 0 : index
      %c0_10 = arith.constant 0 : index
      %12 = vector.load %arg8[%c0_9, %c0_10] : memref<8x128xf32, #tpu.memory_space<vmem>>, vector<8x128xf32>
      %c0_11 = arith.constant 0 : index
      %c0_12 = arith.constant 0 : index
      %13 = vector.load %arg5[%c0_11, %c0_12] : memref<1x128xf32, #tpu.memory_space<vmem>>, vector<1x128xf32>
      %14 = vector.broadcast %13 : vector<1x128xf32> to vector<8x128xf32>
      %15 = arith.mulf %12, %14 : vector<8x128xf32>
      %c0_13 = arith.constant 0 : index
      %c0_14 = arith.constant 0 : index
      %16 = vector.load %arg6[%c0_13, %c0_14] : memref<1x128xf32, #tpu.memory_space<vmem>>, vector<1x128xf32>
      %17 = vector.broadcast %16 : vector<1x128xf32> to vector<8x128xf32>
      %18 = arith.addf %15, %17 : vector<8x128xf32>
      %cst_15 = arith.constant 0.000000e+00 : f32
      %19 = vector.broadcast %cst_15 : f32 to vector<8x128xf32>
      %20 = arith.maximumf %18, %19 : vector<8x128xf32>
      %21 = arith.truncf %20 : vector<8x128xf32> to vector<8x128xbf16>
      %c0_16 = arith.constant 0 : index
      %c0_17 = arith.constant 0 : index
      %22 = vector.load %arg7[%c0_16, %c0_17] : memref<8x128xbf16, #tpu.memory_space<vmem>>, vector<8x128xbf16>
      tpu.vector_store %arg7[%c0_16, %c0_17], %21 {strides = array<i32>} : memref<8x128xbf16, #tpu.memory_space<vmem>>, vector<8x128xbf16>,
    } else {
    }
    return
  }
  func.func @transform_0(%arg0: i32, %arg1: i32, %arg2: i32) -> (i32, i32) {
    %c1_i32 = arith.constant 1 : i32
    %0 = arith.muli %arg2, %c1_i32 : i32
    %1 = arith.addi %0, %arg1 : i32
    %c0_i32 = arith.constant 0 : i32
    return %arg0, %1 : i32, i32
  }
  func.func @transform_1(%arg0: i32, %arg1: i32, %arg2: i32) -> (i32, i32) {
    %c0_i32 = arith.constant 0 : i32
    return %arg2, %arg1 : i32, i32
  }
  func.func @transform_2(%arg0: i32, %arg1: i32, %arg2: i32) -> (i32, i32) {
    %c0_i32 = arith.constant 0 : i32
    %c0_i32_0 = arith.constant 0 : i32
    return %c0_i32, %arg1 : i32, i32
  }
  func.func @transform_3(%arg0: i32, %arg1: i32, %arg2: i32) -> (i32, i32) {
    %c0_i32 = arith.constant 0 : i32
    %c0_i32_0 = arith.constant 0 : i32
    return %c0_i32, %arg1 : i32, i32
  }
  func.func @transform_4(%arg0: i32, %arg1: i32, %arg2: i32) -> (i32, i32) {
    %c0_i32 = arith.constant 0 : i32
    return %arg0, %arg1 : i32, i32
  }
}

module attributes {stable_mosaic.version = 11 : i64} {
  func.func @_matmul_kernel(%arg0: i32, %arg1: i32, %arg2: i32, %arg3: memref<8x128xbf16, #tpu.memory_space<vmem>>, %arg4: memref<128x256xbf16, #tpu.memory_space<vmem>>, %arg5: memref<1x256xf32, #tpu.memory_space<vmem>>, %arg6: memref<1x256xf32, #tpu.memory_space<vmem>>, %arg7: memref<8x256xbf16, #tpu.memory_space<vmem>>, %arg8: memref<8x256xf32, #tpu.memory_space<vmem>>) attributes {dimension_semantics = [#tpu.dimension_semantics<parallel>, #tpu.dimension_semantics<parallel>, #tpu.dimension_semantics<arbitrary>], iteration_bounds = array<i64: 1, 1, 1>, scalar_prefetch = 0 : i64, scratch_operands = 1 : i64, tpu.core_type = #tpu.core_type<tc>, window_params = [{transform_indices = @transform_0, window_bounds = array<i64: 8, 128>}, {transform_indices = @transform_1, window_bounds = array<i64: 128, 256>}, {transform_indices = @transform_2, window_bounds = array<i64: 1, 256>}, {transform_indices = @transform_3, window_bounds = array<i64: 1, 256>}, {transform_indices = @transform_4, window_bounds = array<i64: 8, 256>}]} {
    %c0_i32 = arith.constant 0 : i32
    %0 = arith.cmpi eq, %arg2, %c0_i32 : i32
    %1 = arith.extui %0 : i1 to i32
    %c0_i32_0 = arith.constant 0 : i32
    %2 = arith.cmpi ne, %1, %c0_i32_0 : i32
    scf.if %2 {
      %cst_10 = arith.constant 0.000000e+00 : f32
      %12 = vector.broadcast %cst_10 : f32 to vector<8x256xf32>
      %c0_11 = arith.constant 0 : index
      %c0_12 = arith.constant 0 : index
      %13 = vector.load %arg8[%c0_11, %c0_12] : memref<8x256xf32, #tpu.memory_space<vmem>>, vector<8x256xf32>
      tpu.vector_store %arg8[%c0_11, %c0_12], %12 {strides = array<i32>} : memref<8x256xf32, #tpu.memory_space<vmem>>, vector<8x256xf32>,
    } else {
    }
    %c0 = arith.constant 0 : index
    %c0_1 = arith.constant 0 : index
    %3 = vector.load %arg8[%c0, %c0_1] : memref<8x256xf32, #tpu.memory_space<vmem>>, vector<8x256xf32>
    %c0_2 = arith.constant 0 : index
    %c0_3 = arith.constant 0 : index
    %4 = vector.load %arg3[%c0_2, %c0_3] : memref<8x128xbf16, #tpu.memory_space<vmem>>, vector<8x128xbf16>
    %c0_4 = arith.constant 0 : index
    %c0_5 = arith.constant 0 : index
    %5 = vector.load %arg4[%c0_4, %c0_5] : memref<128x256xbf16, #tpu.memory_space<vmem>>, vector<128x256xbf16>
    %cst = arith.constant dense<0.000000e+00> : vector<8x256xf32>
    %6 = tpu.matmul %4, %5, %cst {dimension_numbers = #tpu.dot_dimension_numbers<[1], [0], [0], [1], [0, 0, 1, 1], [], []>} : vector<8x128xbf16>, vector<128x256xbf16>, vector<8x256xf32> -> vector<8x256xf32>
    %7 = arith.addf %3, %6 : vector<8x256xf32>
    %c0_6 = arith.constant 0 : index
    %c0_7 = arith.constant 0 : index
    %8 = vector.load %arg8[%c0_6, %c0_7] : memref<8x256xf32, #tpu.memory_space<vmem>>, vector<8x256xf32>
    tpu.vector_store %arg8[%c0_6, %c0_7], %7 {strides = array<i32>} : memref<8x256xf32, #tpu.memory_space<vmem>>, vector<8x256xf32>,
    %c0_i32_8 = arith.constant 0 : i32
    %9 = arith.cmpi eq, %arg2, %c0_i32_8 : i32
    %10 = arith.extui %9 : i1 to i32
    %c0_i32_9 = arith.constant 0 : i32
    %11 = arith.cmpi ne, %10, %c0_i32_9 : i32
    scf.if %11 {
      %c0_10 = arith.constant 0 : index
      %c0_11 = arith.constant 0 : index
      %12 = vector.load %arg8[%c0_10, %c0_11] : memref<8x256xf32, #tpu.memory_space<vmem>>, vector<8x256xf32>
      %c0_12 = arith.constant 0 : index
      %c0_13 = arith.constant 0 : index
      %13 = vector.load %arg5[%c0_12, %c0_13] : memref<1x256xf32, #tpu.memory_space<vmem>>, vector<1x256xf32>
      %14 = vector.broadcast %13 : vector<1x256xf32> to vector<8x256xf32>
      %15 = arith.mulf %12, %14 : vector<8x256xf32>
      %c0_14 = arith.constant 0 : index
      %c0_15 = arith.constant 0 : index
      %16 = vector.load %arg6[%c0_14, %c0_15] : memref<1x256xf32, #tpu.memory_space<vmem>>, vector<1x256xf32>
      %17 = vector.broadcast %16 : vector<1x256xf32> to vector<8x256xf32>
      %18 = arith.addf %15, %17 : vector<8x256xf32>
      %19 = arith.truncf %18 : vector<8x256xf32> to vector<8x256xbf16>
      %c0_16 = arith.constant 0 : index
      %c0_17 = arith.constant 0 : index
      %20 = vector.load %arg7[%c0_16, %c0_17] : memref<8x256xbf16, #tpu.memory_space<vmem>>, vector<8x256xbf16>
      tpu.vector_store %arg7[%c0_16, %c0_17], %19 {strides = array<i32>} : memref<8x256xbf16, #tpu.memory_space<vmem>>, vector<8x256xbf16>,
    } else {
    }
    return
  }
  func.func @transform_0(%arg0: i32, %arg1: i32, %arg2: i32) -> (i32, i32) {
    %c0_i32 = arith.constant 0 : i32
    return %arg0, %arg2 : i32, i32
  }
  func.func @transform_1(%arg0: i32, %arg1: i32, %arg2: i32) -> (i32, i32) {
    %c0_i32 = arith.constant 0 : i32
    return %arg2, %arg1 : i32, i32
  }
  func.func @transform_2(%arg0: i32, %arg1: i32, %arg2: i32) -> (i32, i32) {
    %c0_i32 = arith.constant 0 : i32
    %c0_i32_0 = arith.constant 0 : i32
    return %c0_i32, %arg1 : i32, i32
  }
  func.func @transform_3(%arg0: i32, %arg1: i32, %arg2: i32) -> (i32, i32) {
    %c0_i32 = arith.constant 0 : i32
    %c0_i32_0 = arith.constant 0 : i32
    return %c0_i32, %arg1 : i32, i32
  }
  func.func @transform_4(%arg0: i32, %arg1: i32, %arg2: i32) -> (i32, i32) {
    %c0_i32 = arith.constant 0 : i32
    return %arg0, %arg1 : i32, i32
  }
}

module attributes {stable_mosaic.version = 11 : i64} {
  func.func @_matmul_kernel(%arg0: i32, %arg1: i32, %arg2: i32, %arg3: memref<8x128xbf16, #tpu.memory_space<vmem>>, %arg4: memref<128x256xbf16, #tpu.memory_space<vmem>>, %arg5: memref<1x256xf32, #tpu.memory_space<vmem>>, %arg6: memref<1x256xf32, #tpu.memory_space<vmem>>, %arg7: memref<8x256xbf16, #tpu.memory_space<vmem>>, %arg8: memref<8x256xbf16, #tpu.memory_space<vmem>>, %arg9: memref<8x256xf32, #tpu.memory_space<vmem>>) attributes {dimension_semantics = [#tpu.dimension_semantics<parallel>, #tpu.dimension_semantics<parallel>, #tpu.dimension_semantics<arbitrary>], iteration_bounds = array<i64: 1, 1, 1>, scalar_prefetch = 0 : i64, scratch_operands = 1 : i64, tpu.core_type = #tpu.core_type<tc>, window_params = [{transform_indices = @transform_0, window_bounds = array<i64: 8, 128>}, {transform_indices = @transform_1, window_bounds = array<i64: 128, 256>}, {transform_indices = @transform_2, window_bounds = array<i64: 1, 256>}, {transform_indices = @transform_3, window_bounds = array<i64: 1, 256>}, {transform_indices = @transform_4, window_bounds = array<i64: 8, 256>}, {transform_indices = @transform_5, window_bounds = array<i64: 8, 256>}]} {
    %c0_i32 = arith.constant 0 : i32
    %0 = arith.cmpi eq, %arg2, %c0_i32 : i32
    %1 = arith.extui %0 : i1 to i32
    %c0_i32_0 = arith.constant 0 : i32
    %2 = arith.cmpi ne, %1, %c0_i32_0 : i32
    scf.if %2 {
      %cst_10 = arith.constant 0.000000e+00 : f32
      %12 = vector.broadcast %cst_10 : f32 to vector<8x256xf32>
      %c0_11 = arith.constant 0 : index
      %c0_12 = arith.constant 0 : index
      %13 = vector.load %arg9[%c0_11, %c0_12] : memref<8x256xf32, #tpu.memory_space<vmem>>, vector<8x256xf32>
      tpu.vector_store %arg9[%c0_11, %c0_12], %12 {strides = array<i32>} : memref<8x256xf32, #tpu.memory_space<vmem>>, vector<8x256xf32>,
    } else {
    }
    %c0 = arith.constant 0 : index
    %c0_1 = arith.constant 0 : index
    %3 = vector.load %arg9[%c0, %c0_1] : memref<8x256xf32, #tpu.memory_space<vmem>>, vector<8x256xf32>
    %c0_2 = arith.constant 0 : index
    %c0_3 = arith.constant 0 : index
    %4 = vector.load %arg3[%c0_2, %c0_3] : memref<8x128xbf16, #tpu.memory_space<vmem>>, vector<8x128xbf16>
    %c0_4 = arith.constant 0 : index
    %c0_5 = arith.constant 0 : index
    %5 = vector.load %arg4[%c0_4, %c0_5] : memref<128x256xbf16, #tpu.memory_space<vmem>>, vector<128x256xbf16>
    %cst = arith.constant dense<0.000000e+00> : vector<8x256xf32>
    %6 = tpu.matmul %4, %5, %cst {dimension_numbers = #tpu.dot_dimension_numbers<[1], [0], [0], [1], [0, 0, 1, 1], [], []>} : vector<8x128xbf16>, vector<128x256xbf16>, vector<8x256xf32> -> vector<8x256xf32>
    %7 = arith.addf %3, %6 : vector<8x256xf32>
    %c0_6 = arith.constant 0 : index
    %c0_7 = arith.constant 0 : index
    %8 = vector.load %arg9[%c0_6, %c0_7] : memref<8x256xf32, #tpu.memory_space<vmem>>, vector<8x256xf32>
    tpu.vector_store %arg9[%c0_6, %c0_7], %7 {strides = array<i32>} : memref<8x256xf32, #tpu.memory_space<vmem>>, vector<8x256xf32>,
    %c0_i32_8 = arith.constant 0 : i32
    %9 = arith.cmpi eq, %arg2, %c0_i32_8 : i32
    %10 = arith.extui %9 : i1 to i32
    %c0_i32_9 = arith.constant 0 : i32
    %11 = arith.cmpi ne, %10, %c0_i32_9 : i32
    scf.if %11 {
      %c0_10 = arith.constant 0 : index
      %c0_11 = arith.constant 0 : index
      %12 = vector.load %arg9[%c0_10, %c0_11] : memref<8x256xf32, #tpu.memory_space<vmem>>, vector<8x256xf32>
      %c0_12 = arith.constant 0 : index
      %c0_13 = arith.constant 0 : index
      %13 = vector.load %arg5[%c0_12, %c0_13] : memref<1x256xf32, #tpu.memory_space<vmem>>, vector<1x256xf32>
      %14 = vector.broadcast %13 : vector<1x256xf32> to vector<8x256xf32>
      %15 = arith.mulf %12, %14 : vector<8x256xf32>
      %c0_14 = arith.constant 0 : index
      %c0_15 = arith.constant 0 : index
      %16 = vector.load %arg6[%c0_14, %c0_15] : memref<1x256xf32, #tpu.memory_space<vmem>>, vector<1x256xf32>
      %17 = vector.broadcast %16 : vector<1x256xf32> to vector<8x256xf32>
      %18 = arith.addf %15, %17 : vector<8x256xf32>
      %c0_16 = arith.constant 0 : index
      %c0_17 = arith.constant 0 : index
      %19 = vector.load %arg7[%c0_16, %c0_17] : memref<8x256xbf16, #tpu.memory_space<vmem>>, vector<8x256xbf16>
      %20 = arith.extf %19 : vector<8x256xbf16> to vector<8x256xf32>
      %21 = arith.addf %18, %20 : vector<8x256xf32>
      %cst_18 = arith.constant 0.000000e+00 : f32
      %22 = vector.broadcast %cst_18 : f32 to vector<8x256xf32>
      %23 = arith.maximumf %21, %22 : vector<8x256xf32>
      %24 = arith.truncf %23 : vector<8x256xf32> to vector<8x256xbf16>
      %c0_19 = arith.constant 0 : index
      %c0_20 = arith.constant 0 : index
      %25 = vector.load %arg8[%c0_19, %c0_20] : memref<8x256xbf16, #tpu.memory_space<vmem>>, vector<8x256xbf16>
      tpu.vector_store %arg8[%c0_19, %c0_20], %24 {strides = array<i32>} : memref<8x256xbf16, #tpu.memory_space<vmem>>, vector<8x256xbf16>,
    } else {
    }
    return
  }
  func.func @transform_0(%arg0: i32, %arg1: i32, %arg2: i32) -> (i32, i32) {
    %c0_i32 = arith.constant 0 : i32
    return %arg0, %arg2 : i32, i32
  }
  func.func @transform_1(%arg0: i32, %arg1: i32, %arg2: i32) -> (i32, i32) {
    %c0_i32 = arith.constant 0 : i32
    return %arg2, %arg1 : i32, i32
  }
  func.func @transform_2(%arg0: i32, %arg1: i32, %arg2: i32) -> (i32, i32) {
    %c0_i32 = arith.constant 0 : i32
    %c0_i32_0 = arith.constant 0 : i32
    return %c0_i32, %arg1 : i32, i32
  }
  func.func @transform_3(%arg0: i32, %arg1: i32, %arg2: i32) -> (i32, i32) {
    %c0_i32 = arith.constant 0 : i32
    %c0_i32_0 = arith.constant 0 : i32
    return %c0_i32, %arg1 : i32, i32
  }
  func.func @transform_4(%arg0: i32, %arg1: i32, %arg2: i32) -> (i32, i32) {
    %c0_i32 = arith.constant 0 : i32
    return %arg0, %arg1 : i32, i32
  }
  func.func @transform_5(%arg0: i32, %arg1: i32, %arg2: i32) -> (i32, i32) {
    %c0_i32 = arith.constant 0 : i32
    return %arg0, %arg1 : i32, i32
  }
}

module attributes {stable_mosaic.version = 11 : i64} {
  func.func @_matmul_kernel(%arg0: i32, %arg1: i32, %arg2: i32, %arg3: memref<8x256xbf16, #tpu.memory_space<vmem>>, %arg4: memref<256x256xbf16, #tpu.memory_space<vmem>>, %arg5: memref<1x256xf32, #tpu.memory_space<vmem>>, %arg6: memref<1x256xf32, #tpu.memory_space<vmem>>, %arg7: memref<8x256xbf16, #tpu.memory_space<vmem>>, %arg8: memref<8x256xf32, #tpu.memory_space<vmem>>) attributes {dimension_semantics = [#tpu.dimension_semantics<parallel>, #tpu.dimension_semantics<parallel>, #tpu.dimension_semantics<arbitrary>], iteration_bounds = array<i64: 1, 1, 1>, scalar_prefetch = 0 : i64, scratch_operands = 1 : i64, tpu.core_type = #tpu.core_type<tc>, window_params = [{transform_indices = @transform_0, window_bounds = array<i64: 8, 256>}, {transform_indices = @transform_1, window_bounds = array<i64: 256, 256>}, {transform_indices = @transform_2, window_bounds = array<i64: 1, 256>}, {transform_indices = @transform_3, window_bounds = array<i64: 1, 256>}, {transform_indices = @transform_4, window_bounds = array<i64: 8, 256>}]} {
    %c0_i32 = arith.constant 0 : i32
    %0 = arith.cmpi eq, %arg2, %c0_i32 : i32
    %1 = arith.extui %0 : i1 to i32
    %c0_i32_0 = arith.constant 0 : i32
    %2 = arith.cmpi ne, %1, %c0_i32_0 : i32
    scf.if %2 {
      %cst_10 = arith.constant 0.000000e+00 : f32
      %12 = vector.broadcast %cst_10 : f32 to vector<8x256xf32>
      %c0_11 = arith.constant 0 : index
      %c0_12 = arith.constant 0 : index
      %13 = vector.load %arg8[%c0_11, %c0_12] : memref<8x256xf32, #tpu.memory_space<vmem>>, vector<8x256xf32>
      tpu.vector_store %arg8[%c0_11, %c0_12], %12 {strides = array<i32>} : memref<8x256xf32, #tpu.memory_space<vmem>>, vector<8x256xf32>,
    } else {
    }
    %c0 = arith.constant 0 : index
    %c0_1 = arith.constant 0 : index
    %3 = vector.load %arg8[%c0, %c0_1] : memref<8x256xf32, #tpu.memory_space<vmem>>, vector<8x256xf32>
    %c0_2 = arith.constant 0 : index
    %c0_3 = arith.constant 0 : index
    %4 = vector.load %arg3[%c0_2, %c0_3] : memref<8x256xbf16, #tpu.memory_space<vmem>>, vector<8x256xbf16>
    %c0_4 = arith.constant 0 : index
    %c0_5 = arith.constant 0 : index
    %5 = vector.load %arg4[%c0_4, %c0_5] : memref<256x256xbf16, #tpu.memory_space<vmem>>, vector<256x256xbf16>
    %cst = arith.constant dense<0.000000e+00> : vector<8x256xf32>
    %6 = tpu.matmul %4, %5, %cst {dimension_numbers = #tpu.dot_dimension_numbers<[1], [0], [0], [1], [0, 0, 1, 1], [], []>} : vector<8x256xbf16>, vector<256x256xbf16>, vector<8x256xf32> -> vector<8x256xf32>
    %7 = arith.addf %3, %6 : vector<8x256xf32>
    %c0_6 = arith.constant 0 : index
    %c0_7 = arith.constant 0 : index
    %8 = vector.load %arg8[%c0_6, %c0_7] : memref<8x256xf32, #tpu.memory_space<vmem>>, vector<8x256xf32>
    tpu.vector_store %arg8[%c0_6, %c0_7], %7 {strides = array<i32>} : memref<8x256xf32, #tpu.memory_space<vmem>>, vector<8x256xf32>,
    %c0_i32_8 = arith.constant 0 : i32
    %9 = arith.cmpi eq, %arg2, %c0_i32_8 : i32
    %10 = arith.extui %9 : i1 to i32
    %c0_i32_9 = arith.constant 0 : i32
    %11 = arith.cmpi ne, %10, %c0_i32_9 : i32
    scf.if %11 {
      %c0_10 = arith.constant 0 : index
      %c0_11 = arith.constant 0 : index
      %12 = vector.load %arg8[%c0_10, %c0_11] : memref<8x256xf32, #tpu.memory_space<vmem>>, vector<8x256xf32>
      %c0_12 = arith.constant 0 : index
      %c0_13 = arith.constant 0 : index
      %13 = vector.load %arg5[%c0_12, %c0_13] : memref<1x256xf32, #tpu.memory_space<vmem>>, vector<1x256xf32>
      %14 = vector.broadcast %13 : vector<1x256xf32> to vector<8x256xf32>
      %15 = arith.mulf %12, %14 : vector<8x256xf32>
      %c0_14 = arith.constant 0 : index
      %c0_15 = arith.constant 0 : index
      %16 = vector.load %arg6[%c0_14, %c0_15] : memref<1x256xf32, #tpu.memory_space<vmem>>, vector<1x256xf32>
      %17 = vector.broadcast %16 : vector<1x256xf32> to vector<8x256xf32>
      %18 = arith.addf %15, %17 : vector<8x256xf32>
      %cst_16 = arith.constant 0.000000e+00 : f32
      %19 = vector.broadcast %cst_16 : f32 to vector<8x256xf32>
      %20 = arith.maximumf %18, %19 : vector<8x256xf32>
      %21 = arith.truncf %20 : vector<8x256xf32> to vector<8x256xbf16>
      %c0_17 = arith.constant 0 : index
      %c0_18 = arith.constant 0 : index
      %22 = vector.load %arg7[%c0_17, %c0_18] : memref<8x256xbf16, #tpu.memory_space<vmem>>, vector<8x256xbf16>
      tpu.vector_store %arg7[%c0_17, %c0_18], %21 {strides = array<i32>} : memref<8x256xbf16, #tpu.memory_space<vmem>>, vector<8x256xbf16>,
    } else {
    }
    return
  }
  func.func @transform_0(%arg0: i32, %arg1: i32, %arg2: i32) -> (i32, i32) {
    %c0_i32 = arith.constant 0 : i32
    return %arg0, %arg2 : i32, i32
  }
  func.func @transform_1(%arg0: i32, %arg1: i32, %arg2: i32) -> (i32, i32) {
    %c0_i32 = arith.constant 0 : i32
    return %arg2, %arg1 : i32, i32
  }
  func.func @transform_2(%arg0: i32, %arg1: i32, %arg2: i32) -> (i32, i32) {
    %c0_i32 = arith.constant 0 : i32
    %c0_i32_0 = arith.constant 0 : i32
    return %c0_i32, %arg1 : i32, i32
  }
  func.func @transform_3(%arg0: i32, %arg1: i32, %arg2: i32) -> (i32, i32) {
    %c0_i32 = arith.constant 0 : i32
    %c0_i32_0 = arith.constant 0 : i32
    return %c0_i32, %arg1 : i32, i32
  }
  func.func @transform_4(%arg0: i32, %arg1: i32, %arg2: i32) -> (i32, i32) {
    %c0_i32 = arith.constant 0 : i32
    return %arg0, %arg1 : i32, i32
  }
}

module attributes {stable_mosaic.version = 11 : i64} {
  func.func @_matmul_kernel(%arg0: i32, %arg1: i32, %arg2: i32, %arg3: memref<8x256xbf16, #tpu.memory_space<vmem>>, %arg4: memref<256x256xbf16, #tpu.memory_space<vmem>>, %arg5: memref<1x256xf32, #tpu.memory_space<vmem>>, %arg6: memref<1x256xf32, #tpu.memory_space<vmem>>, %arg7: memref<8x256xbf16, #tpu.memory_space<vmem>>, %arg8: memref<8x256xf32, #tpu.memory_space<vmem>>) attributes {dimension_semantics = [#tpu.dimension_semantics<parallel>, #tpu.dimension_semantics<parallel>, #tpu.dimension_semantics<arbitrary>], iteration_bounds = array<i64: 1, 1, 9>, scalar_prefetch = 0 : i64, scratch_operands = 1 : i64, tpu.core_type = #tpu.core_type<tc>, window_params = [{transform_indices = @transform_0, window_bounds = array<i64: 8, 256>}, {transform_indices = @transform_1, window_bounds = array<i64: 256, 256>}, {transform_indices = @transform_2, window_bounds = array<i64: 1, 256>}, {transform_indices = @transform_3, window_bounds = array<i64: 1, 256>}, {transform_indices = @transform_4, window_bounds = array<i64: 8, 256>}]} {
    %c0_i32 = arith.constant 0 : i32
    %0 = arith.cmpi eq, %arg2, %c0_i32 : i32
    %1 = arith.extui %0 : i1 to i32
    %c0_i32_0 = arith.constant 0 : i32
    %2 = arith.cmpi ne, %1, %c0_i32_0 : i32
    scf.if %2 {
      %cst_9 = arith.constant 0.000000e+00 : f32
      %12 = vector.broadcast %cst_9 : f32 to vector<8x256xf32>
      %c0_10 = arith.constant 0 : index
      %c0_11 = arith.constant 0 : index
      %13 = vector.load %arg8[%c0_10, %c0_11] : memref<8x256xf32, #tpu.memory_space<vmem>>, vector<8x256xf32>
      tpu.vector_store %arg8[%c0_10, %c0_11], %12 {strides = array<i32>} : memref<8x256xf32, #tpu.memory_space<vmem>>, vector<8x256xf32>,
    } else {
    }
    %c0 = arith.constant 0 : index
    %c0_1 = arith.constant 0 : index
    %3 = vector.load %arg8[%c0, %c0_1] : memref<8x256xf32, #tpu.memory_space<vmem>>, vector<8x256xf32>
    %c0_2 = arith.constant 0 : index
    %c0_3 = arith.constant 0 : index
    %4 = vector.load %arg3[%c0_2, %c0_3] : memref<8x256xbf16, #tpu.memory_space<vmem>>, vector<8x256xbf16>
    %c0_4 = arith.constant 0 : index
    %c0_5 = arith.constant 0 : index
    %5 = vector.load %arg4[%c0_4, %c0_5] : memref<256x256xbf16, #tpu.memory_space<vmem>>, vector<256x256xbf16>
    %cst = arith.constant dense<0.000000e+00> : vector<8x256xf32>
    %6 = tpu.matmul %4, %5, %cst {dimension_numbers = #tpu.dot_dimension_numbers<[1], [0], [0], [1], [0, 0, 1, 1], [], []>} : vector<8x256xbf16>, vector<256x256xbf16>, vector<8x256xf32> -> vector<8x256xf32>
    %7 = arith.addf %3, %6 : vector<8x256xf32>
    %c0_6 = arith.constant 0 : index
    %c0_7 = arith.constant 0 : index
    %8 = vector.load %arg8[%c0_6, %c0_7] : memref<8x256xf32, #tpu.memory_space<vmem>>, vector<8x256xf32>
    tpu.vector_store %arg8[%c0_6, %c0_7], %7 {strides = array<i32>} : memref<8x256xf32, #tpu.memory_space<vmem>>, vector<8x256xf32>,
    %c8_i32 = arith.constant 8 : i32
    %9 = arith.cmpi eq, %arg2, %c8_i32 : i32
    %10 = arith.extui %9 : i1 to i32
    %c0_i32_8 = arith.constant 0 : i32
    %11 = arith.cmpi ne, %10, %c0_i32_8 : i32
    scf.if %11 {
      %c0_9 = arith.constant 0 : index
      %c0_10 = arith.constant 0 : index
      %12 = vector.load %arg8[%c0_9, %c0_10] : memref<8x256xf32, #tpu.memory_space<vmem>>, vector<8x256xf32>
      %c0_11 = arith.constant 0 : index
      %c0_12 = arith.constant 0 : index
      %13 = vector.load %arg5[%c0_11, %c0_12] : memref<1x256xf32, #tpu.memory_space<vmem>>, vector<1x256xf32>
      %14 = vector.broadcast %13 : vector<1x256xf32> to vector<8x256xf32>
      %15 = arith.mulf %12, %14 : vector<8x256xf32>
      %c0_13 = arith.constant 0 : index
      %c0_14 = arith.constant 0 : index
      %16 = vector.load %arg6[%c0_13, %c0_14] : memref<1x256xf32, #tpu.memory_space<vmem>>, vector<1x256xf32>
      %17 = vector.broadcast %16 : vector<1x256xf32> to vector<8x256xf32>
      %18 = arith.addf %15, %17 : vector<8x256xf32>
      %cst_15 = arith.constant 0.000000e+00 : f32
      %19 = vector.broadcast %cst_15 : f32 to vector<8x256xf32>
      %20 = arith.maximumf %18, %19 : vector<8x256xf32>
      %21 = arith.truncf %20 : vector<8x256xf32> to vector<8x256xbf16>
      %c0_16 = arith.constant 0 : index
      %c0_17 = arith.constant 0 : index
      %22 = vector.load %arg7[%c0_16, %c0_17] : memref<8x256xbf16, #tpu.memory_space<vmem>>, vector<8x256xbf16>
      tpu.vector_store %arg7[%c0_16, %c0_17], %21 {strides = array<i32>} : memref<8x256xbf16, #tpu.memory_space<vmem>>, vector<8x256xbf16>,
    } else {
    }
    return
  }
  func.func @transform_0(%arg0: i32, %arg1: i32, %arg2: i32) -> (i32, i32) {
    %c1_i32 = arith.constant 1 : i32
    %0 = arith.muli %arg2, %c1_i32 : i32
    %1 = arith.addi %0, %arg1 : i32
    %c0_i32 = arith.constant 0 : i32
    return %arg0, %1 : i32, i32
  }
  func.func @transform_1(%arg0: i32, %arg1: i32, %arg2: i32) -> (i32, i32) {
    %c0_i32 = arith.constant 0 : i32
    return %arg2, %arg1 : i32, i32
  }
  func.func @transform_2(%arg0: i32, %arg1: i32, %arg2: i32) -> (i32, i32) {
    %c0_i32 = arith.constant 0 : i32
    %c0_i32_0 = arith.constant 0 : i32
    return %c0_i32, %arg1 : i32, i32
  }
  func.func @transform_3(%arg0: i32, %arg1: i32, %arg2: i32) -> (i32, i32) {
    %c0_i32 = arith.constant 0 : i32
    %c0_i32_0 = arith.constant 0 : i32
    return %c0_i32, %arg1 : i32, i32
  }
  func.func @transform_4(%arg0: i32, %arg1: i32, %arg2: i32) -> (i32, i32) {
    %c0_i32 = arith.constant 0 : i32
    return %arg0, %arg1 : i32, i32
  }
}

module attributes {stable_mosaic.version = 11 : i64} {
  func.func @_matmul_kernel(%arg0: i32, %arg1: i32, %arg2: i32, %arg3: memref<8x256xbf16, #tpu.memory_space<vmem>>, %arg4: memref<256x512xbf16, #tpu.memory_space<vmem>>, %arg5: memref<1x512xf32, #tpu.memory_space<vmem>>, %arg6: memref<1x512xf32, #tpu.memory_space<vmem>>, %arg7: memref<8x512xbf16, #tpu.memory_space<vmem>>, %arg8: memref<8x512xf32, #tpu.memory_space<vmem>>) attributes {dimension_semantics = [#tpu.dimension_semantics<parallel>, #tpu.dimension_semantics<parallel>, #tpu.dimension_semantics<arbitrary>], iteration_bounds = array<i64: 1, 1, 1>, scalar_prefetch = 0 : i64, scratch_operands = 1 : i64, tpu.core_type = #tpu.core_type<tc>, window_params = [{transform_indices = @transform_0, window_bounds = array<i64: 8, 256>}, {transform_indices = @transform_1, window_bounds = array<i64: 256, 512>}, {transform_indices = @transform_2, window_bounds = array<i64: 1, 512>}, {transform_indices = @transform_3, window_bounds = array<i64: 1, 512>}, {transform_indices = @transform_4, window_bounds = array<i64: 8, 512>}]} {
    %c0_i32 = arith.constant 0 : i32
    %0 = arith.cmpi eq, %arg2, %c0_i32 : i32
    %1 = arith.extui %0 : i1 to i32
    %c0_i32_0 = arith.constant 0 : i32
    %2 = arith.cmpi ne, %1, %c0_i32_0 : i32
    scf.if %2 {
      %cst_10 = arith.constant 0.000000e+00 : f32
      %12 = vector.broadcast %cst_10 : f32 to vector<8x512xf32>
      %c0_11 = arith.constant 0 : index
      %c0_12 = arith.constant 0 : index
      %13 = vector.load %arg8[%c0_11, %c0_12] : memref<8x512xf32, #tpu.memory_space<vmem>>, vector<8x512xf32>
      tpu.vector_store %arg8[%c0_11, %c0_12], %12 {strides = array<i32>} : memref<8x512xf32, #tpu.memory_space<vmem>>, vector<8x512xf32>,
    } else {
    }
    %c0 = arith.constant 0 : index
    %c0_1 = arith.constant 0 : index
    %3 = vector.load %arg8[%c0, %c0_1] : memref<8x512xf32, #tpu.memory_space<vmem>>, vector<8x512xf32>
    %c0_2 = arith.constant 0 : index
    %c0_3 = arith.constant 0 : index
    %4 = vector.load %arg3[%c0_2, %c0_3] : memref<8x256xbf16, #tpu.memory_space<vmem>>, vector<8x256xbf16>
    %c0_4 = arith.constant 0 : index
    %c0_5 = arith.constant 0 : index
    %5 = vector.load %arg4[%c0_4, %c0_5] : memref<256x512xbf16, #tpu.memory_space<vmem>>, vector<256x512xbf16>
    %cst = arith.constant dense<0.000000e+00> : vector<8x512xf32>
    %6 = tpu.matmul %4, %5, %cst {dimension_numbers = #tpu.dot_dimension_numbers<[1], [0], [0], [1], [0, 0, 1, 1], [], []>} : vector<8x256xbf16>, vector<256x512xbf16>, vector<8x512xf32> -> vector<8x512xf32>
    %7 = arith.addf %3, %6 : vector<8x512xf32>
    %c0_6 = arith.constant 0 : index
    %c0_7 = arith.constant 0 : index
    %8 = vector.load %arg8[%c0_6, %c0_7] : memref<8x512xf32, #tpu.memory_space<vmem>>, vector<8x512xf32>
    tpu.vector_store %arg8[%c0_6, %c0_7], %7 {strides = array<i32>} : memref<8x512xf32, #tpu.memory_space<vmem>>, vector<8x512xf32>,
    %c0_i32_8 = arith.constant 0 : i32
    %9 = arith.cmpi eq, %arg2, %c0_i32_8 : i32
    %10 = arith.extui %9 : i1 to i32
    %c0_i32_9 = arith.constant 0 : i32
    %11 = arith.cmpi ne, %10, %c0_i32_9 : i32
    scf.if %11 {
      %c0_10 = arith.constant 0 : index
      %c0_11 = arith.constant 0 : index
      %12 = vector.load %arg8[%c0_10, %c0_11] : memref<8x512xf32, #tpu.memory_space<vmem>>, vector<8x512xf32>
      %c0_12 = arith.constant 0 : index
      %c0_13 = arith.constant 0 : index
      %13 = vector.load %arg5[%c0_12, %c0_13] : memref<1x512xf32, #tpu.memory_space<vmem>>, vector<1x512xf32>
      %14 = vector.broadcast %13 : vector<1x512xf32> to vector<8x512xf32>
      %15 = arith.mulf %12, %14 : vector<8x512xf32>
      %c0_14 = arith.constant 0 : index
      %c0_15 = arith.constant 0 : index
      %16 = vector.load %arg6[%c0_14, %c0_15] : memref<1x512xf32, #tpu.memory_space<vmem>>, vector<1x512xf32>
      %17 = vector.broadcast %16 : vector<1x512xf32> to vector<8x512xf32>
      %18 = arith.addf %15, %17 : vector<8x512xf32>
      %19 = arith.truncf %18 : vector<8x512xf32> to vector<8x512xbf16>
      %c0_16 = arith.constant 0 : index
      %c0_17 = arith.constant 0 : index
      %20 = vector.load %arg7[%c0_16, %c0_17] : memref<8x512xbf16, #tpu.memory_space<vmem>>, vector<8x512xbf16>
      tpu.vector_store %arg7[%c0_16, %c0_17], %19 {strides = array<i32>} : memref<8x512xbf16, #tpu.memory_space<vmem>>, vector<8x512xbf16>,
    } else {
    }
    return
  }
  func.func @transform_0(%arg0: i32, %arg1: i32, %arg2: i32) -> (i32, i32) {
    %c0_i32 = arith.constant 0 : i32
    return %arg0, %arg2 : i32, i32
  }
  func.func @transform_1(%arg0: i32, %arg1: i32, %arg2: i32) -> (i32, i32) {
    %c0_i32 = arith.constant 0 : i32
    return %arg2, %arg1 : i32, i32
  }
  func.func @transform_2(%arg0: i32, %arg1: i32, %arg2: i32) -> (i32, i32) {
    %c0_i32 = arith.constant 0 : i32
    %c0_i32_0 = arith.constant 0 : i32
    return %c0_i32, %arg1 : i32, i32
  }
  func.func @transform_3(%arg0: i32, %arg1: i32, %arg2: i32) -> (i32, i32) {
    %c0_i32 = arith.constant 0 : i32
    %c0_i32_0 = arith.constant 0 : i32
    return %c0_i32, %arg1 : i32, i32
  }
  func.func @transform_4(%arg0: i32, %arg1: i32, %arg2: i32) -> (i32, i32) {
    %c0_i32 = arith.constant 0 : i32
    return %arg0, %arg1 : i32, i32
  }
}

module attributes {stable_mosaic.version = 11 : i64} {
  func.func @_matmul_kernel(%arg0: i32, %arg1: i32, %arg2: i32, %arg3: memref<8x256xbf16, #tpu.memory_space<vmem>>, %arg4: memref<256x512xbf16, #tpu.memory_space<vmem>>, %arg5: memref<1x512xf32, #tpu.memory_space<vmem>>, %arg6: memref<1x512xf32, #tpu.memory_space<vmem>>, %arg7: memref<8x512xbf16, #tpu.memory_space<vmem>>, %arg8: memref<8x512xbf16, #tpu.memory_space<vmem>>, %arg9: memref<8x512xf32, #tpu.memory_space<vmem>>) attributes {dimension_semantics = [#tpu.dimension_semantics<parallel>, #tpu.dimension_semantics<parallel>, #tpu.dimension_semantics<arbitrary>], iteration_bounds = array<i64: 1, 1, 1>, scalar_prefetch = 0 : i64, scratch_operands = 1 : i64, tpu.core_type = #tpu.core_type<tc>, window_params = [{transform_indices = @transform_0, window_bounds = array<i64: 8, 256>}, {transform_indices = @transform_1, window_bounds = array<i64: 256, 512>}, {transform_indices = @transform_2, window_bounds = array<i64: 1, 512>}, {transform_indices = @transform_3, window_bounds = array<i64: 1, 512>}, {transform_indices = @transform_4, window_bounds = array<i64: 8, 512>}, {transform_indices = @transform_5, window_bounds = array<i64: 8, 512>}]} {
    %c0_i32 = arith.constant 0 : i32
    %0 = arith.cmpi eq, %arg2, %c0_i32 : i32
    %1 = arith.extui %0 : i1 to i32
    %c0_i32_0 = arith.constant 0 : i32
    %2 = arith.cmpi ne, %1, %c0_i32_0 : i32
    scf.if %2 {
      %cst_10 = arith.constant 0.000000e+00 : f32
      %12 = vector.broadcast %cst_10 : f32 to vector<8x512xf32>
      %c0_11 = arith.constant 0 : index
      %c0_12 = arith.constant 0 : index
      %13 = vector.load %arg9[%c0_11, %c0_12] : memref<8x512xf32, #tpu.memory_space<vmem>>, vector<8x512xf32>
      tpu.vector_store %arg9[%c0_11, %c0_12], %12 {strides = array<i32>} : memref<8x512xf32, #tpu.memory_space<vmem>>, vector<8x512xf32>,
    } else {
    }
    %c0 = arith.constant 0 : index
    %c0_1 = arith.constant 0 : index
    %3 = vector.load %arg9[%c0, %c0_1] : memref<8x512xf32, #tpu.memory_space<vmem>>, vector<8x512xf32>
    %c0_2 = arith.constant 0 : index
    %c0_3 = arith.constant 0 : index
    %4 = vector.load %arg3[%c0_2, %c0_3] : memref<8x256xbf16, #tpu.memory_space<vmem>>, vector<8x256xbf16>
    %c0_4 = arith.constant 0 : index
    %c0_5 = arith.constant 0 : index
    %5 = vector.load %arg4[%c0_4, %c0_5] : memref<256x512xbf16, #tpu.memory_space<vmem>>, vector<256x512xbf16>
    %cst = arith.constant dense<0.000000e+00> : vector<8x512xf32>
    %6 = tpu.matmul %4, %5, %cst {dimension_numbers = #tpu.dot_dimension_numbers<[1], [0], [0], [1], [0, 0, 1, 1], [], []>} : vector<8x256xbf16>, vector<256x512xbf16>, vector<8x512xf32> -> vector<8x512xf32>
    %7 = arith.addf %3, %6 : vector<8x512xf32>
    %c0_6 = arith.constant 0 : index
    %c0_7 = arith.constant 0 : index
    %8 = vector.load %arg9[%c0_6, %c0_7] : memref<8x512xf32, #tpu.memory_space<vmem>>, vector<8x512xf32>
    tpu.vector_store %arg9[%c0_6, %c0_7], %7 {strides = array<i32>} : memref<8x512xf32, #tpu.memory_space<vmem>>, vector<8x512xf32>,
    %c0_i32_8 = arith.constant 0 : i32
    %9 = arith.cmpi eq, %arg2, %c0_i32_8 : i32
    %10 = arith.extui %9 : i1 to i32
    %c0_i32_9 = arith.constant 0 : i32
    %11 = arith.cmpi ne, %10, %c0_i32_9 : i32
    scf.if %11 {
      %c0_10 = arith.constant 0 : index
      %c0_11 = arith.constant 0 : index
      %12 = vector.load %arg9[%c0_10, %c0_11] : memref<8x512xf32, #tpu.memory_space<vmem>>, vector<8x512xf32>
      %c0_12 = arith.constant 0 : index
      %c0_13 = arith.constant 0 : index
      %13 = vector.load %arg5[%c0_12, %c0_13] : memref<1x512xf32, #tpu.memory_space<vmem>>, vector<1x512xf32>
      %14 = vector.broadcast %13 : vector<1x512xf32> to vector<8x512xf32>
      %15 = arith.mulf %12, %14 : vector<8x512xf32>
      %c0_14 = arith.constant 0 : index
      %c0_15 = arith.constant 0 : index
      %16 = vector.load %arg6[%c0_14, %c0_15] : memref<1x512xf32, #tpu.memory_space<vmem>>, vector<1x512xf32>
      %17 = vector.broadcast %16 : vector<1x512xf32> to vector<8x512xf32>
      %18 = arith.addf %15, %17 : vector<8x512xf32>
      %c0_16 = arith.constant 0 : index
      %c0_17 = arith.constant 0 : index
      %19 = vector.load %arg7[%c0_16, %c0_17] : memref<8x512xbf16, #tpu.memory_space<vmem>>, vector<8x512xbf16>
      %20 = arith.extf %19 : vector<8x512xbf16> to vector<8x512xf32>
      %21 = arith.addf %18, %20 : vector<8x512xf32>
      %cst_18 = arith.constant 0.000000e+00 : f32
      %22 = vector.broadcast %cst_18 : f32 to vector<8x512xf32>
      %23 = arith.maximumf %21, %22 : vector<8x512xf32>
      %24 = arith.truncf %23 : vector<8x512xf32> to vector<8x512xbf16>
      %c0_19 = arith.constant 0 : index
      %c0_20 = arith.constant 0 : index
      %25 = vector.load %arg8[%c0_19, %c0_20] : memref<8x512xbf16, #tpu.memory_space<vmem>>, vector<8x512xbf16>
      tpu.vector_store %arg8[%c0_19, %c0_20], %24 {strides = array<i32>} : memref<8x512xbf16, #tpu.memory_space<vmem>>, vector<8x512xbf16>,
    } else {
    }
    return
  }
  func.func @transform_0(%arg0: i32, %arg1: i32, %arg2: i32) -> (i32, i32) {
    %c0_i32 = arith.constant 0 : i32
    return %arg0, %arg2 : i32, i32
  }
  func.func @transform_1(%arg0: i32, %arg1: i32, %arg2: i32) -> (i32, i32) {
    %c0_i32 = arith.constant 0 : i32
    return %arg2, %arg1 : i32, i32
  }
  func.func @transform_2(%arg0: i32, %arg1: i32, %arg2: i32) -> (i32, i32) {
    %c0_i32 = arith.constant 0 : i32
    %c0_i32_0 = arith.constant 0 : i32
    return %c0_i32, %arg1 : i32, i32
  }
  func.func @transform_3(%arg0: i32, %arg1: i32, %arg2: i32) -> (i32, i32) {
    %c0_i32 = arith.constant 0 : i32
    %c0_i32_0 = arith.constant 0 : i32
    return %c0_i32, %arg1 : i32, i32
  }
  func.func @transform_4(%arg0: i32, %arg1: i32, %arg2: i32) -> (i32, i32) {
    %c0_i32 = arith.constant 0 : i32
    return %arg0, %arg1 : i32, i32
  }
  func.func @transform_5(%arg0: i32, %arg1: i32, %arg2: i32) -> (i32, i32) {
    %c0_i32 = arith.constant 0 : i32
    return %arg0, %arg1 : i32, i32
  }
}

module attributes {stable_mosaic.version = 11 : i64} {
  func.func @_matmul_kernel(%arg0: i32, %arg1: i32, %arg2: i32, %arg3: memref<8x512xbf16, #tpu.memory_space<vmem>>, %arg4: memref<512x128xbf16, #tpu.memory_space<vmem>>, %arg5: memref<1x128xf32, #tpu.memory_space<vmem>>, %arg6: memref<1x128xf32, #tpu.memory_space<vmem>>, %arg7: memref<8x128xf32, #tpu.memory_space<vmem>>, %arg8: memref<8x128xf32, #tpu.memory_space<vmem>>) attributes {dimension_semantics = [#tpu.dimension_semantics<parallel>, #tpu.dimension_semantics<parallel>, #tpu.dimension_semantics<arbitrary>], iteration_bounds = array<i64: 1, 1, 1>, scalar_prefetch = 0 : i64, scratch_operands = 1 : i64, tpu.core_type = #tpu.core_type<tc>, window_params = [{transform_indices = @transform_0, window_bounds = array<i64: 8, 512>}, {transform_indices = @transform_1, window_bounds = array<i64: 512, 128>}, {transform_indices = @transform_2, window_bounds = array<i64: 1, 128>}, {transform_indices = @transform_3, window_bounds = array<i64: 1, 128>}, {transform_indices = @transform_4, window_bounds = array<i64: 8, 128>}]} {
    %c0_i32 = arith.constant 0 : i32
    %0 = arith.cmpi eq, %arg2, %c0_i32 : i32
    %1 = arith.extui %0 : i1 to i32
    %c0_i32_0 = arith.constant 0 : i32
    %2 = arith.cmpi ne, %1, %c0_i32_0 : i32
    scf.if %2 {
      %cst_10 = arith.constant 0.000000e+00 : f32
      %12 = vector.broadcast %cst_10 : f32 to vector<8x128xf32>
      %c0_11 = arith.constant 0 : index
      %c0_12 = arith.constant 0 : index
      %13 = vector.load %arg8[%c0_11, %c0_12] : memref<8x128xf32, #tpu.memory_space<vmem>>, vector<8x128xf32>
      tpu.vector_store %arg8[%c0_11, %c0_12], %12 {strides = array<i32>} : memref<8x128xf32, #tpu.memory_space<vmem>>, vector<8x128xf32>,
    } else {
    }
    %c0 = arith.constant 0 : index
    %c0_1 = arith.constant 0 : index
    %3 = vector.load %arg8[%c0, %c0_1] : memref<8x128xf32, #tpu.memory_space<vmem>>, vector<8x128xf32>
    %c0_2 = arith.constant 0 : index
    %c0_3 = arith.constant 0 : index
    %4 = vector.load %arg3[%c0_2, %c0_3] : memref<8x512xbf16, #tpu.memory_space<vmem>>, vector<8x512xbf16>
    %c0_4 = arith.constant 0 : index
    %c0_5 = arith.constant 0 : index
    %5 = vector.load %arg4[%c0_4, %c0_5] : memref<512x128xbf16, #tpu.memory_space<vmem>>, vector<512x128xbf16>
    %cst = arith.constant dense<0.000000e+00> : vector<8x128xf32>
    %6 = tpu.matmul %4, %5, %cst {dimension_numbers = #tpu.dot_dimension_numbers<[1], [0], [0], [1], [0, 0, 1, 1], [], []>} : vector<8x512xbf16>, vector<512x128xbf16>, vector<8x128xf32> -> vector<8x128xf32>
    %7 = arith.addf %3, %6 : vector<8x128xf32>
    %c0_6 = arith.constant 0 : index
    %c0_7 = arith.constant 0 : index
    %8 = vector.load %arg8[%c0_6, %c0_7] : memref<8x128xf32, #tpu.memory_space<vmem>>, vector<8x128xf32>
    tpu.vector_store %arg8[%c0_6, %c0_7], %7 {strides = array<i32>} : memref<8x128xf32, #tpu.memory_space<vmem>>, vector<8x128xf32>,
    %c0_i32_8 = arith.constant 0 : i32
    %9 = arith.cmpi eq, %arg2, %c0_i32_8 : i32
    %10 = arith.extui %9 : i1 to i32
    %c0_i32_9 = arith.constant 0 : i32
    %11 = arith.cmpi ne, %10, %c0_i32_9 : i32
    scf.if %11 {
      %c0_10 = arith.constant 0 : index
      %c0_11 = arith.constant 0 : index
      %12 = vector.load %arg8[%c0_10, %c0_11] : memref<8x128xf32, #tpu.memory_space<vmem>>, vector<8x128xf32>
      %c0_12 = arith.constant 0 : index
      %c0_13 = arith.constant 0 : index
      %13 = vector.load %arg5[%c0_12, %c0_13] : memref<1x128xf32, #tpu.memory_space<vmem>>, vector<1x128xf32>
      %14 = vector.broadcast %13 : vector<1x128xf32> to vector<8x128xf32>
      %15 = arith.mulf %12, %14 : vector<8x128xf32>
      %c0_14 = arith.constant 0 : index
      %c0_15 = arith.constant 0 : index
      %16 = vector.load %arg6[%c0_14, %c0_15] : memref<1x128xf32, #tpu.memory_space<vmem>>, vector<1x128xf32>
      %17 = vector.broadcast %16 : vector<1x128xf32> to vector<8x128xf32>
      %18 = arith.addf %15, %17 : vector<8x128xf32>
      %c0_16 = arith.constant 0 : index
      %c0_17 = arith.constant 0 : index
      %19 = vector.load %arg7[%c0_16, %c0_17] : memref<8x128xf32, #tpu.memory_space<vmem>>, vector<8x128xf32>
      tpu.vector_store %arg7[%c0_16, %c0_17], %18 {strides = array<i32>} : memref<8x128xf32, #tpu.memory_space<vmem>>, vector<8x128xf32>,
    } else {
    }
    return
  }
  func.func @transform_0(%arg0: i32, %arg1: i32, %arg2: i32) -> (i32, i32) {
    %c0_i32 = arith.constant 0 : i32
    return %arg0, %arg2 : i32, i32
  }
  func.func @transform_1(%arg0: i32, %arg1: i32, %arg2: i32) -> (i32, i32) {
    %c0_i32 = arith.constant 0 : i32
    return %arg2, %arg1 : i32, i32
  }
  func.func @transform_2(%arg0: i32, %arg1: i32, %arg2: i32) -> (i32, i32) {
    %c0_i32 = arith.constant 0 : i32
    %c0_i32_0 = arith.constant 0 : i32
    return %c0_i32, %arg1 : i32, i32
  }
  func.func @transform_3(%arg0: i32, %arg1: i32, %arg2: i32) -> (i32, i32) {
    %c0_i32 = arith.constant 0 : i32
    %c0_i32_0 = arith.constant 0 : i32
    return %c0_i32, %arg1 : i32, i32
  }
  func.func @transform_4(%arg0: i32, %arg1: i32, %arg2: i32) -> (i32, i32) {
    %c0_i32 = arith.constant 0 : i32
    return %arg0, %arg1 : i32, i32
  }
}

</mosaic_0001>

<bundles_post_ra>
// kernel: resnext_forward.19
= control target key start
LH: loop header
LB: loop body
LE: loop exit
PB: predicated region body
PF: predicated region fallthrough
CT: control target
= control target key end

     0   :  { %s914_s15 = smov 0   ;;  %s916_s16 = smov 0   ;;  %s990_s0 = inlined_call_operand.vmem [shape: bf16[128,128], index: 0, kind: input, shape index: {}]   ;;  %s991_s1 = inlined_call_operand.vmem [shape: bf16[128,128], index: 1, kind: input, shape index: {}]   ;;  %s992_s2 = inlined_call_operand.vmem [shape: f32[1,128], index: 2, kind: input, shape index: {}]   ;;  %s993_s3 = inlined_call_operand.vmem [shape: f32[1,128], index: 3, kind: input, shape index: {}]   ;;  %s994_s4 = inlined_call_operand.vmem [shape: bf16[128,128], index: 4, kind: output, shape index: {}]  }
   0x1   :  { %s918_s17 = smov 0  }
   0x2 LB: > { %s33_s18 = sadd.s32 1, %s883_s16  ;;  %p717_p0 = scmp.ge.s32.totalorder %s887_s17, 1  ;;  %s887_s17 = sphi %s918_s17, %s14_s17   ;;  %s883_s16 = sphi %s916_s16, %s996_s16   ;;  %s879_s15 = sphi %s914_s15, %s995_s15  }
   0x3   : > { %p35_p1 = scmp.ge.s32.totalorder %s33_s18, 2  ;;  %p221_p2 = scmp.lt.s32.totalorder %s887_s17, 3 }
   0x5   : > { %s998_s18 = smov (%p35_p1, %s33_s18), 0  ;;  %p222_p3 = pnand %p717_p0, %p221_p2 }
   0x6   : > { %v853_v0 = vld [vmem:[%s991_s1] sm:$0xff] (!%p222_p3)   ;;  %s718_s21 = sshll.u32 (!%p222_p3), %s879_s15, 3  ;;  %v854_v1 = vld [vmem:[%s991_s1 + $0x8] sm:$0xff] (!%p222_p3)   ;;  %v855_v2 = vld [vmem:[%s991_s1 + $0x10] sm:$0xff] (!%p222_p3)  }
   0x7   : > { %225 = sbr.rel (%p222_p3) target bundleno = 263 (0x107), region = 36  ;;  %p268_p4 = scmp.lt.s32.totalorder (!%p222_p3), %s718_s21, 15  ;;  %789 = vmatprep.subr.bf16.mxu0 (!%p222_p3), %v853_v0  ;;  %813 = vmatprep.subr.bf16.mxu1 (!%p222_p3), %v853_v0  ;;  %v856_v3 = vld [vmem:[%s991_s1 + $0x18] sm:$0xff] (!%p222_p3)   ;;  %v857_v6 = vld [vmem:[%s991_s1 + $0x20] sm:$0xff] (!%p222_p3)   ;;  %v858_v7 = vld [vmem:[%s991_s1 + $0x28] sm:$0xff] (!%p222_p3)  }
   0x8   : > { %790 = vmatpush3.bf16.msra.mxu0 (!%p222_p3), %v853_v0  ;;  %821 = vmatpush3.bf16.msra.mxu1 (!%p222_p3), %v853_v0  ;;  %v859_v8 = vld [vmem:[%s991_s1 + $0x30] sm:$0xff] (!%p222_p3)   ;;  %v860_v9 = vld [vmem:[%s991_s1 + $0x38] sm:$0xff] (!%p222_p3)   ;;  %v734_v12 = vld [vmem:[%s992_s2] ss:$0 sm:$0xff] (!%p222_p3) }
   0x9   : > { %791 = vmatprep.subr.bf16.mxu0 (!%p222_p3), %v854_v1  ;;  %814 = vmatprep.subr.bf16.mxu1 (!%p222_p3), %v854_v1  ;;  %v735_v14 = vld [vmem:[%s993_s3] ss:$0 sm:$0xff] (!%p222_p3) }
   0xc   : > { %792 = vmatpush3.bf16.msra.mxu0 (!%p222_p3), %v854_v1  ;;  %822 = vmatpush3.bf16.msra.mxu1 (!%p222_p3), %v854_v1 }
   0xd   : > { %793 = vmatprep.subr.bf16.mxu0 (!%p222_p3), %v855_v2  ;;  %815 = vmatprep.subr.bf16.mxu1 (!%p222_p3), %v855_v2 }
   0xe   : > { %s1000_s21 = smov (!%p268_p4, %s718_s21), 15 }
   0xf   : > { %s719_s26 = sshll.u32 %s1000_s21, 2 }
  0x10   : > { %s949_s29 = scalar_lea.vmem %s990_s0, %s719_s26  ;;  %794 = vmatpush3.bf16.msra.mxu0 %v855_v2  ;;  %823 = vmatpush3.bf16.msra.mxu1 %v855_v2  ;;  %s298_s24 = scalar_lea.vmem %s994_s4, %s719_s26 }
  0x11   : > { %v861_v4 = vld [vmem:[%s949_s29] sm:$0xff]   ;;  %v862_v5 = vld [vmem:[%s949_s29 + $0x10] sm:$0xff]   ;;  %795 = vmatprep.subr.bf16.mxu0 %v856_v3  ;;  %816 = vmatprep.subr.bf16.mxu1 %v856_v3  ;;  %v863_v10 = vld [vmem:[%s949_s29 + $0x8] sm:$0xff]  }
  0x12   : > { %805 = vmatprep.mubr.bf16.mxu0 %v861_v4  ;;  %809 = vmatprep.mubr.bf16.mxu1 %v862_v5  ;;  %v864_v11 = vld [vmem:[%s949_s29 + $0x18] sm:$0xff]  }
  0x14   : > { %796 = vmatpush3.bf16.msra.mxu0 %v856_v3  ;;  %824 = vmatpush3.bf16.msra.mxu1 %v856_v3 }
  0x15   : > { %797 = vmatprep.subr.bf16.mxu0 %v857_v6  ;;  %817 = vmatprep.subr.bf16.mxu1 %v857_v6 }
  0x18   : > { %798 = vmatpush3.bf16.msra.mxu0 %v857_v6  ;;  %825 = vmatpush3.bf16.msra.mxu1 %v857_v6 }
  0x19   : > { %799 = vmatprep.subr.bf16.mxu0 %v858_v7  ;;  %818 = vmatprep.subr.bf16.mxu1 %v858_v7 }
  0x1c   : > { %800 = vmatpush3.bf16.msra.mxu0 %v858_v7  ;;  %826 = vmatpush3.bf16.msra.mxu1 %v858_v7 }
  0x1d   : > { %801 = vmatprep.subr.bf16.mxu0 %v859_v8  ;;  %819 = vmatprep.subr.bf16.mxu1 %v859_v8 }
  0x20   : > { %802 = vmatpush3.bf16.msra.mxu0 %v859_v8  ;;  %827 = vmatpush3.bf16.msra.mxu1 %v859_v8 }
  0x21   : > { %803 = vmatprep.subr.bf16.mxu0 %v860_v9  ;;  %820 = vmatprep.subr.bf16.mxu1 %v860_v9 }
  0x24   : > { %804 = vmatpush3.bf16.msra.mxu0 %v860_v9  ;;  %828 = vmatpush3.bf16.msra.mxu1 %v860_v9 }
  0x27   : > { %806 = vmatmul.mubr.bf16.vlgmr.msra.gmra.mrb[0].mxu0 %v863_v10  ;;  %810 = vmatmul.mubr.bf16.vlgmr.msra.gmra.mrb[0].mxu1 %v864_v11 }
  0xfa   : > { %v807_v13 = vpop.f32.mrb[0].mxu0  ;;  %v811_v15 = vpop.f32.mrb[0].mxu1 }
  0xfb   : > { %v518_v16 = vmul.f32 %v807_v13, %v734_v12  ;;  %v522_v17 = vmul.f32 %v811_v15, %v734_v12  ;;  %v451_v18 = vpop.f32.mrb[1].mxu0  ;;  %v467_v19 = vpop.f32.mrb[1].mxu1 }
  0xfc   : > { %v516_v20 = vmul.f32 %v734_v12, %v451_v18  ;;  %v520_v21 = vmul.f32 %v734_v12, %v467_v19  ;;  %v808_v22 = vpop.f32.mrb[2].mxu0  ;;  %v812_v23 = vpop.f32.mrb[2].mxu1 }
  0xfd   : > { %v533_v24 = vadd.f32 %v735_v14, %v518_v16  ;;  %v537_v25 = vadd.f32 %v735_v14, %v522_v17  ;;  %v519_v26 = vmul.f32 %v808_v22, %v734_v12  ;;  %v523_v27 = vmul.f32 %v812_v23, %v734_v12  ;;  %v454_v28 = vpop.f32.mrb[3].mxu0  ;;  %v470_v29 = vpop.f32.mrb[3].mxu1 }
  0xfe   : > { %v531_v30 = vadd.f32 %v735_v14, %v516_v20  ;;  %v535_v31 = vadd.f32 %v735_v14, %v520_v21  ;;  %v517_v32 = vmul.f32 %v734_v12, %v454_v28  ;;  %v521_v33 = vmul.f32 %v734_v12, %v470_v29 }
  0xff   : > { %v534_v34 = vadd.f32 %v735_v14, %v519_v26  ;;  %v538_v35 = vadd.f32 %v735_v14, %v523_v27  ;;  %v541_v38 = vmax.f32 %v533_v24, 0.0  ;;  %v545_v39 = vmax.f32 %v537_v25, 0.0 }
 0x100   : > { %v532_v36 = vadd.f32 %v735_v14, %v517_v32  ;;  %v536_v37 = vadd.f32 %v735_v14, %v521_v33  ;;  %v539_v42 = vmax.f32 %v531_v30, 0.0  ;;  %v543_v43 = vmax.f32 %v535_v31, 0.0 }
 0x101   : > { %v542_v40 = vmax.f32 %v534_v34, 0.0  ;;  %v546_v41 = vmax.f32 %v538_v35, 0.0 }
 0x102   : > { %v540_v44 = vmax.f32 %v532_v36, 0.0  ;;  %v544_v45 = vmax.f32 %v536_v37, 0.0 }
 0x103   : > { %v762_v46 = vpack.c.bf16 %v542_v40, %v541_v38  ;;  %v772_v47 = vpack.c.bf16 %v546_v41, %v545_v39 }
 0x104   : > { %v757_v48 = vpack.c.bf16 %v540_v44, %v539_v42  ;;  %v767_v49 = vpack.c.bf16 %v544_v45, %v543_v43 }
 0x105   : > { %774 = vst [vmem:[%s298_s24 + $0x8] sm:$0xff] %v762_v46   ;;  %776 = vst [vmem:[%s298_s24 + $0x18] sm:$0xff] %v772_v47  }
 0x106   : > { %758 = vst [vmem:[%s298_s24] sm:$0xff] %v757_v48   ;;  %775 = vst [vmem:[%s298_s24 + $0x10] sm:$0xff] %v767_v49  }
 0x107 PF: > { %s14_s17 = sadd.s32 1, %s887_s17   ;;  %s995_s15 = smov %s883_s16 }
 0x108   : > { %p11_p5 = scmp.ge.s32.totalorder %s14_s17, 4   ;;  %s996_s16 = smov %s998_s18 }
 0x10a   :  { %13 = sbr.rel (!%p11_p5) target bundleno = 2 (0x2), region = 83 }

// kernel: resnext_forward.18
= control target key start
LH: loop header
LB: loop body
LE: loop exit
PB: predicated region body
PF: predicated region fallthrough
CT: control target
= control target key end

     0   :  { %s1843_s15 = smov 0   ;;  %s1845_s16 = smov 0   ;;  %s2054_s0 = inlined_call_operand.vmem [shape: bf16[512,256], index: 0, kind: input, shape index: {}]   ;;  %s2055_s1 = inlined_call_operand.vmem [shape: bf16[256,128], index: 1, kind: input, shape index: {}]   ;;  %s2056_s2 = inlined_call_operand.vmem [shape: f32[1,128], index: 2, kind: input, shape index: {}]   ;;  %s2057_s3 = inlined_call_operand.vmem [shape: f32[1,128], index: 3, kind: input, shape index: {}]   ;;  %s2058_s4 = inlined_call_operand.vmem [shape: bf16[512,128], index: 4, kind: output, shape index: {}]  }
   0x1   :  { %s1847_s17 = smov 0  }
   0x2 LB: > { %s33_s18 = sadd.s32 1, %s1812_s16  ;;  %p1360_p0 = scmp.ge.s32.totalorder %s1816_s17, 1  ;;  %s1816_s17 = sphi %s1847_s17, %s14_s17   ;;  %s1812_s16 = sphi %s1845_s16, %s2060_s16   ;;  %s1808_s15 = sphi %s1843_s15, %s2059_s15  }
   0x3   : > { %p35_p1 = scmp.ge.s32.totalorder %s33_s18, 2  ;;  %p224_p2 = scmp.lt.s32.totalorder %s1816_s17, 3 }
   0x5   : > { %s2062_s18 = smov (%p35_p1, %s33_s18), 0  ;;  %p225_p3 = pnand %p1360_p0, %p224_p2 }
   0x6   : > { %v1730_v0 = vld [vmem:[%s2055_s1 + $0x40] sm:$0xff] (!%p225_p3)   ;;  %s1361_s21 = sshll.u32 (!%p225_p3), %s1808_s15, 5  ;;  %v1732_v2 = vld [vmem:[%s2055_s1 + $0x48] sm:$0xff] (!%p225_p3)   ;;  %v1734_v4 = vld [vmem:[%s2055_s1 + $0x50] sm:$0xff] (!%p225_p3)  }
   0x7   : > { %228 = sbr.rel (%p225_p3) target bundleno = 322 (0x142), region = 36  ;;  %v1731_v1 = vld [vmem:[%s2055_s1] sm:$0xff] (!%p225_p3)   ;;  %1578 = vmatprep.subr.bf16.mxu0 (!%p225_p3), %v1730_v0  ;;  %1690 = vmatprep.subr.bf16.mxu1 (!%p225_p3), %v1730_v0  ;;  %v1733_v3 = vld [vmem:[%s2055_s1 + $0x8] sm:$0xff] (!%p225_p3)   ;;  %p274_p4 = scmp.lt.s32.totalorder (!%p225_p3), %s1361_s21, 63  ;;  %v1735_v5 = vld [vmem:[%s2055_s1 + $0x10] sm:$0xff] (!%p225_p3)  }
   0x8   : > { %1579 = vmatpush3.bf16.msra.mxu0 (!%p225_p3), %v1731_v1  ;;  %1698 = vmatpush3.bf16.msra.mxu1 (!%p225_p3), %v1731_v1  ;;  %v1736_v6 = vld [vmem:[%s2055_s1 + $0x58] sm:$0xff] (!%p225_p3)   ;;  %v1738_v8 = vld [vmem:[%s2055_s1 + $0x60] sm:$0xff] (!%p225_p3)   ;;  %v1740_v10 = vld [vmem:[%s2055_s1 + $0x68] sm:$0xff] (!%p225_p3)  }
   0x9   : > { %1580 = vmatprep.subr.bf16.mxu0 (!%p225_p3), %v1732_v2  ;;  %1691 = vmatprep.subr.bf16.mxu1 (!%p225_p3), %v1732_v2  ;;  %v1737_v7 = vld [vmem:[%s2055_s1 + $0x18] sm:$0xff] (!%p225_p3)   ;;  %v1739_v9 = vld [vmem:[%s2055_s1 + $0x20] sm:$0xff] (!%p225_p3)   ;;  %v1741_v13 = vld [vmem:[%s2055_s1 + $0x28] sm:$0xff] (!%p225_p3)  }
   0xa   : > { %v1742_v14 = vld [vmem:[%s2055_s1 + $0x70] sm:$0xff] (!%p225_p3)   ;;  %v1744_v16 = vld [vmem:[%s2055_s1 + $0x78] sm:$0xff] (!%p225_p3)   ;;  %v1952_v51 = vld [vmem:[%s2056_s2] ss:$0 sm:$0xff] (!%p225_p3) }
   0xb   : > { %v1743_v15 = vld [vmem:[%s2055_s1 + $0x30] sm:$0xff] (!%p225_p3)   ;;  %v1745_v17 = vld [vmem:[%s2055_s1 + $0x38] sm:$0xff] (!%p225_p3)   ;;  %v1957_v57 = vld [vmem:[%s2057_s3] ss:$0 sm:$0xff] (!%p225_p3) }
   0xc   : > { %1581 = vmatpush3.bf16.msra.mxu0 (!%p225_p3), %v1733_v3  ;;  %1699 = vmatpush3.bf16.msra.mxu1 (!%p225_p3), %v1733_v3 }
   0xd   : > { %1582 = vmatprep.subr.bf16.mxu0 (!%p225_p3), %v1734_v4  ;;  %1692 = vmatprep.subr.bf16.mxu1 (!%p225_p3), %v1734_v4 }
   0xe   : > { %s2064_s21 = smov (!%p274_p4, %s1361_s21), 63 }
   0xf   : > { %s1450_s10 = sshll.u32 %s2064_s21, 3  ;;  %s1365_s12 = sshll.u32 %s2064_s21, 2 }
  0x10   : > { %1583 = vmatpush3.bf16.msra.mxu0 %v1735_v5  ;;  %1700 = vmatpush3.bf16.msra.mxu1 %v1735_v5  ;;  %s1894_s15 = scalar_lea.vmem %s2054_s0, %s1450_s10  ;;  %s1971_s21 = scalar_lea.vmem %s2058_s4, %s1365_s12 }
  0x11   : > { %1584 = vmatprep.subr.bf16.mxu0 %v1736_v6  ;;  %1693 = vmatprep.subr.bf16.mxu1 %v1736_v6  ;;  %v1748_v11 = vld [vmem:[%s1894_s15 + $0x4] ss:$8 sps:$4 sm:$0xff]   ;;  %v1746_v18 = vld [vmem:[%s1894_s15] ss:$8 sps:$4 sm:$0xff]   ;;  %v1752_v20 = vld [vmem:[%s1894_s15 + $0x14] ss:$8 sps:$4 sm:$0xff]  }
  0x12   : > { %v1751_v12 = vld [vmem:[%s1894_s15 + $0x84] ss:$8 sps:$4 sm:$0xff]   ;;  %729 = vmatprep.mubr.bf16.mxu0 %v1748_v11  ;;  %v1749_v19 = vld [vmem:[%s1894_s15 + $0x80] ss:$8 sps:$4 sm:$0xff]   ;;  %v1754_v21 = vld [vmem:[%s1894_s15 + $0x94] ss:$8 sps:$4 sm:$0xff]  }
  0x13   : > { %793 = vmatprep.mubr.bf16.mxu1 %v1751_v12  ;;  %v1756_v22 = vld [vmem:[%s1894_s15 + $0x10] ss:$8 sps:$4 sm:$0xff]   ;;  %v1758_v24 = vld [vmem:[%s1894_s15 + $0x24] ss:$8 sps:$4 sm:$0xff]   ;;  %v1762_v26 = vld [vmem:[%s1894_s15 + $0x20] ss:$8 sps:$4 sm:$0xff]  }
  0x14   : > { %1585 = vmatpush3.bf16.msra.mxu0 %v1737_v7  ;;  %1701 = vmatpush3.bf16.msra.mxu1 %v1737_v7  ;;  %v1757_v23 = vld [vmem:[%s1894_s15 + $0x90] ss:$8 sps:$4 sm:$0xff]   ;;  %v1760_v25 = vld [vmem:[%s1894_s15 + $0xa4] ss:$8 sps:$4 sm:$0xff]   ;;  %v1763_v27 = vld [vmem:[%s1894_s15 + $0xa0] ss:$8 sps:$4 sm:$0xff]  }
  0x15   : > { %1586 = vmatprep.subr.bf16.mxu0 %v1738_v8  ;;  %1694 = vmatprep.subr.bf16.mxu1 %v1738_v8  ;;  %v1764_v28 = vld [vmem:[%s1894_s15 + $0x34] ss:$8 sps:$4 sm:$0xff]   ;;  %v1768_v30 = vld [vmem:[%s1894_s15 + $0x30] ss:$8 sps:$4 sm:$0xff]   ;;  %v1770_v32 = vld [vmem:[%s1894_s15 + $0x44] ss:$8 sps:$4 sm:$0xff]  }
  0x16   : > { %v1766_v29 = vld [vmem:[%s1894_s15 + $0xb4] ss:$8 sps:$4 sm:$0xff]   ;;  %v1769_v31 = vld [vmem:[%s1894_s15 + $0xb0] ss:$8 sps:$4 sm:$0xff]   ;;  %v1772_v33 = vld [vmem:[%s1894_s15 + $0xc4] ss:$8 sps:$4 sm:$0xff]  }
  0x17   : > { %v1774_v34 = vld [vmem:[%s1894_s15 + $0x40] ss:$8 sps:$4 sm:$0xff]   ;;  %v1776_v36 = vld [vmem:[%s1894_s15 + $0x54] ss:$8 sps:$4 sm:$0xff]   ;;  %v1780_v38 = vld [vmem:[%s1894_s15 + $0x50] ss:$8 sps:$4 sm:$0xff]  }
  0x18   : > { %1587 = vmatpush3.bf16.msra.mxu0 %v1739_v9  ;;  %1702 = vmatpush3.bf16.msra.mxu1 %v1739_v9  ;;  %v1775_v35 = vld [vmem:[%s1894_s15 + $0xc0] ss:$8 sps:$4 sm:$0xff]   ;;  %v1778_v37 = vld [vmem:[%s1894_s15 + $0xd4] ss:$8 sps:$4 sm:$0xff]   ;;  %v1781_v39 = vld [vmem:[%s1894_s15 + $0xd0] ss:$8 sps:$4 sm:$0xff]  }
  0x19   : > { %1588 = vmatprep.subr.bf16.mxu0 %v1740_v10  ;;  %1695 = vmatprep.subr.bf16.mxu1 %v1740_v10  ;;  %v1782_v40 = vld [vmem:[%s1894_s15 + $0x64] ss:$8 sps:$4 sm:$0xff]   ;;  %v1786_v42 = vld [vmem:[%s1894_s15 + $0x60] ss:$8 sps:$4 sm:$0xff]   ;;  %v1788_v44 = vld [vmem:[%s1894_s15 + $0x74] ss:$8 sps:$4 sm:$0xff]  }
  0x1a   : > { %v1784_v41 = vld [vmem:[%s1894_s15 + $0xe4] ss:$8 sps:$4 sm:$0xff]   ;;  %v1787_v43 = vld [vmem:[%s1894_s15 + $0xe0] ss:$8 sps:$4 sm:$0xff]   ;;  %v1790_v45 = vld [vmem:[%s1894_s15 + $0xf4] ss:$8 sps:$4 sm:$0xff]  }
  0x1b   : > { %v1792_v46 = vld [vmem:[%s1894_s15 + $0x70] ss:$8 sps:$4 sm:$0xff]  }
  0x1c   : > { %1589 = vmatpush3.bf16.msra.mxu0 %v1741_v13  ;;  %1703 = vmatpush3.bf16.msra.mxu1 %v1741_v13  ;;  %v1793_v47 = vld [vmem:[%s1894_s15 + $0xf0] ss:$8 sps:$4 sm:$0xff]  }
  0x1d   : > { %1590 = vmatprep.subr.bf16.mxu0 %v1742_v14  ;;  %1696 = vmatprep.subr.bf16.mxu1 %v1742_v14 }
  0x20   : > { %1591 = vmatpush3.bf16.msra.mxu0 %v1743_v15  ;;  %1704 = vmatpush3.bf16.msra.mxu1 %v1743_v15 }
  0x21   : > { %1592 = vmatprep.subr.bf16.mxu0 %v1744_v16  ;;  %1697 = vmatprep.subr.bf16.mxu1 %v1744_v16 }
  0x24   : > { %1593 = vmatpush3.bf16.msra.mxu0 %v1745_v17  ;;  %1705 = vmatpush3.bf16.msra.mxu1 %v1745_v17 }
  0x27   : > { %730 = vmatmul.mubr.bf16.vlgmr.msra.gmra.mrb[0].mxu0 %v1746_v18  ;;  %794 = vmatmul.mubr.bf16.vlgmr.msra.gmra.mrb[0].mxu1 %v1749_v19 }
  0x28   : > { %737 = vmatprep.mubr.bf16.mxu0 %v1752_v20  ;;  %801 = vmatprep.mubr.bf16.mxu1 %v1754_v21 }
  0x2f   : > { %738 = vmatmul.mubr.bf16.gmra.mrb[4].mxu0 %v1756_v22  ;;  %802 = vmatmul.mubr.bf16.gmra.mrb[4].mxu1 %v1757_v23 }
  0x30   : > { %745 = vmatprep.mubr.bf16.mxu0 %v1758_v24  ;;  %809 = vmatprep.mubr.bf16.mxu1 %v1760_v25 }
  0x37   : > { %746 = vmatmul.mubr.bf16.gmra.mrb[8].mxu0 %v1762_v26  ;;  %810 = vmatmul.mubr.bf16.gmra.mrb[8].mxu1 %v1763_v27 }
  0x38   : > { %753 = vmatprep.mubr.bf16.mxu0 %v1764_v28  ;;  %817 = vmatprep.mubr.bf16.mxu1 %v1766_v29 }
  0x3f   : > { %754 = vmatmul.mubr.bf16.gmra.mrb[12].mxu0 %v1768_v30  ;;  %818 = vmatmul.mubr.bf16.gmra.mrb[12].mxu1 %v1769_v31 }
  0x40   : > { %761 = vmatprep.mubr.bf16.mxu0 %v1770_v32  ;;  %825 = vmatprep.mubr.bf16.mxu1 %v1772_v33 }
  0x47   : > { %762 = vmatmul.mubr.bf16.gmra.mrb[16].mxu0 %v1774_v34  ;;  %826 = vmatmul.mubr.bf16.gmra.mrb[16].mxu1 %v1775_v35 }
  0x48   : > { %769 = vmatprep.mubr.bf16.mxu0 %v1776_v36  ;;  %833 = vmatprep.mubr.bf16.mxu1 %v1778_v37 }
  0x4f   : > { %770 = vmatmul.mubr.bf16.gmra.mrb[20].mxu0 %v1780_v38  ;;  %834 = vmatmul.mubr.bf16.gmra.mrb[20].mxu1 %v1781_v39 }
  0x50   : > { %777 = vmatprep.mubr.bf16.mxu0 %v1782_v40  ;;  %841 = vmatprep.mubr.bf16.mxu1 %v1784_v41 }
  0x57   : > { %778 = vmatmul.mubr.bf16.gmra.mrb[24].mxu0 %v1786_v42  ;;  %842 = vmatmul.mubr.bf16.gmra.mrb[24].mxu1 %v1787_v43 }
  0x58   : > { %785 = vmatprep.mubr.bf16.mxu0 %v1788_v44  ;;  %849 = vmatprep.mubr.bf16.mxu1 %v1790_v45 }
  0x5f   : > { %786 = vmatmul.mubr.bf16.gmra.mrb[28].mxu0 %v1792_v46  ;;  %850 = vmatmul.mubr.bf16.gmra.mrb[28].mxu1 %v1793_v47 }
  0xfa   : > { %v1594_v48 = vpop.f32.mrb[0].mxu0  ;;  %v1642_v49 = vpop.f32.mrb[0].mxu1 }
  0xfb   : > { %v1595_v50 = vpop.f32.mrb[1].mxu0  ;;  %v1643_v52 = vpop.f32.mrb[1].mxu1 }
  0xfc   : > { %v1596_v53 = vadd.f32 %v1595_v50, %v1594_v48  ;;  %v1644_v54 = vadd.f32 %v1643_v52, %v1642_v49  ;;  %v1597_v55 = vpop.f32.mrb[2].mxu0  ;;  %v1645_v56 = vpop.f32.mrb[2].mxu1 }
  0xfd   : > { %v1598_v58 = vpop.f32.mrb[3].mxu0  ;;  %v1646_v59 = vpop.f32.mrb[3].mxu1 }
  0xfe   : > { %v964_v60 = vmul.f32 %v1596_v53, %v1952_v51  ;;  %v980_v61 = vmul.f32 %v1644_v54, %v1952_v51  ;;  %v1599_v62 = vadd.f32 %v1598_v58, %v1597_v55  ;;  %v1647_v63 = vadd.f32 %v1646_v59, %v1645_v56 }
 0x100   : > { %v1003_v0 = vadd.f32 %v1957_v57, %v964_v60  ;;  %v1019_v1 = vadd.f32 %v1957_v57, %v980_v61  ;;  %v965_v2 = vmul.f32 %v1599_v62, %v1952_v51  ;;  %v981_v3 = vmul.f32 %v1647_v63, %v1952_v51 }
 0x102   : > { %v1004_v4 = vadd.f32 %v1957_v57, %v965_v2  ;;  %v1020_v5 = vadd.f32 %v1957_v57, %v981_v3  ;;  %v1600_v6 = vpop.f32.mrb[4].mxu0  ;;  %v1648_v7 = vpop.f32.mrb[4].mxu1  ;;  %v1035_v8 = vmax.f32 %v1003_v0, 0.0  ;;  %v1051_v9 = vmax.f32 %v1019_v1, 0.0 }
 0x103   : > { %v1601_v10 = vpop.f32.mrb[5].mxu0  ;;  %v1649_v11 = vpop.f32.mrb[5].mxu1 }
 0x104   : > { %v1036_v12 = vmax.f32 %v1004_v4, 0.0  ;;  %v1052_v13 = vmax.f32 %v1020_v5, 0.0  ;;  %v1602_v14 = vadd.f32 %v1601_v10, %v1600_v6  ;;  %v1650_v15 = vadd.f32 %v1649_v11, %v1648_v7  ;;  %v1603_v16 = vpop.f32.mrb[6].mxu0  ;;  %v1651_v17 = vpop.f32.mrb[6].mxu1 }
 0x105   : > { %v1604_v18 = vpop.f32.mrb[7].mxu0  ;;  %v1652_v19 = vpop.f32.mrb[7].mxu1 }
 0x106   : > { %v1486_v20 = vpack.c.bf16 %v1036_v12, %v1035_v8  ;;  %v1526_v21 = vpack.c.bf16 %v1052_v13, %v1051_v9  ;;  %v966_v22 = vmul.f32 %v1602_v14, %v1952_v51  ;;  %v982_v23 = vmul.f32 %v1650_v15, %v1952_v51 }
 0x107   : > { %v1605_v24 = vadd.f32 %v1604_v18, %v1603_v16  ;;  %v1653_v25 = vadd.f32 %v1652_v19, %v1651_v17 }
 0x108   : > { %1487 = vst [vmem:[%s1971_s21] sm:$0xff] %v1486_v20   ;;  %1570 = vst [vmem:[%s1971_s21 + $0x40] sm:$0xff] %v1526_v21   ;;  %v1005_v26 = vadd.f32 %v1957_v57, %v966_v22  ;;  %v1021_v27 = vadd.f32 %v1957_v57, %v982_v23 }
 0x109   : > { %v967_v28 = vmul.f32 %v1605_v24, %v1952_v51  ;;  %v983_v29 = vmul.f32 %v1653_v25, %v1952_v51 }
 0x10a   : > { %v1606_v30 = vpop.f32.mrb[8].mxu0  ;;  %v1654_v31 = vpop.f32.mrb[8].mxu1  ;;  %v1037_v40 = vmax.f32 %v1005_v26, 0.0  ;;  %v1053_v41 = vmax.f32 %v1021_v27, 0.0 }
 0x10b   : > { %v1006_v32 = vadd.f32 %v1957_v57, %v967_v28  ;;  %v1022_v33 = vadd.f32 %v1957_v57, %v983_v29  ;;  %v1607_v34 = vpop.f32.mrb[9].mxu0  ;;  %v1655_v35 = vpop.f32.mrb[9].mxu1 }
 0x10c   : > { %v1608_v36 = vadd.f32 %v1607_v34, %v1606_v30  ;;  %v1656_v37 = vadd.f32 %v1655_v35, %v1654_v31  ;;  %v1609_v38 = vpop.f32.mrb[10].mxu0  ;;  %v1657_v39 = vpop.f32.mrb[10].mxu1 }
 0x10d   : > { %v1038_v42 = vmax.f32 %v1006_v32, 0.0  ;;  %v1054_v43 = vmax.f32 %v1022_v33, 0.0  ;;  %v1610_v44 = vpop.f32.mrb[11].mxu0  ;;  %v1658_v45 = vpop.f32.mrb[11].mxu1 }
 0x10e   : > { %v968_v46 = vmul.f32 %v1608_v36, %v1952_v51  ;;  %v984_v47 = vmul.f32 %v1656_v37, %v1952_v51  ;;  %v1611_v48 = vadd.f32 %v1610_v44, %v1609_v38  ;;  %v1659_v49 = vadd.f32 %v1658_v45, %v1657_v39 }
 0x10f   : > { %v1491_v50 = vpack.c.bf16 %v1038_v42, %v1037_v40  ;;  %v1531_v52 = vpack.c.bf16 %v1054_v43, %v1053_v41 }
 0x110   : > { %v1007_v53 = vadd.f32 %v1957_v57, %v968_v46  ;;  %v1023_v54 = vadd.f32 %v1957_v57, %v984_v47  ;;  %v969_v55 = vmul.f32 %v1611_v48, %v1952_v51  ;;  %v985_v56 = vmul.f32 %v1659_v49, %v1952_v51 }
 0x111   : > { %1563 = vst [vmem:[%s1971_s21 + $0x8] sm:$0xff] %v1491_v50   ;;  %1571 = vst [vmem:[%s1971_s21 + $0x48] sm:$0xff] %v1531_v52  }
 0x112   : > { %v1008_v58 = vadd.f32 %v1957_v57, %v969_v55  ;;  %v1024_v59 = vadd.f32 %v1957_v57, %v985_v56  ;;  %v1612_v60 = vpop.f32.mrb[12].mxu0  ;;  %v1660_v61 = vpop.f32.mrb[12].mxu1  ;;  %v1039_v62 = vmax.f32 %v1007_v53, 0.0  ;;  %v1055_v63 = vmax.f32 %v1023_v54, 0.0 }
 0x113   : > { %v1613_v0 = vpop.f32.mrb[13].mxu0  ;;  %v1661_v1 = vpop.f32.mrb[13].mxu1 }
 0x114   : > { %v1040_v2 = vmax.f32 %v1008_v58, 0.0  ;;  %v1056_v3 = vmax.f32 %v1024_v59, 0.0  ;;  %v1614_v4 = vadd.f32 %v1613_v0, %v1612_v60  ;;  %v1662_v5 = vadd.f32 %v1661_v1, %v1660_v61  ;;  %v1615_v6 = vpop.f32.mrb[14].mxu0  ;;  %v1663_v7 = vpop.f32.mrb[14].mxu1 }
 0x115   : > { %v1616_v8 = vpop.f32.mrb[15].mxu0  ;;  %v1664_v9 = vpop.f32.mrb[15].mxu1 }
 0x116   : > { %v1496_v10 = vpack.c.bf16 %v1040_v2, %v1039_v62  ;;  %v1536_v11 = vpack.c.bf16 %v1056_v3, %v1055_v63  ;;  %v970_v12 = vmul.f32 %v1614_v4, %v1952_v51  ;;  %v986_v13 = vmul.f32 %v1662_v5, %v1952_v51 }
 0x117   : > { %v1617_v14 = vadd.f32 %v1616_v8, %v1615_v6  ;;  %v1665_v15 = vadd.f32 %v1664_v9, %v1663_v7 }
 0x118   : > { %1564 = vst [vmem:[%s1971_s21 + $0x10] sm:$0xff] %v1496_v10   ;;  %1572 = vst [vmem:[%s1971_s21 + $0x50] sm:$0xff] %v1536_v11   ;;  %v1009_v16 = vadd.f32 %v1957_v57, %v970_v12  ;;  %v1025_v17 = vadd.f32 %v1957_v57, %v986_v13 }
 0x119   : > { %v971_v18 = vmul.f32 %v1617_v14, %v1952_v51  ;;  %v987_v19 = vmul.f32 %v1665_v15, %v1952_v51 }
 0x11a   : > { %v1618_v20 = vpop.f32.mrb[16].mxu0  ;;  %v1666_v21 = vpop.f32.mrb[16].mxu1  ;;  %v1041_v30 = vmax.f32 %v1009_v16, 0.0  ;;  %v1057_v31 = vmax.f32 %v1025_v17, 0.0 }
 0x11b   : > { %v1010_v22 = vadd.f32 %v1957_v57, %v971_v18  ;;  %v1026_v23 = vadd.f32 %v1957_v57, %v987_v19  ;;  %v1619_v24 = vpop.f32.mrb[17].mxu0  ;;  %v1667_v25 = vpop.f32.mrb[17].mxu1 }
 0x11c   : > { %v1620_v26 = vadd.f32 %v1619_v24, %v1618_v20  ;;  %v1668_v27 = vadd.f32 %v1667_v25, %v1666_v21  ;;  %v1621_v28 = vpop.f32.mrb[18].mxu0  ;;  %v1669_v29 = vpop.f32.mrb[18].mxu1 }
 0x11d   : > { %v1042_v32 = vmax.f32 %v1010_v22, 0.0  ;;  %v1058_v33 = vmax.f32 %v1026_v23, 0.0  ;;  %v1622_v34 = vpop.f32.mrb[19].mxu0  ;;  %v1670_v35 = vpop.f32.mrb[19].mxu1 }
 0x11e   : > { %v972_v36 = vmul.f32 %v1620_v26, %v1952_v51  ;;  %v988_v37 = vmul.f32 %v1668_v27, %v1952_v51  ;;  %v1623_v38 = vadd.f32 %v1622_v34, %v1621_v28  ;;  %v1671_v39 = vadd.f32 %v1670_v35, %v1669_v29 }
 0x11f   : > { %v1501_v40 = vpack.c.bf16 %v1042_v32, %v1041_v30  ;;  %v1541_v41 = vpack.c.bf16 %v1058_v33, %v1057_v31 }
 0x120   : > { %v1011_v42 = vadd.f32 %v1957_v57, %v972_v36  ;;  %v1027_v43 = vadd.f32 %v1957_v57, %v988_v37  ;;  %v973_v44 = vmul.f32 %v1623_v38, %v1952_v51  ;;  %v989_v45 = vmul.f32 %v1671_v39, %v1952_v51 }
 0x121   : > { %1565 = vst [vmem:[%s1971_s21 + $0x18] sm:$0xff] %v1501_v40   ;;  %1573 = vst [vmem:[%s1971_s21 + $0x58] sm:$0xff] %v1541_v41  }
 0x122   : > { %v1012_v46 = vadd.f32 %v1957_v57, %v973_v44  ;;  %v1028_v47 = vadd.f32 %v1957_v57, %v989_v45  ;;  %v1624_v48 = vpop.f32.mrb[20].mxu0  ;;  %v1672_v49 = vpop.f32.mrb[20].mxu1  ;;  %v1043_v50 = vmax.f32 %v1011_v42, 0.0  ;;  %v1059_v52 = vmax.f32 %v1027_v43, 0.0 }
 0x123   : > { %v1625_v53 = vpop.f32.mrb[21].mxu0  ;;  %v1673_v54 = vpop.f32.mrb[21].mxu1 }
 0x124   : > { %v1044_v55 = vmax.f32 %v1012_v46, 0.0  ;;  %v1060_v56 = vmax.f32 %v1028_v47, 0.0  ;;  %v1626_v58 = vadd.f32 %v1625_v53, %v1624_v48  ;;  %v1674_v59 = vadd.f32 %v1673_v54, %v1672_v49  ;;  %v1627_v60 = vpop.f32.mrb[22].mxu0  ;;  %v1675_v61 = vpop.f32.mrb[22].mxu1 }
 0x125   : > { %v1628_v62 = vpop.f32.mrb[23].mxu0  ;;  %v1676_v63 = vpop.f32.mrb[23].mxu1 }
 0x126   : > { %v1506_v0 = vpack.c.bf16 %v1044_v55, %v1043_v50  ;;  %v1546_v1 = vpack.c.bf16 %v1060_v56, %v1059_v52  ;;  %v974_v2 = vmul.f32 %v1626_v58, %v1952_v51  ;;  %v990_v3 = vmul.f32 %v1674_v59, %v1952_v51 }
 0x127   : > { %v1629_v4 = vadd.f32 %v1628_v62, %v1627_v60  ;;  %v1677_v5 = vadd.f32 %v1676_v63, %v1675_v61 }
 0x128   : > { %1566 = vst [vmem:[%s1971_s21 + $0x20] sm:$0xff] %v1506_v0   ;;  %1574 = vst [vmem:[%s1971_s21 + $0x60] sm:$0xff] %v1546_v1   ;;  %v1013_v6 = vadd.f32 %v1957_v57, %v974_v2  ;;  %v1029_v7 = vadd.f32 %v1957_v57, %v990_v3 }
 0x129   : > { %v975_v8 = vmul.f32 %v1629_v4, %v1952_v51  ;;  %v991_v9 = vmul.f32 %v1677_v5, %v1952_v51 }
 0x12a   : > { %v1630_v10 = vpop.f32.mrb[24].mxu0  ;;  %v1678_v11 = vpop.f32.mrb[24].mxu1  ;;  %v1045_v20 = vmax.f32 %v1013_v6, 0.0  ;;  %v1061_v21 = vmax.f32 %v1029_v7, 0.0 }
 0x12b   : > { %v1014_v12 = vadd.f32 %v1957_v57, %v975_v8  ;;  %v1030_v13 = vadd.f32 %v1957_v57, %v991_v9  ;;  %v1631_v14 = vpop.f32.mrb[25].mxu0  ;;  %v1679_v15 = vpop.f32.mrb[25].mxu1 }
 0x12c   : > { %v1632_v16 = vadd.f32 %v1631_v14, %v1630_v10  ;;  %v1680_v17 = vadd.f32 %v1679_v15, %v1678_v11  ;;  %v1633_v18 = vpop.f32.mrb[26].mxu0  ;;  %v1681_v19 = vpop.f32.mrb[26].mxu1 }
 0x12d   : > { %v1046_v22 = vmax.f32 %v1014_v12, 0.0  ;;  %v1062_v23 = vmax.f32 %v1030_v13, 0.0  ;;  %v1634_v24 = vpop.f32.mrb[27].mxu0  ;;  %v1682_v25 = vpop.f32.mrb[27].mxu1 }
 0x12e   : > { %v976_v26 = vmul.f32 %v1632_v16, %v1952_v51  ;;  %v992_v27 = vmul.f32 %v1680_v17, %v1952_v51  ;;  %v1635_v28 = vadd.f32 %v1634_v24, %v1633_v18  ;;  %v1683_v29 = vadd.f32 %v1682_v25, %v1681_v19 }
 0x12f   : > { %v1511_v30 = vpack.c.bf16 %v1046_v22, %v1045_v20  ;;  %v1551_v31 = vpack.c.bf16 %v1062_v23, %v1061_v21 }
 0x130   : > { %v1015_v32 = vadd.f32 %v1957_v57, %v976_v26  ;;  %v1031_v33 = vadd.f32 %v1957_v57, %v992_v27  ;;  %v977_v34 = vmul.f32 %v1635_v28, %v1952_v51  ;;  %v993_v35 = vmul.f32 %v1683_v29, %v1952_v51 }
 0x131   : > { %1567 = vst [vmem:[%s1971_s21 + $0x28] sm:$0xff] %v1511_v30   ;;  %1575 = vst [vmem:[%s1971_s21 + $0x68] sm:$0xff] %v1551_v31  }
 0x132   : > { %v1016_v36 = vadd.f32 %v1957_v57, %v977_v34  ;;  %v1032_v37 = vadd.f32 %v1957_v57, %v993_v35  ;;  %v1636_v38 = vpop.f32.mrb[28].mxu0  ;;  %v1684_v39 = vpop.f32.mrb[28].mxu1  ;;  %v1047_v40 = vmax.f32 %v1015_v32, 0.0  ;;  %v1063_v41 = vmax.f32 %v1031_v33, 0.0 }
 0x133   : > { %v1637_v42 = vpop.f32.mrb[29].mxu0  ;;  %v1685_v43 = vpop.f32.mrb[29].mxu1 }
 0x134   : > { %v1048_v44 = vmax.f32 %v1016_v36, 0.0  ;;  %v1064_v45 = vmax.f32 %v1032_v37, 0.0  ;;  %v1638_v46 = vadd.f32 %v1637_v42, %v1636_v38  ;;  %v1686_v47 = vadd.f32 %v1685_v43, %v1684_v39  ;;  %v1639_v48 = vpop.f32.mrb[30].mxu0  ;;  %v1687_v49 = vpop.f32.mrb[30].mxu1 }
 0x135   : > { %v1640_v50 = vpop.f32.mrb[31].mxu0  ;;  %v1688_v52 = vpop.f32.mrb[31].mxu1 }
 0x136   : > { %v1516_v53 = vpack.c.bf16 %v1048_v44, %v1047_v40  ;;  %v1556_v54 = vpack.c.bf16 %v1064_v45, %v1063_v41  ;;  %v978_v55 = vmul.f32 %v1638_v46, %v1952_v51  ;;  %v994_v56 = vmul.f32 %v1686_v47, %v1952_v51 }
 0x137   : > { %v1641_v58 = vadd.f32 %v1640_v50, %v1639_v48  ;;  %v1689_v59 = vadd.f32 %v1688_v52, %v1687_v49 }
 0x138   : > { %1568 = vst [vmem:[%s1971_s21 + $0x30] sm:$0xff] %v1516_v53   ;;  %1576 = vst [vmem:[%s1971_s21 + $0x70] sm:$0xff] %v1556_v54   ;;  %v1017_v60 = vadd.f32 %v1957_v57, %v978_v55  ;;  %v1033_v61 = vadd.f32 %v1957_v57, %v994_v56 }
 0x139   : > { %v979_v62 = vmul.f32 %v1641_v58, %v1952_v51  ;;  %v995_v63 = vmul.f32 %v1689_v59, %v1952_v51 }
 0x13a   : > { %v1049_v2 = vmax.f32 %v1017_v60, 0.0  ;;  %v1065_v3 = vmax.f32 %v1033_v61, 0.0 }
 0x13b   : > { %v1018_v0 = vadd.f32 %v1957_v57, %v979_v62  ;;  %v1034_v1 = vadd.f32 %v1957_v57, %v995_v63 }
 0x13d   : > { %v1050_v4 = vmax.f32 %v1018_v0, 0.0  ;;  %v1066_v5 = vmax.f32 %v1034_v1, 0.0 }
 0x13f   : > { %v1521_v6 = vpack.c.bf16 %v1050_v4, %v1049_v2  ;;  %v1561_v7 = vpack.c.bf16 %v1066_v5, %v1065_v3 }
 0x141   : > { %1569 = vst [vmem:[%s1971_s21 + $0x38] sm:$0xff] %v1521_v6   ;;  %1577 = vst [vmem:[%s1971_s21 + $0x78] sm:$0xff] %v1561_v7  }
 0x142 PF: > { %s14_s17 = sadd.s32 1, %s1816_s17   ;;  %s2059_s15 = smov %s1812_s16 }
 0x143   : > { %p11_p5 = scmp.ge.s32.totalorder %s14_s17, 4   ;;  %s2060_s16 = smov %s2062_s18 }
 0x145   :  { %13 = sbr.rel (!%p11_p5) target bundleno = 2 (0x2), region = 83 }

// kernel: resnext_forward.20
= control target key start
LH: loop header
LB: loop body
LE: loop exit
PB: predicated region body
PF: predicated region fallthrough
CT: control target
= control target key end

     0   :  { %s1243_s15 = smov 0   ;;  %s1245_s16 = smov 0   ;;  %s1391_s0 = inlined_call_operand.vmem [shape: bf16[128,384], index: 0, kind: input, shape index: {}]   ;;  %s1392_s1 = inlined_call_operand.vmem [shape: bf16[384,128], index: 1, kind: input, shape index: {}]   ;;  %s1393_s2 = inlined_call_operand.vmem [shape: f32[1,128], index: 2, kind: input, shape index: {}]   ;;  %s1394_s3 = inlined_call_operand.vmem [shape: f32[1,128], index: 3, kind: input, shape index: {}]   ;;  %s1395_s4 = inlined_call_operand.vmem [shape: bf16[128,128], index: 4, kind: output, shape index: {}]  }
   0x1   :  { %s1247_s17 = smov 0  }
   0x2 LB: > { %s33_s18 = sadd.s32 1, %s1212_s16  ;;  %p969_p0 = scmp.ge.s32.totalorder %s1216_s17, 1  ;;  %s1216_s17 = sphi %s1247_s17, %s14_s17   ;;  %s1212_s16 = sphi %s1245_s16, %s1397_s16   ;;  %s1208_s15 = sphi %s1243_s15, %s1396_s15  }
   0x3   : > { %p35_p1 = scmp.ge.s32.totalorder %s33_s18, 2  ;;  %p224_p2 = scmp.lt.s32.totalorder %s1216_s17, 3 }
   0x5   : > { %s1399_s18 = smov (%p35_p1, %s33_s18), 0  ;;  %p225_p3 = pnand %p969_p0, %p224_p2 }
   0x6   : > { %v1154_v0 = vld [vmem:[%s1392_s1 + $0x40] sm:$0xff] (!%p225_p3)   ;;  %v1157_v3 = vld [vmem:[%s1392_s1 + $0x48] sm:$0xff] (!%p225_p3)   ;;  %v1160_v6 = vld [vmem:[%s1392_s1 + $0x50] sm:$0xff] (!%p225_p3)   ;;  %s970_s9 = sshll.u32 (!%p225_p3), %s1208_s15, 3 }
   0x7   : > { %228 = sbr.rel (%p225_p3) target bundleno = 291 (0x123), region = 36  ;;  %v1155_v1 = vld [vmem:[%s1392_s1] sm:$0xff] (!%p225_p3)   ;;  %1053 = vmatprep.subr.bf16.mxu0 (!%p225_p3), %v1154_v0  ;;  %v1158_v4 = vld [vmem:[%s1392_s1 + $0x8] sm:$0xff] (!%p225_p3)   ;;  %v1161_v7 = vld [vmem:[%s1392_s1 + $0x10] sm:$0xff] (!%p225_p3)   ;;  %p274_p4 = scmp.lt.s32.totalorder (!%p225_p3), %s970_s9, 15 }
   0x8   : > { %v1156_v2 = vld [vmem:[%s1392_s1 + $0x80] sm:$0xff] (!%p225_p3)   ;;  %1054 = vmatpush3.bf16.msra.mxu0 (!%p225_p3), %v1155_v1  ;;  %v1159_v5 = vld [vmem:[%s1392_s1 + $0x88] sm:$0xff] (!%p225_p3)   ;;  %v1162_v8 = vld [vmem:[%s1392_s1 + $0x90] sm:$0xff] (!%p225_p3)  }
   0x9   : > { %1105 = vmatprep.subr.bf16.mxu1 (!%p225_p3), %v1156_v2  ;;  %1055 = vmatprep.subr.bf16.mxu0 (!%p225_p3), %v1157_v3  ;;  %v1163_v9 = vld [vmem:[%s1392_s1 + $0x58] sm:$0xff] (!%p225_p3)   ;;  %v1166_v12 = vld [vmem:[%s1392_s1 + $0x60] sm:$0xff] (!%p225_p3)   ;;  %v1169_v15 = vld [vmem:[%s1392_s1 + $0x68] sm:$0xff] (!%p225_p3)  }
   0xa   : > { %1106 = vmatpush3.bf16.msra.mxu1 (!%p225_p3), %v1156_v2  ;;  %v1164_v10 = vld [vmem:[%s1392_s1 + $0x18] sm:$0xff] (!%p225_p3)   ;;  %v1168_v13 = vld [vmem:[%s1392_s1 + $0xa0] sm:$0xff] (!%p225_p3)   ;;  %v1171_v16 = vld [vmem:[%s1392_s1 + $0xa8] sm:$0xff] (!%p225_p3)  }
   0xb   : > { %1107 = vmatprep.subr.bf16.mxu1 (!%p225_p3), %v1159_v5  ;;  %v1165_v11 = vld [vmem:[%s1392_s1 + $0x98] sm:$0xff] (!%p225_p3)   ;;  %v1167_v14 = vld [vmem:[%s1392_s1 + $0x20] sm:$0xff] (!%p225_p3)   ;;  %v1170_v17 = vld [vmem:[%s1392_s1 + $0x28] sm:$0xff] (!%p225_p3)  }
   0xc   : > { %1056 = vmatpush3.bf16.msra.mxu0 (!%p225_p3), %v1158_v4  ;;  %v1172_v18 = vld [vmem:[%s1392_s1 + $0x70] sm:$0xff] (!%p225_p3)   ;;  %v1175_v21 = vld [vmem:[%s1392_s1 + $0x78] sm:$0xff] (!%p225_p3)   ;;  %v1359_v43 = vld [vmem:[%s1393_s2] ss:$0 sm:$0xff] (!%p225_p3) }
   0xd   : > { %1057 = vmatprep.subr.bf16.mxu0 (!%p225_p3), %v1160_v6  ;;  %v1173_v19 = vld [vmem:[%s1392_s1 + $0x30] sm:$0xff] (!%p225_p3)   ;;  %v1177_v22 = vld [vmem:[%s1392_s1 + $0xb8] sm:$0xff] (!%p225_p3)   ;;  %v1011_v47 = vld [vmem:[%s1394_s3] ss:$0 sm:$0xff] (!%p225_p3) }
   0xe   : > { %1108 = vmatpush3.bf16.msra.mxu1 %v1159_v5  ;;  %s1401_s9 = smov (!%p274_p4, %s970_s9), 15  ;;  %v1174_v20 = vld [vmem:[%s1392_s1 + $0xb0] sm:$0xff]   ;;  %v1176_v25 = vld [vmem:[%s1392_s1 + $0x38] sm:$0xff]  }
   0xf   : > { %1109 = vmatprep.subr.bf16.mxu1 %v1162_v8  ;;  %s1129_s5 = smul.u32 12, %s1401_s9 }
  0x10   : > { %1058 = vmatpush3.bf16.msra.mxu0 %v1161_v7 }
  0x11   : > { %1059 = vmatprep.subr.bf16.mxu0 %v1163_v9  ;;  %s1333_s21 = scalar_lea.vmem %s1391_s0, %s1129_s5  ;;  %s973_s5 = sshll.u32 %s1401_s9, 2 }
  0x12   : > { %1110 = vmatpush3.bf16.msra.mxu1 %v1162_v8  ;;  %v1180_v23 = vld [vmem:[%s1333_s21 + $0x4] ss:$12 sps:$4 sm:$0xff]   ;;  %v1181_v24 = vld [vmem:[%s1333_s21 + $0x8] ss:$12 sps:$4 sm:$0xff]   ;;  %v1178_v26 = vld [vmem:[%s1333_s21] ss:$12 sps:$4 sm:$0xff]   ;;  %s1370_s8 = scalar_lea.vmem %s1395_s4, %s973_s5 }
  0x13   : > { %1111 = vmatprep.subr.bf16.mxu1 %v1165_v11  ;;  %633 = vmatprep.mubr.bf16.mxu0 %v1180_v23  ;;  %v1183_v27 = vld [vmem:[%s1333_s21 + $0x1c] ss:$12 sps:$4 sm:$0xff]   ;;  %v1182_v28 = vld [vmem:[%s1333_s21 + $0x20] ss:$12 sps:$4 sm:$0xff]   ;;  %v1189_v29 = vld [vmem:[%s1333_s21 + $0x38] ss:$12 sps:$4 sm:$0xff]  }
  0x14   : > { %1060 = vmatpush3.bf16.msra.mxu0 %v1164_v10  ;;  %1121 = vmatprep.mubr.bf16.mxu1 %v1181_v24  ;;  %v1185_v30 = vld [vmem:[%s1333_s21 + $0x18] ss:$12 sps:$4 sm:$0xff]   ;;  %v1186_v31 = vld [vmem:[%s1333_s21 + $0x34] ss:$12 sps:$4 sm:$0xff]   ;;  %v1190_v32 = vld [vmem:[%s1333_s21 + $0x50] ss:$12 sps:$4 sm:$0xff]  }
  0x15   : > { %1061 = vmatprep.subr.bf16.mxu0 %v1166_v12  ;;  %v1188_v33 = vld [vmem:[%s1333_s21 + $0x30] ss:$12 sps:$4 sm:$0xff]   ;;  %v1191_v34 = vld [vmem:[%s1333_s21 + $0x4c] ss:$12 sps:$4 sm:$0xff]   ;;  %v1193_v35 = vld [vmem:[%s1333_s21 + $0x48] ss:$12 sps:$4 sm:$0xff]  }
  0x16   : > { %1112 = vmatpush3.bf16.msra.mxu1 %v1165_v11 }
  0x17   : > { %1113 = vmatprep.subr.bf16.mxu1 %v1168_v13 }
  0x18   : > { %1062 = vmatpush3.bf16.msra.mxu0 %v1167_v14 }
  0x19   : > { %1063 = vmatprep.subr.bf16.mxu0 %v1169_v15 }
  0x1a   : > { %1114 = vmatpush3.bf16.msra.mxu1 %v1168_v13 }
  0x1b   : > { %1115 = vmatprep.subr.bf16.mxu1 %v1171_v16 }
  0x1c   : > { %1064 = vmatpush3.bf16.msra.mxu0 %v1170_v17 }
  0x1d   : > { %1065 = vmatprep.subr.bf16.mxu0 %v1172_v18 }
  0x1e   : > { %1116 = vmatpush3.bf16.msra.mxu1 %v1171_v16 }
  0x1f   : > { %1117 = vmatprep.subr.bf16.mxu1 %v1174_v20 }
  0x20   : > { %1066 = vmatpush3.bf16.msra.mxu0 %v1173_v19 }
  0x21   : > { %1067 = vmatprep.subr.bf16.mxu0 %v1175_v21 }
  0x22   : > { %1118 = vmatpush3.bf16.msra.mxu1 %v1174_v20 }
  0x23   : > { %1119 = vmatprep.subr.bf16.mxu1 %v1177_v22 }
  0x24   : > { %1068 = vmatpush3.bf16.msra.mxu0 %v1176_v25 }
  0x26   : > { %1120 = vmatpush3.bf16.msra.mxu1 %v1177_v22 }
  0x27   : > { %634 = vmatmul.mubr.bf16.vlgmr.msra.gmra.mrb[0].mxu0 %v1178_v26 }
  0x28   : > { %641 = vmatprep.mubr.bf16.mxu0 %v1183_v27 }
  0x29   : > { %1122 = vmatmul.mubr.bf16.vlgmr.msra.gmra.mrb[0].mxu1 %v1182_v28 }
  0x2a   : > { %1125 = vmatprep.mubr.bf16.mxu1 %v1189_v29 }
  0x2f   : > { %642 = vmatmul.mubr.bf16.gmra.mrb[4].mxu0 %v1185_v30 }
  0x30   : > { %649 = vmatprep.mubr.bf16.mxu0 %v1186_v31 }
  0x31   : > { %1126 = vmatmul.mubr.bf16.gmra.mrb[4].mxu1 %v1190_v32 }
  0x37   : > { %650 = vmatmul.mubr.bf16.gmra.mrb[8].mxu0 %v1188_v33 }
  0x38   : > { %657 = vmatprep.mubr.bf16.mxu0 %v1191_v34 }
  0x3f   : > { %658 = vmatmul.mubr.bf16.gmra.mrb[12].mxu0 %v1193_v35 }
  0xfa   : > { %v1069_v36 = vpop.f32.mrb[0].mxu0 }
  0xfb   : > { %v1070_v37 = vpop.f32.mrb[1].mxu0 }
  0xfc   : > { %v1071_v38 = vadd.f32 %v1070_v37, %v1069_v36  ;;  %v1072_v39 = vpop.f32.mrb[2].mxu0  ;;  %v1123_v40 = vpop.f32.mrb[0].mxu1 }
  0xfd   : > { %v1073_v41 = vpop.f32.mrb[3].mxu0  ;;  %v700_v42 = vpop.f32.mrb[1].mxu1 }
  0xfe   : > { %v1074_v44 = vadd.f32 %v1073_v41, %v1072_v39  ;;  %v701_v45 = vadd.f32 %v1071_v38, %v700_v42  ;;  %v1124_v46 = vpop.f32.mrb[2].mxu1 }
  0xff   : > { %v703_v48 = vpop.f32.mrb[3].mxu1 }
 0x100   : > { %v765_v49 = vmul.f32 %v1359_v43, %v701_v45  ;;  %v704_v50 = vadd.f32 %v1074_v44, %v703_v48 }
 0x102   : > { %v780_v51 = vadd.f32 %v1011_v47, %v765_v49  ;;  %v766_v52 = vmul.f32 %v1359_v43, %v704_v50  ;;  %v1075_v53 = vpop.f32.mrb[4].mxu0 }
 0x103   : > { %v1076_v54 = vpop.f32.mrb[5].mxu0 }
 0x104   : > { %v781_v55 = vadd.f32 %v1011_v47, %v766_v52  ;;  %v1077_v56 = vadd.f32 %v1076_v54, %v1075_v53  ;;  %v1078_v57 = vpop.f32.mrb[6].mxu0  ;;  %v1127_v58 = vpop.f32.mrb[4].mxu1  ;;  %v788_v61 = vmax.f32 %v780_v51, 0.0 }
 0x105   : > { %v1079_v59 = vpop.f32.mrb[7].mxu0  ;;  %v716_v60 = vpop.f32.mrb[5].mxu1 }
 0x106   : > { %v789_v62 = vmax.f32 %v781_v55, 0.0  ;;  %v709_v63 = vadd.f32 %v1123_v40, %v1077_v56  ;;  %v1080_v0 = vadd.f32 %v1079_v59, %v1078_v57  ;;  %v1128_v1 = vpop.f32.mrb[6].mxu1 }
 0x107   : > { %v719_v2 = vpop.f32.mrb[7].mxu1 }
 0x108   : > { %v1033_v3 = vpack.c.bf16 %v789_v62, %v788_v61  ;;  %v767_v4 = vmul.f32 %v1359_v43, %v709_v63  ;;  %v712_v5 = vadd.f32 %v1124_v46, %v1080_v0 }
 0x10a   : > { %1034 = vst [vmem:[%s1370_s8] sm:$0xff] %v1033_v3   ;;  %v782_v6 = vadd.f32 %v1011_v47, %v767_v4  ;;  %v768_v7 = vmul.f32 %v1359_v43, %v712_v5  ;;  %v1081_v8 = vpop.f32.mrb[8].mxu0 }
 0x10b   : > { %v1082_v9 = vpop.f32.mrb[9].mxu0 }
 0x10c   : > { %v783_v10 = vadd.f32 %v1011_v47, %v768_v7  ;;  %v1083_v11 = vadd.f32 %v1082_v9, %v1081_v8  ;;  %v1084_v12 = vpop.f32.mrb[10].mxu0  ;;  %v790_v14 = vmax.f32 %v782_v6, 0.0 }
 0x10d   : > { %v1085_v13 = vpop.f32.mrb[11].mxu0 }
 0x10e   : > { %v791_v15 = vmax.f32 %v783_v10, 0.0  ;;  %v1086_v16 = vadd.f32 %v1085_v13, %v1084_v12  ;;  %v717_v17 = vadd.f32 %v1083_v11, %v716_v60 }
 0x110   : > { %v1038_v18 = vpack.c.bf16 %v791_v15, %v790_v14  ;;  %v769_v19 = vmul.f32 %v1359_v43, %v717_v17  ;;  %v720_v20 = vadd.f32 %v1086_v16, %v719_v2 }
 0x112   : > { %1050 = vst [vmem:[%s1370_s8 + $0x8] sm:$0xff] %v1038_v18   ;;  %v784_v21 = vadd.f32 %v1011_v47, %v769_v19  ;;  %v770_v22 = vmul.f32 %v1359_v43, %v720_v20  ;;  %v1087_v23 = vpop.f32.mrb[12].mxu0 }
 0x113   : > { %v1088_v24 = vpop.f32.mrb[13].mxu0 }
 0x114   : > { %v785_v25 = vadd.f32 %v1011_v47, %v770_v22  ;;  %v1089_v26 = vadd.f32 %v1088_v24, %v1087_v23  ;;  %v1090_v27 = vpop.f32.mrb[14].mxu0  ;;  %v792_v29 = vmax.f32 %v784_v21, 0.0 }
 0x115   : > { %v1091_v28 = vpop.f32.mrb[15].mxu0 }
 0x116   : > { %v793_v30 = vmax.f32 %v785_v25, 0.0  ;;  %v725_v31 = vadd.f32 %v1127_v58, %v1089_v26  ;;  %v1092_v32 = vadd.f32 %v1091_v28, %v1090_v27 }
 0x118   : > { %v1043_v33 = vpack.c.bf16 %v793_v30, %v792_v29  ;;  %v771_v34 = vmul.f32 %v1359_v43, %v725_v31  ;;  %v728_v35 = vadd.f32 %v1128_v1, %v1092_v32 }
 0x11a   : > { %1051 = vst [vmem:[%s1370_s8 + $0x10] sm:$0xff] %v1043_v33   ;;  %v786_v36 = vadd.f32 %v1011_v47, %v771_v34  ;;  %v772_v37 = vmul.f32 %v1359_v43, %v728_v35 }
 0x11c   : > { %v787_v38 = vadd.f32 %v1011_v47, %v772_v37  ;;  %v794_v39 = vmax.f32 %v786_v36, 0.0 }
 0x11e   : > { %v795_v40 = vmax.f32 %v787_v38, 0.0 }
 0x120   : > { %v1048_v41 = vpack.c.bf16 %v795_v40, %v794_v39 }
 0x122   : > { %1052 = vst [vmem:[%s1370_s8 + $0x18] sm:$0xff] %v1048_v41  }
 0x123 PF: > { %s14_s17 = sadd.s32 1, %s1216_s17   ;;  %s1396_s15 = smov %s1212_s16 }
 0x124   : > { %p11_p5 = scmp.ge.s32.totalorder %s14_s17, 4   ;;  %s1397_s16 = smov %s1399_s18 }
 0x126   :  { %13 = sbr.rel (!%p11_p5) target bundleno = 2 (0x2), region = 83 }

// kernel: resnext_forward.21
= control target key start
LH: loop header
LB: loop body
LE: loop exit
PB: predicated region body
PF: predicated region fallthrough
CT: control target
= control target key end

     0   :  { %s906_s15 = smov 0   ;;  %s908_s16 = smov 0   ;;  %s982_s0 = inlined_call_operand.vmem [shape: bf16[128,128], index: 0, kind: input, shape index: {}]   ;;  %s983_s1 = inlined_call_operand.vmem [shape: bf16[128,128], index: 1, kind: input, shape index: {}]   ;;  %s984_s2 = inlined_call_operand.vmem [shape: f32[1,128], index: 2, kind: input, shape index: {}]   ;;  %s985_s3 = inlined_call_operand.vmem [shape: f32[1,128], index: 3, kind: input, shape index: {}]   ;;  %s986_s4 = inlined_call_operand.vmem [shape: bf16[128,128], index: 4, kind: output, shape index: {}]  }
   0x1   :  { %s910_s17 = smov 0  }
   0x2 LB: > { %s33_s18 = sadd.s32 1, %s875_s16  ;;  %p709_p0 = scmp.ge.s32.totalorder %s879_s17, 1  ;;  %s879_s17 = sphi %s910_s17, %s14_s17   ;;  %s875_s16 = sphi %s908_s16, %s988_s16   ;;  %s871_s15 = sphi %s906_s15, %s987_s15  }
   0x3   : > { %p35_p1 = scmp.ge.s32.totalorder %s33_s18, 2  ;;  %p221_p2 = scmp.lt.s32.totalorder %s879_s17, 3 }
   0x5   : > { %s990_s18 = smov (%p35_p1, %s33_s18), 0  ;;  %p222_p3 = pnand %p709_p0, %p221_p2 }
   0x6   : > { %v845_v0 = vld [vmem:[%s983_s1] sm:$0xff] (!%p222_p3)   ;;  %s710_s21 = sshll.u32 (!%p222_p3), %s871_s15, 3  ;;  %v846_v1 = vld [vmem:[%s983_s1 + $0x8] sm:$0xff] (!%p222_p3)   ;;  %v847_v2 = vld [vmem:[%s983_s1 + $0x10] sm:$0xff] (!%p222_p3)  }
   0x7   : > { %225 = sbr.rel (%p222_p3) target bundleno = 261 (0x105), region = 36  ;;  %p268_p4 = scmp.lt.s32.totalorder (!%p222_p3), %s710_s21, 15  ;;  %781 = vmatprep.subr.bf16.mxu0 (!%p222_p3), %v845_v0  ;;  %805 = vmatprep.subr.bf16.mxu1 (!%p222_p3), %v845_v0  ;;  %v848_v3 = vld [vmem:[%s983_s1 + $0x18] sm:$0xff] (!%p222_p3)   ;;  %v849_v6 = vld [vmem:[%s983_s1 + $0x20] sm:$0xff] (!%p222_p3)   ;;  %v850_v7 = vld [vmem:[%s983_s1 + $0x28] sm:$0xff] (!%p222_p3)  }
   0x8   : > { %782 = vmatpush3.bf16.msra.mxu0 (!%p222_p3), %v845_v0  ;;  %813 = vmatpush3.bf16.msra.mxu1 (!%p222_p3), %v845_v0  ;;  %v851_v8 = vld [vmem:[%s983_s1 + $0x30] sm:$0xff] (!%p222_p3)   ;;  %v852_v9 = vld [vmem:[%s983_s1 + $0x38] sm:$0xff] (!%p222_p3)   ;;  %v726_v12 = vld [vmem:[%s984_s2] ss:$0 sm:$0xff] (!%p222_p3) }
   0x9   : > { %783 = vmatprep.subr.bf16.mxu0 (!%p222_p3), %v846_v1  ;;  %806 = vmatprep.subr.bf16.mxu1 (!%p222_p3), %v846_v1  ;;  %v727_v19 = vld [vmem:[%s985_s3] ss:$0 sm:$0xff] (!%p222_p3) }
   0xc   : > { %784 = vmatpush3.bf16.msra.mxu0 (!%p222_p3), %v846_v1  ;;  %814 = vmatpush3.bf16.msra.mxu1 (!%p222_p3), %v846_v1 }
   0xd   : > { %785 = vmatprep.subr.bf16.mxu0 (!%p222_p3), %v847_v2  ;;  %807 = vmatprep.subr.bf16.mxu1 (!%p222_p3), %v847_v2 }
   0xe   : > { %s992_s21 = smov (!%p268_p4, %s710_s21), 15 }
   0xf   : > { %s711_s26 = sshll.u32 %s992_s21, 2 }
  0x10   : > { %s941_s29 = scalar_lea.vmem %s982_s0, %s711_s26  ;;  %786 = vmatpush3.bf16.msra.mxu0 %v847_v2  ;;  %815 = vmatpush3.bf16.msra.mxu1 %v847_v2  ;;  %s298_s24 = scalar_lea.vmem %s986_s4, %s711_s26 }
  0x11   : > { %v853_v4 = vld [vmem:[%s941_s29] sm:$0xff]   ;;  %v854_v5 = vld [vmem:[%s941_s29 + $0x10] sm:$0xff]   ;;  %787 = vmatprep.subr.bf16.mxu0 %v848_v3  ;;  %808 = vmatprep.subr.bf16.mxu1 %v848_v3  ;;  %v855_v10 = vld [vmem:[%s941_s29 + $0x8] sm:$0xff]  }
  0x12   : > { %797 = vmatprep.mubr.bf16.mxu0 %v853_v4  ;;  %801 = vmatprep.mubr.bf16.mxu1 %v854_v5  ;;  %v856_v11 = vld [vmem:[%s941_s29 + $0x18] sm:$0xff]  }
  0x14   : > { %788 = vmatpush3.bf16.msra.mxu0 %v848_v3  ;;  %816 = vmatpush3.bf16.msra.mxu1 %v848_v3 }
  0x15   : > { %789 = vmatprep.subr.bf16.mxu0 %v849_v6  ;;  %809 = vmatprep.subr.bf16.mxu1 %v849_v6 }
  0x18   : > { %790 = vmatpush3.bf16.msra.mxu0 %v849_v6  ;;  %817 = vmatpush3.bf16.msra.mxu1 %v849_v6 }
  0x19   : > { %791 = vmatprep.subr.bf16.mxu0 %v850_v7  ;;  %810 = vmatprep.subr.bf16.mxu1 %v850_v7 }
  0x1c   : > { %792 = vmatpush3.bf16.msra.mxu0 %v850_v7  ;;  %818 = vmatpush3.bf16.msra.mxu1 %v850_v7 }
  0x1d   : > { %793 = vmatprep.subr.bf16.mxu0 %v851_v8  ;;  %811 = vmatprep.subr.bf16.mxu1 %v851_v8 }
  0x20   : > { %794 = vmatpush3.bf16.msra.mxu0 %v851_v8  ;;  %819 = vmatpush3.bf16.msra.mxu1 %v851_v8 }
  0x21   : > { %795 = vmatprep.subr.bf16.mxu0 %v852_v9  ;;  %812 = vmatprep.subr.bf16.mxu1 %v852_v9 }
  0x24   : > { %796 = vmatpush3.bf16.msra.mxu0 %v852_v9  ;;  %820 = vmatpush3.bf16.msra.mxu1 %v852_v9 }
  0x27   : > { %798 = vmatmul.mubr.bf16.vlgmr.msra.gmra.mrb[0].mxu0 %v855_v10  ;;  %802 = vmatmul.mubr.bf16.vlgmr.msra.gmra.mrb[0].mxu1 %v856_v11 }
  0xfa   : > { %v799_v13 = vpop.f32.mrb[0].mxu0  ;;  %v803_v14 = vpop.f32.mrb[0].mxu1 }
  0xfb   : > { %v518_v15 = vmul.f32 %v799_v13, %v726_v12  ;;  %v522_v16 = vmul.f32 %v803_v14, %v726_v12  ;;  %v451_v17 = vpop.f32.mrb[1].mxu0  ;;  %v467_v18 = vpop.f32.mrb[1].mxu1 }
  0xfc   : > { %v516_v20 = vmul.f32 %v726_v12, %v451_v17  ;;  %v520_v21 = vmul.f32 %v726_v12, %v467_v18  ;;  %v800_v22 = vpop.f32.mrb[2].mxu0  ;;  %v804_v23 = vpop.f32.mrb[2].mxu1 }
  0xfd   : > { %v519_v24 = vmul.f32 %v800_v22, %v726_v12  ;;  %v523_v25 = vmul.f32 %v804_v23, %v726_v12  ;;  %v454_v26 = vpop.f32.mrb[3].mxu0  ;;  %v470_v27 = vpop.f32.mrb[3].mxu1  ;;  %v533_v30 = vadd.f32 %v727_v19, %v518_v15  ;;  %v537_v31 = vadd.f32 %v727_v19, %v522_v16 }
  0xfe   : > { %v517_v28 = vmul.f32 %v726_v12, %v454_v26  ;;  %v521_v29 = vmul.f32 %v726_v12, %v470_v27  ;;  %v531_v34 = vadd.f32 %v727_v19, %v516_v20  ;;  %v535_v35 = vadd.f32 %v727_v19, %v520_v21 }
  0xff   : > { %v534_v32 = vadd.f32 %v727_v19, %v519_v24  ;;  %v538_v33 = vadd.f32 %v727_v19, %v523_v25 }
 0x100   : > { %v532_v36 = vadd.f32 %v727_v19, %v517_v28  ;;  %v536_v37 = vadd.f32 %v727_v19, %v521_v29 }
 0x101   : > { %v754_v38 = vpack.c.bf16 %v534_v32, %v533_v30  ;;  %v764_v39 = vpack.c.bf16 %v538_v33, %v537_v31 }
 0x102   : > { %v749_v40 = vpack.c.bf16 %v532_v36, %v531_v34  ;;  %v759_v41 = vpack.c.bf16 %v536_v37, %v535_v35 }
 0x103   : > { %766 = vst [vmem:[%s298_s24 + $0x8] sm:$0xff] %v754_v38   ;;  %768 = vst [vmem:[%s298_s24 + $0x18] sm:$0xff] %v764_v39  }
 0x104   : > { %750 = vst [vmem:[%s298_s24] sm:$0xff] %v749_v40   ;;  %767 = vst [vmem:[%s298_s24 + $0x10] sm:$0xff] %v759_v41  }
 0x105 PF: > { %s14_s17 = sadd.s32 1, %s879_s17   ;;  %s987_s15 = smov %s875_s16 }
 0x106   : > { %p11_p5 = scmp.ge.s32.totalorder %s14_s17, 4   ;;  %s988_s16 = smov %s990_s18 }
 0x108   :  { %13 = sbr.rel (!%p11_p5) target bundleno = 2 (0x2), region = 83 }

// kernel: resnext_forward.22
= control target key start
LH: loop header
LB: loop body
LE: loop exit
PB: predicated region body
PF: predicated region fallthrough
CT: control target
= control target key end

     0   :  { %s1039_s18 = smov 0   ;;  %s1041_s19 = smov 0   ;;  %s1116_s0 = inlined_call_operand.vmem [shape: bf16[128,128], index: 0, kind: input, shape index: {}]   ;;  %s1117_s1 = inlined_call_operand.vmem [shape: bf16[128,128], index: 1, kind: input, shape index: {}]   ;;  %s1118_s2 = inlined_call_operand.vmem [shape: f32[1,128], index: 2, kind: input, shape index: {}]   ;;  %s1119_s3 = inlined_call_operand.vmem [shape: f32[1,128], index: 3, kind: input, shape index: {}]   ;;  %s1120_s4 = inlined_call_operand.vmem [shape: bf16[128,128], index: 4, kind: input, shape index: {}]   ;;  %s1121_s5 = inlined_call_operand.vmem [shape: bf16[128,128], index: 5, kind: output, shape index: {}]  }
   0x1   :  { %s1043_s20 = smov 0  }
   0x2 LB: > { %s34_s21 = sadd.s32 1, %s1003_s19  ;;  %p816_p0 = scmp.ge.s32.totalorder %s1007_s20, 1  ;;  %s1007_s20 = sphi %s1043_s20, %s15_s20   ;;  %s1003_s19 = sphi %s1041_s19, %s1123_s19   ;;  %s999_s18 = sphi %s1039_s18, %s1122_s18  }
   0x3   : > { %p36_p1 = scmp.ge.s32.totalorder %s34_s21, 2  ;;  %p262_p2 = scmp.lt.s32.totalorder %s1007_s20, 3 }
   0x5   : > { %s1125_s21 = smov (%p36_p1, %s34_s21), 0  ;;  %p263_p3 = pnand %p816_p0, %p262_p2 }
   0x6   : > { %v973_v0 = vld [vmem:[%s1117_s1] sm:$0xff] (!%p263_p3)   ;;  %s817_s24 = sshll.u32 (!%p263_p3), %s999_s18, 3  ;;  %v974_v1 = vld [vmem:[%s1117_s1 + $0x8] sm:$0xff] (!%p263_p3)   ;;  %v975_v2 = vld [vmem:[%s1117_s1 + $0x10] sm:$0xff] (!%p263_p3)  }
   0x7   : > { %266 = sbr.rel (%p263_p3) target bundleno = 265 (0x109), region = 40  ;;  %p319_p4 = scmp.lt.s32.totalorder (!%p263_p3), %s817_s24, 15  ;;  %909 = vmatprep.subr.bf16.mxu0 (!%p263_p3), %v973_v0  ;;  %933 = vmatprep.subr.bf16.mxu1 (!%p263_p3), %v973_v0  ;;  %v976_v3 = vld [vmem:[%s1117_s1 + $0x18] sm:$0xff] (!%p263_p3)   ;;  %v977_v6 = vld [vmem:[%s1117_s1 + $0x20] sm:$0xff] (!%p263_p3)   ;;  %v978_v7 = vld [vmem:[%s1117_s1 + $0x28] sm:$0xff] (!%p263_p3)  }
   0x8   : > { %910 = vmatpush3.bf16.msra.mxu0 (!%p263_p3), %v973_v0  ;;  %941 = vmatpush3.bf16.msra.mxu1 (!%p263_p3), %v973_v0  ;;  %v979_v8 = vld [vmem:[%s1117_s1 + $0x30] sm:$0xff] (!%p263_p3)   ;;  %v980_v9 = vld [vmem:[%s1117_s1 + $0x38] sm:$0xff] (!%p263_p3)   ;;  %v835_v16 = vld [vmem:[%s1118_s2] ss:$0 sm:$0xff] (!%p263_p3) }
   0x9   : > { %911 = vmatprep.subr.bf16.mxu0 (!%p263_p3), %v974_v1  ;;  %934 = vmatprep.subr.bf16.mxu1 (!%p263_p3), %v974_v1  ;;  %v836_v18 = vld [vmem:[%s1119_s3] ss:$0 sm:$0xff] (!%p263_p3) }
   0xc   : > { %912 = vmatpush3.bf16.msra.mxu0 (!%p263_p3), %v974_v1  ;;  %942 = vmatpush3.bf16.msra.mxu1 (!%p263_p3), %v974_v1 }
   0xd   : > { %913 = vmatprep.subr.bf16.mxu0 (!%p263_p3), %v975_v2  ;;  %935 = vmatprep.subr.bf16.mxu1 (!%p263_p3), %v975_v2 }
   0xe   : > { %s1127_s24 = smov (!%p319_p4, %s817_s24), 15 }
   0xf   : > { %s1066_s29 = sshll.u32 %s1127_s24, 2 }
  0x10   : > { %s1072_s7 = scalar_lea.vmem %s1116_s0, %s1066_s29  ;;  %914 = vmatpush3.bf16.msra.mxu0 %v975_v2  ;;  %943 = vmatpush3.bf16.msra.mxu1 %v975_v2  ;;  %s349_s23 = scalar_lea.vmem %s1120_s4, %s1066_s29 }
  0x11   : > { %v981_v4 = vld [vmem:[%s1072_s7] sm:$0xff]   ;;  %v982_v5 = vld [vmem:[%s1072_s7 + $0x10] sm:$0xff]   ;;  %915 = vmatprep.subr.bf16.mxu0 %v976_v3  ;;  %936 = vmatprep.subr.bf16.mxu1 %v976_v3  ;;  %v983_v10 = vld [vmem:[%s1072_s7 + $0x8] sm:$0xff]   ;;  %s358_s6 = scalar_lea.vmem %s1121_s5, %s1066_s29 }
  0x12   : > { %925 = vmatprep.mubr.bf16.mxu0 %v981_v4  ;;  %929 = vmatprep.mubr.bf16.mxu1 %v982_v5  ;;  %v984_v11 = vld [vmem:[%s1072_s7 + $0x18] sm:$0xff]   ;;  %v891_v12 = vld [vmem:[%s349_s23 + $0x8] sm:$0xff]   ;;  %v856_v14 = vld [vmem:[%s349_s23] sm:$0xff]  }
  0x13   : > { %v893_v13 = vld [vmem:[%s349_s23 + $0x18] sm:$0xff]   ;;  %v892_v15 = vld [vmem:[%s349_s23 + $0x10] sm:$0xff]   ;;  %v861_v19 = vunpack.c.l.bf16 %v891_v12  ;;  %v857_v22 = vunpack.c.l.bf16 %v856_v14  ;;  %v862_v28 = vunpack.c.h.bf16 %v891_v12  ;;  %v858_v34 = vunpack.c.h.bf16 %v856_v14 }
  0x14   : > { %916 = vmatpush3.bf16.msra.mxu0 %v976_v3  ;;  %944 = vmatpush3.bf16.msra.mxu1 %v976_v3  ;;  %v869_v21 = vunpack.c.l.bf16 %v893_v13  ;;  %v865_v23 = vunpack.c.l.bf16 %v892_v15  ;;  %v870_v29 = vunpack.c.h.bf16 %v893_v13  ;;  %v866_v35 = vunpack.c.h.bf16 %v892_v15 }
  0x15   : > { %917 = vmatprep.subr.bf16.mxu0 %v977_v6  ;;  %937 = vmatprep.subr.bf16.mxu1 %v977_v6 }
  0x18   : > { %918 = vmatpush3.bf16.msra.mxu0 %v977_v6  ;;  %945 = vmatpush3.bf16.msra.mxu1 %v977_v6 }
  0x19   : > { %919 = vmatprep.subr.bf16.mxu0 %v978_v7  ;;  %938 = vmatprep.subr.bf16.mxu1 %v978_v7 }
  0x1c   : > { %920 = vmatpush3.bf16.msra.mxu0 %v978_v7  ;;  %946 = vmatpush3.bf16.msra.mxu1 %v978_v7 }
  0x1d   : > { %921 = vmatprep.subr.bf16.mxu0 %v979_v8  ;;  %939 = vmatprep.subr.bf16.mxu1 %v979_v8 }
  0x20   : > { %922 = vmatpush3.bf16.msra.mxu0 %v979_v8  ;;  %947 = vmatpush3.bf16.msra.mxu1 %v979_v8 }
  0x21   : > { %923 = vmatprep.subr.bf16.mxu0 %v980_v9  ;;  %940 = vmatprep.subr.bf16.mxu1 %v980_v9 }
  0x24   : > { %924 = vmatpush3.bf16.msra.mxu0 %v980_v9  ;;  %948 = vmatpush3.bf16.msra.mxu1 %v980_v9 }
  0x27   : > { %926 = vmatmul.mubr.bf16.vlgmr.msra.gmra.mrb[0].mxu0 %v983_v10  ;;  %930 = vmatmul.mubr.bf16.vlgmr.msra.gmra.mrb[0].mxu1 %v984_v11 }
  0xfa   : > { %v927_v17 = vpop.f32.mrb[0].mxu0  ;;  %v931_v20 = vpop.f32.mrb[0].mxu1 }
  0xfb   : > { %v578_v24 = vmul.f32 %v927_v17, %v835_v16  ;;  %v582_v25 = vmul.f32 %v931_v20, %v835_v16  ;;  %v511_v26 = vpop.f32.mrb[1].mxu0  ;;  %v527_v27 = vpop.f32.mrb[1].mxu1 }
  0xfc   : > { %v576_v30 = vmul.f32 %v835_v16, %v511_v26  ;;  %v580_v31 = vmul.f32 %v835_v16, %v527_v27  ;;  %v928_v32 = vpop.f32.mrb[2].mxu0  ;;  %v932_v33 = vpop.f32.mrb[2].mxu1 }
  0xfd   : > { %v593_v36 = vadd.f32 %v836_v18, %v578_v24  ;;  %v597_v37 = vadd.f32 %v836_v18, %v582_v25  ;;  %v579_v38 = vmul.f32 %v928_v32, %v835_v16  ;;  %v583_v39 = vmul.f32 %v932_v33, %v835_v16  ;;  %v514_v40 = vpop.f32.mrb[3].mxu0  ;;  %v530_v41 = vpop.f32.mrb[3].mxu1 }
  0xfe   : > { %v591_v42 = vadd.f32 %v836_v18, %v576_v30  ;;  %v595_v43 = vadd.f32 %v836_v18, %v580_v31  ;;  %v577_v44 = vmul.f32 %v835_v16, %v514_v40  ;;  %v581_v45 = vmul.f32 %v835_v16, %v530_v41 }
  0xff   : > { %v617_v46 = vadd.f32 %v861_v19, %v593_v36  ;;  %v621_v47 = vadd.f32 %v869_v21, %v597_v37  ;;  %v594_v48 = vadd.f32 %v836_v18, %v579_v38  ;;  %v598_v49 = vadd.f32 %v836_v18, %v583_v39 }
 0x100   : > { %v615_v50 = vadd.f32 %v857_v22, %v591_v42  ;;  %v619_v51 = vadd.f32 %v865_v23, %v595_v43  ;;  %v592_v52 = vadd.f32 %v836_v18, %v577_v44  ;;  %v596_v53 = vadd.f32 %v836_v18, %v581_v45 }
 0x101   : > { %v618_v54 = vadd.f32 %v862_v28, %v594_v48  ;;  %v622_v55 = vadd.f32 %v870_v29, %v598_v49  ;;  %v625_v58 = vmax.f32 %v617_v46, 0.0  ;;  %v629_v59 = vmax.f32 %v621_v47, 0.0 }
 0x102   : > { %v616_v56 = vadd.f32 %v858_v34, %v592_v52  ;;  %v620_v57 = vadd.f32 %v866_v35, %v596_v53  ;;  %v623_v62 = vmax.f32 %v615_v50, 0.0  ;;  %v627_v63 = vmax.f32 %v619_v51, 0.0 }
 0x103   : > { %v626_v60 = vmax.f32 %v618_v54, 0.0  ;;  %v630_v61 = vmax.f32 %v622_v55, 0.0 }
 0x104   : > { %v624_v0 = vmax.f32 %v616_v56, 0.0  ;;  %v628_v1 = vmax.f32 %v620_v57, 0.0 }
 0x105   : > { %v879_v2 = vpack.c.bf16 %v626_v60, %v625_v58  ;;  %v889_v3 = vpack.c.bf16 %v630_v61, %v629_v59 }
 0x106   : > { %v874_v4 = vpack.c.bf16 %v624_v0, %v623_v62  ;;  %v884_v5 = vpack.c.bf16 %v628_v1, %v627_v63 }
 0x107   : > { %894 = vst [vmem:[%s358_s6 + $0x8] sm:$0xff] %v879_v2   ;;  %896 = vst [vmem:[%s358_s6 + $0x18] sm:$0xff] %v889_v3  }
 0x108   : > { %875 = vst [vmem:[%s358_s6] sm:$0xff] %v874_v4   ;;  %895 = vst [vmem:[%s358_s6 + $0x10] sm:$0xff] %v884_v5  }
 0x109 PF: > { %s15_s20 = sadd.s32 1, %s1007_s20   ;;  %s1122_s18 = smov %s1003_s19 }
 0x10a   : > { %p12_p5 = scmp.ge.s32.totalorder %s15_s20, 4   ;;  %s1123_s19 = smov %s1125_s21 }
 0x10c   :  { %14 = sbr.rel (!%p12_p5) target bundleno = 2 (0x2), region = 90 }

// kernel: resnext_forward.25
= control target key start
LH: loop header
LB: loop body
LE: loop exit
PB: predicated region body
PF: predicated region fallthrough
CT: control target
= control target key end

     0   :  { %s731_s15 = smov 0   ;;  %s733_s16 = smov 0   ;;  %s801_s0 = inlined_call_operand.vmem [shape: bf16[32,128], index: 0, kind: input, shape index: {}]   ;;  %s802_s1 = inlined_call_operand.vmem [shape: bf16[128,128], index: 1, kind: input, shape index: {}]   ;;  %s803_s2 = inlined_call_operand.vmem [shape: f32[1,128], index: 2, kind: input, shape index: {}]   ;;  %s804_s3 = inlined_call_operand.vmem [shape: f32[1,128], index: 3, kind: input, shape index: {}]   ;;  %s805_s4 = inlined_call_operand.vmem [shape: bf16[32,128], index: 4, kind: output, shape index: {}]  }
   0x1   :  { %s735_s17 = smov 0  }
   0x2 LB: > { %s33_s18 = sadd.s32 1, %s698_s16  ;;  %p589_p0 = scmp.ge.s32.totalorder %s702_s17, 1  ;;  %s702_s17 = sphi %s735_s17, %s14_s17   ;;  %s698_s16 = sphi %s733_s16, %s807_s16   ;;  %s694_s15 = sphi %s731_s15, %s806_s15  }
   0x3   : > { %p35_p1 = scmp.ge.s32.totalorder %s33_s18, 2  ;;  %p221_p2 = scmp.lt.s32.totalorder %s702_s17, 3 }
   0x5   : > { %s809_s18 = smov (%p35_p1, %s33_s18), 0  ;;  %p222_p3 = pnand %p589_p0, %p221_p2 }
   0x6   : > { %v671_v0 = vld [vmem:[%s802_s1] sm:$0xff] (!%p222_p3)   ;;  %v704_v1 = vmov (!%p222_p3), 0.0   ;;  %v672_v2 = vld [vmem:[%s802_s1 + $0x8] sm:$0xff] (!%p222_p3)   ;;  %vm705_vm0 = vmmov (!%p222_p3), 0   ;;  %s590_s23 = sshll.u32 (!%p222_p3), %s694_s15, 1  ;;  %v673_v3 = vld [vmem:[%s802_s1 + $0x10] sm:$0xff] (!%p222_p3)  }
   0x7   : > { %225 = sbr.rel (%p222_p3) target bundleno = 260 (0x104), region = 36  ;;  %625 = vmatprep.subr.bf16.mxu0 (!%p222_p3), %v704_v1  ;;  %641 = vmatprep.mubr.msk.bf16.mxu0 (!%p222_p3), %vm705_vm0, %v704_v1  ;;  %p268_p4 = scmp.lt.s32.totalorder (!%p222_p3), %s590_s23, 3  ;;  %v674_v4 = vld [vmem:[%s802_s1 + $0x18] sm:$0xff] (!%p222_p3)   ;;  %v675_v5 = vld [vmem:[%s802_s1 + $0x20] sm:$0xff] (!%p222_p3)   ;;  %v676_v6 = vld [vmem:[%s802_s1 + $0x28] sm:$0xff] (!%p222_p3)  }
   0x8   : > { %626 = vmatpush3.bf16.msra.mxu0 (!%p222_p3), %v671_v0  ;;  %v677_v7 = vld [vmem:[%s802_s1 + $0x30] sm:$0xff] (!%p222_p3)   ;;  %v678_v8 = vld [vmem:[%s802_s1 + $0x38] sm:$0xff] (!%p222_p3)   ;;  %v603_v10 = vld [vmem:[%s803_s2] ss:$0 sm:$0xff] (!%p222_p3) }
   0x9   : > { %627 = vmatprep.subr.bf16.mxu0 (!%p222_p3), %v704_v1  ;;  %v604_v14 = vld [vmem:[%s804_s3] ss:$0 sm:$0xff] (!%p222_p3) }
   0xc   : > { %628 = vmatpush3.bf16.msra.mxu0 (!%p222_p3), %v672_v2 }
   0xd   : > { %629 = vmatprep.subr.bf16.mxu0 (!%p222_p3), %v704_v1 }
   0xe   : > { %s811_s23 = smov (!%p268_p4, %s590_s23), 3 }
   0xf   : > { %s591_s26 = sshll.u32 %s811_s23, 2 }
  0x10   : > { %s274_s29 = scalar_lea.vmem %s801_s0, %s591_s26  ;;  %630 = vmatpush3.bf16.msra.mxu0 %v673_v3  ;;  %s298_s24 = scalar_lea.vmem %s805_s4, %s591_s26 }
  0x11   : > { %631 = vmatprep.subr.bf16.mxu0 %v704_v1  ;;  %v679_v9 = vld [vmem:[%s274_s29] sm:$0xff]  }
  0x14   : > { %632 = vmatpush3.bf16.msra.mxu0 %v674_v4 }
  0x15   : > { %633 = vmatprep.subr.bf16.mxu0 %v704_v1 }
  0x18   : > { %634 = vmatpush3.bf16.msra.mxu0 %v675_v5 }
  0x19   : > { %635 = vmatprep.subr.bf16.mxu0 %v704_v1 }
  0x1c   : > { %636 = vmatpush3.bf16.msra.mxu0 %v676_v6 }
  0x1d   : > { %637 = vmatprep.subr.bf16.mxu0 %v704_v1 }
  0x20   : > { %638 = vmatpush3.bf16.msra.mxu0 %v677_v7 }
  0x21   : > { %639 = vmatprep.subr.bf16.mxu0 %v704_v1 }
  0x24   : > { %640 = vmatpush3.bf16.msra.mxu0 %v678_v8 }
  0x27   : > { %642 = vmatmul.mubr.bf16.vlgmr.msra.gmra.mrb[0].mxu0 %v679_v9 }
  0xfa   : > { %v415_v11 = vpop.f32.mrb[0].mxu0 }
  0xfb   : > { %v438_v12 = vmul.f32 %v603_v10, %v415_v11  ;;  %v643_v13 = vpop.f32.mrb[1].mxu0 }
  0xfc   : > { %v418_v15 = vpop.f32.mrb[2].mxu0 }
  0xfd   : > { %v439_v16 = vmul.f32 %v603_v10, %v418_v15  ;;  %v644_v17 = vpop.f32.mrb[3].mxu0  ;;  %v447_v18 = vadd.f32 %v604_v14, %v438_v12 }
  0xff   : > { %v448_v19 = vadd.f32 %v604_v14, %v439_v16 }
 0x101   : > { %v614_v20 = vpack.c.bf16 %v448_v19, %v447_v18 }
 0x103   : > { %615 = vst [vmem:[%s298_s24] sm:$0xff] %v614_v20  }
 0x104 PF: > { %s14_s17 = sadd.s32 1, %s702_s17   ;;  %s806_s15 = smov %s698_s16 }
 0x105   : > { %p11_p5 = scmp.ge.s32.totalorder %s14_s17, 4   ;;  %s807_s16 = smov %s809_s18 }
 0x107   :  { %13 = sbr.rel (!%p11_p5) target bundleno = 2 (0x2), region = 83 }

// kernel: resnext_forward.24
= control target key start
LH: loop header
LB: loop body
LE: loop exit
PB: predicated region body
PF: predicated region fallthrough
CT: control target
= control target key end

     0   :  { %s1225_s15 = smov 0   ;;  %s1227_s16 = smov 0   ;;  %s1398_s0 = inlined_call_operand.vmem [shape: bf16[32,640], index: 0, kind: input, shape index: {}]   ;;  %s1399_s1 = inlined_call_operand.vmem [shape: bf16[640,128], index: 1, kind: input, shape index: {}]   ;;  %s1400_s2 = inlined_call_operand.vmem [shape: f32[1,128], index: 2, kind: input, shape index: {}]   ;;  %s1401_s3 = inlined_call_operand.vmem [shape: f32[1,128], index: 3, kind: input, shape index: {}]   ;;  %s1402_s4 = inlined_call_operand.vmem [shape: bf16[32,128], index: 4, kind: output, shape index: {}]  }
   0x1   :  { %s1229_s17 = smov 0  }
   0x2 LB: > { %s33_s18 = sadd.s32 1, %s1192_s16  ;;  %p964_p0 = scmp.ge.s32.totalorder %s1196_s17, 1  ;;  %s1196_s17 = sphi %s1229_s17, %s14_s17   ;;  %s1192_s16 = sphi %s1227_s16, %s1404_s16   ;;  %s1188_s15 = sphi %s1225_s15, %s1403_s15  }
   0x3   : > { %p35_p1 = scmp.ge.s32.totalorder %s33_s18, 2  ;;  %p224_p2 = scmp.lt.s32.totalorder %s1196_s17, 3 }
   0x5   : > { %s1406_s18 = smov (%p35_p1, %s33_s18), 0  ;;  %p225_p3 = pnand %p964_p0, %p224_p2 }
   0x6   : > { %v1127_v0 = vld [vmem:[%s1399_s1 + $0x40] sm:$0xff] (!%p225_p3)   ;;  %v1131_v4 = vld [vmem:[%s1399_s1 + $0x48] sm:$0xff] (!%p225_p3)   ;;  %v1135_v8 = vld [vmem:[%s1399_s1 + $0x50] sm:$0xff] (!%p225_p3)   ;;  %s965_s27 = sshll.u32 (!%p225_p3), %s1188_s15, 1  ;;  %v1198_v34 = vmov (!%p225_p3), 0.0   ;;  %vm1199_vm0 = vmmov (!%p225_p3), 0  }
   0x7   : > { %228 = sbr.rel (%p225_p3) target bundleno = 297 (0x129), region = 36  ;;  %v1128_v1 = vld [vmem:[%s1399_s1 + $0xc0] sm:$0xff] (!%p225_p3)   ;;  %1027 = vmatprep.subr.bf16.mxu0 (!%p225_p3), %v1127_v0  ;;  %v1132_v5 = vld [vmem:[%s1399_s1 + $0xc8] sm:$0xff] (!%p225_p3)   ;;  %v1136_v9 = vld [vmem:[%s1399_s1 + $0xd0] sm:$0xff] (!%p225_p3)   ;;  %p274_p4 = scmp.lt.s32.totalorder (!%p225_p3), %s965_s27, 3 }
   0x8   : > { %v1129_v2 = vld [vmem:[%s1399_s1] sm:$0xff] (!%p225_p3)   ;;  %1049 = vmatprep.subr.bf16.mxu1 (!%p225_p3), %v1128_v1  ;;  %v1133_v6 = vld [vmem:[%s1399_s1 + $0x8] sm:$0xff] (!%p225_p3)   ;;  %v1137_v10 = vld [vmem:[%s1399_s1 + $0x10] sm:$0xff] (!%p225_p3)  }
   0x9   : > { %v1130_v3 = vld [vmem:[%s1399_s1 + $0x80] sm:$0xff] (!%p225_p3)   ;;  %1028 = vmatpush3.bf16.msra.mxu0 (!%p225_p3), %v1129_v2  ;;  %v1134_v7 = vld [vmem:[%s1399_s1 + $0x88] sm:$0xff] (!%p225_p3)   ;;  %v1138_v11 = vld [vmem:[%s1399_s1 + $0x90] sm:$0xff] (!%p225_p3)  }
   0xa   : > { %1050 = vmatpush3.bf16.msra.mxu1 (!%p225_p3), %v1130_v3  ;;  %1029 = vmatprep.subr.bf16.mxu0 (!%p225_p3), %v1131_v4  ;;  %v1139_v12 = vld [vmem:[%s1399_s1 + $0x58] sm:$0xff] (!%p225_p3)   ;;  %v1143_v16 = vld [vmem:[%s1399_s1 + $0x60] sm:$0xff] (!%p225_p3)   ;;  %v1147_v20 = vld [vmem:[%s1399_s1 + $0x68] sm:$0xff] (!%p225_p3)  }
   0xb   : > { %1051 = vmatprep.subr.bf16.mxu1 (!%p225_p3), %v1132_v5  ;;  %v1140_v13 = vld [vmem:[%s1399_s1 + $0xd8] sm:$0xff] (!%p225_p3)   ;;  %v1144_v17 = vld [vmem:[%s1399_s1 + $0xe0] sm:$0xff] (!%p225_p3)   ;;  %v1148_v21 = vld [vmem:[%s1399_s1 + $0xe8] sm:$0xff] (!%p225_p3)  }
   0xc   : > { %v1141_v14 = vld [vmem:[%s1399_s1 + $0x18] sm:$0xff] (!%p225_p3)   ;;  %v1145_v18 = vld [vmem:[%s1399_s1 + $0x20] sm:$0xff] (!%p225_p3)   ;;  %v1149_v22 = vld [vmem:[%s1399_s1 + $0x28] sm:$0xff] (!%p225_p3)  }
   0xd   : > { %1030 = vmatpush3.bf16.msra.mxu0 (!%p225_p3), %v1133_v6  ;;  %v1142_v15 = vld [vmem:[%s1399_s1 + $0x98] sm:$0xff] (!%p225_p3)   ;;  %v1146_v19 = vld [vmem:[%s1399_s1 + $0xa0] sm:$0xff] (!%p225_p3)   ;;  %v1150_v23 = vld [vmem:[%s1399_s1 + $0xa8] sm:$0xff] (!%p225_p3)  }
   0xe   : > { %1052 = vmatpush3.bf16.msra.mxu1 %v1134_v7  ;;  %1031 = vmatprep.subr.bf16.mxu0 %v1135_v8  ;;  %s1408_s27 = smov (!%p274_p4, %s965_s27), 3  ;;  %v1151_v24 = vld [vmem:[%s1399_s1 + $0x70] sm:$0xff]   ;;  %v1155_v28 = vld [vmem:[%s1399_s1 + $0x78] sm:$0xff]   ;;  %v1165_v37 = vld [vmem:[%s1399_s1 + $0x100] sm:$0xff]  }
   0xf   : > { %1053 = vmatprep.subr.bf16.mxu1 %v1136_v9  ;;  %v1152_v25 = vld [vmem:[%s1399_s1 + $0xf0] sm:$0xff]   ;;  %s1100_s28 = smul.u32 20, %s1408_s27  ;;  %v1156_v29 = vld [vmem:[%s1399_s1 + $0xf8] sm:$0xff]   ;;  %v1166_v38 = vld [vmem:[%s1399_s1 + $0x108] sm:$0xff]   ;;  %s968_s19 = sshll.u32 %s1408_s27, 2 }
  0x10   : > { %v1153_v26 = vld [vmem:[%s1399_s1 + $0x30] sm:$0xff]   ;;  %v1157_v30 = vld [vmem:[%s1399_s1 + $0x38] sm:$0xff]   ;;  %v1169_v41 = vld [vmem:[%s1399_s1 + $0x120] sm:$0xff]   ;;  %s306_s22 = scalar_lea.vmem %s1402_s4, %s968_s19 }
  0x11   : > { %1032 = vmatpush3.bf16.msra.mxu0 %v1137_v10  ;;  %v1154_v27 = vld [vmem:[%s1399_s1 + $0xb0] sm:$0xff]   ;;  %s1342_s12 = scalar_lea.vmem %s1398_s0, %s1100_s28  ;;  %v1158_v31 = vld [vmem:[%s1399_s1 + $0xb8] sm:$0xff]   ;;  %v1170_v42 = vld [vmem:[%s1399_s1 + $0x128] sm:$0xff]  }
  0x12   : > { %1054 = vmatpush3.bf16.msra.mxu1 %v1138_v11  ;;  %1033 = vmatprep.subr.bf16.mxu0 %v1139_v12  ;;  %v1159_v32 = vld [vmem:[%s1342_s12] ss:$20 sps:$4 sm:$0xff]   ;;  %v1161_v33 = vld [vmem:[%s1342_s12 + $0x4] ss:$20 sps:$4 sm:$0xff]   ;;  %v1162_v35 = vld [vmem:[%s1342_s12 + $0x8] ss:$20 sps:$4 sm:$0xff]  }
  0x13   : > { %1055 = vmatprep.subr.bf16.mxu1 %v1140_v13  ;;  %v1164_v36 = vld [vmem:[%s1342_s12 + $0xc] ss:$20 sps:$4 sm:$0xff]   ;;  %701 = vmatprep.mubr.bf16.mxu0 %v1161_v33  ;;  %v1167_v39 = vld [vmem:[%s1399_s1 + $0x110] sm:$0xff]   ;;  %v1168_v40 = vld [vmem:[%s1399_s1 + $0x118] sm:$0xff]  }
  0x14   : > { %742 = vmatprep.mubr.bf16.mxu1 %v1164_v36  ;;  %v1171_v43 = vld [vmem:[%s1399_s1 + $0x130] sm:$0xff]   ;;  %v1172_v44 = vld [vmem:[%s1399_s1 + $0x138] sm:$0xff]   ;;  %v1014_v61 = vld [vmem:[%s1400_s2] ss:$0 sm:$0xff] }
  0x15   : > { %1034 = vmatpush3.bf16.msra.mxu0 %v1141_v14  ;;  %v1173_v45 = vld [vmem:[%s1342_s12 + $0x10] ss:$20 sps:$4 sm:$0xff]   ;;  %v1015_v0 = vld [vmem:[%s1401_s3] ss:$0 sm:$0xff] }
  0x16   : > { %1056 = vmatpush3.bf16.msra.mxu1 %v1142_v15  ;;  %1035 = vmatprep.subr.bf16.mxu0 %v1143_v16 }
  0x17   : > { %1057 = vmatprep.subr.bf16.mxu1 %v1144_v17 }
  0x19   : > { %1036 = vmatpush3.bf16.msra.mxu0 %v1145_v18 }
  0x1a   : > { %1058 = vmatpush3.bf16.msra.mxu1 %v1146_v19  ;;  %1037 = vmatprep.subr.bf16.mxu0 %v1147_v20 }
  0x1b   : > { %1059 = vmatprep.subr.bf16.mxu1 %v1148_v21 }
  0x1d   : > { %1038 = vmatpush3.bf16.msra.mxu0 %v1149_v22 }
  0x1e   : > { %1060 = vmatpush3.bf16.msra.mxu1 %v1150_v23  ;;  %1039 = vmatprep.subr.bf16.mxu0 %v1151_v24 }
  0x1f   : > { %1061 = vmatprep.subr.bf16.mxu1 %v1152_v25 }
  0x21   : > { %1040 = vmatpush3.bf16.msra.mxu0 %v1153_v26 }
  0x22   : > { %1062 = vmatpush3.bf16.msra.mxu1 %v1154_v27  ;;  %1041 = vmatprep.subr.bf16.mxu0 %v1155_v28 }
  0x23   : > { %1063 = vmatprep.subr.bf16.mxu1 %v1156_v29 }
  0x25   : > { %1042 = vmatpush3.bf16.msra.mxu0 %v1157_v30 }
  0x26   : > { %1064 = vmatpush3.bf16.msra.mxu1 %v1158_v31  ;;  %1080 = vmatprep.subr.bf16.mxu0 %v1198_v34 }
  0x28   : > { %702 = vmatmul.mubr.bf16.vlgmr.msra.gmra.mrb[0].mxu0 %v1159_v32 }
  0x29   : > { %743 = vmatmul.mubr.bf16.vlgmr.msra.gmra.mrb[0].mxu1 %v1162_v35  ;;  %1081 = vmatpush3.bf16.msra.mxu0 %v1165_v37 }
  0x2a   : > { %1082 = vmatprep.subr.bf16.mxu0 %v1198_v34  ;;  %1096 = vmatprep.mubr.msk.bf16.mxu0 %vm1199_vm0, %v1198_v34 }
  0x2d   : > { %1083 = vmatpush3.bf16.msra.mxu0 %v1166_v38 }
  0x2e   : > { %1084 = vmatprep.subr.bf16.mxu0 %v1198_v34 }
  0x31   : > { %1085 = vmatpush3.bf16.msra.mxu0 %v1167_v39 }
  0x32   : > { %1086 = vmatprep.subr.bf16.mxu0 %v1198_v34 }
  0x35   : > { %1087 = vmatpush3.bf16.msra.mxu0 %v1168_v40 }
  0x36   : > { %1088 = vmatprep.subr.bf16.mxu0 %v1198_v34 }
  0x39   : > { %1089 = vmatpush3.bf16.msra.mxu0 %v1169_v41 }
  0x3a   : > { %1090 = vmatprep.subr.bf16.mxu0 %v1198_v34 }
  0x3d   : > { %1091 = vmatpush3.bf16.msra.mxu0 %v1170_v42 }
  0x3e   : > { %1092 = vmatprep.subr.bf16.mxu0 %v1198_v34 }
  0x41   : > { %1093 = vmatpush3.bf16.msra.mxu0 %v1171_v43 }
  0x42   : > { %1094 = vmatprep.subr.bf16.mxu0 %v1198_v34 }
  0x45   : > { %1095 = vmatpush3.bf16.msra.mxu0 %v1172_v44 }
  0x48   : > { %1097 = vmatmul.mubr.bf16.vlgmr.msra.gmra.mrb[4].mxu0 %v1173_v45 }
  0xfb   : > { %v1043_v46 = vpop.f32.mrb[0].mxu0 }
  0xfc   : > { %v1065_v47 = vpop.f32.mrb[0].mxu1  ;;  %v1044_v48 = vpop.f32.mrb[1].mxu0 }
  0xfd   : > { %v1045_v49 = vadd.f32 %v1044_v48, %v1043_v46  ;;  %v1066_v50 = vpop.f32.mrb[1].mxu1  ;;  %v1046_v51 = vpop.f32.mrb[2].mxu0 }
  0xfe   : > { %v1067_v52 = vadd.f32 %v1066_v50, %v1065_v47  ;;  %v1068_v53 = vpop.f32.mrb[2].mxu1  ;;  %v1047_v54 = vpop.f32.mrb[3].mxu0 }
  0xff   : > { %v1048_v55 = vadd.f32 %v1047_v54, %v1046_v51  ;;  %v1069_v56 = vpop.f32.mrb[3].mxu1 }
 0x100   : > { %v1070_v57 = vadd.f32 %v1069_v56, %v1068_v53  ;;  %v745_v58 = vadd.f32 %v1067_v52, %v1045_v49 }
 0x102   : > { %v748_v59 = vadd.f32 %v1070_v57, %v1048_v55 }
 0x11b   : > { %v785_v60 = vpop.f32.mrb[4].mxu0 }
 0x11c   : > { %v786_v62 = vadd.f32 %v785_v60, %v745_v58  ;;  %v1098_v63 = vpop.f32.mrb[5].mxu0 }
 0x11d   : > { %v788_v1 = vpop.f32.mrb[6].mxu0 }
 0x11e   : > { %v808_v2 = vmul.f32 %v1014_v61, %v786_v62  ;;  %v789_v3 = vadd.f32 %v788_v1, %v748_v59  ;;  %v1099_v4 = vpop.f32.mrb[7].mxu0 }
 0x120   : > { %v817_v5 = vadd.f32 %v1015_v0, %v808_v2  ;;  %v809_v6 = vmul.f32 %v1014_v61, %v789_v3 }
 0x122   : > { %v818_v7 = vadd.f32 %v1015_v0, %v809_v6  ;;  %v819_v8 = vmax.f32 %v817_v5, 0.0 }
 0x124   : > { %v820_v9 = vmax.f32 %v818_v7, 0.0 }
 0x126   : > { %v1025_v10 = vpack.c.bf16 %v820_v9, %v819_v8 }
 0x128   : > { %1026 = vst [vmem:[%s306_s22] sm:$0xff] %v1025_v10  }
 0x129 PF: > { %s14_s17 = sadd.s32 1, %s1196_s17   ;;  %s1403_s15 = smov %s1192_s16 }
 0x12a   : > { %p11_p5 = scmp.ge.s32.totalorder %s14_s17, 4   ;;  %s1404_s16 = smov %s1406_s18 }
 0x12c   :  { %13 = sbr.rel (!%p11_p5) target bundleno = 2 (0x2), region = 83 }

// kernel: resnext_forward.26
= control target key start
LH: loop header
LB: loop body
LE: loop exit
PB: predicated region body
PF: predicated region fallthrough
CT: control target
= control target key end

     0   :  { %s825_s18 = smov 0   ;;  %s827_s19 = smov 0   ;;  %s896_s0 = inlined_call_operand.vmem [shape: bf16[32,128], index: 0, kind: input, shape index: {}]   ;;  %s897_s1 = inlined_call_operand.vmem [shape: bf16[128,128], index: 1, kind: input, shape index: {}]   ;;  %s898_s2 = inlined_call_operand.vmem [shape: f32[1,128], index: 2, kind: input, shape index: {}]   ;;  %s899_s3 = inlined_call_operand.vmem [shape: f32[1,128], index: 3, kind: input, shape index: {}]   ;;  %s900_s4 = inlined_call_operand.vmem [shape: bf16[32,128], index: 4, kind: input, shape index: {}]   ;;  %s901_s5 = inlined_call_operand.vmem [shape: bf16[32,128], index: 5, kind: output, shape index: {}]  }
   0x1   :  { %s829_s20 = smov 0  }
   0x2 LB: > { %s34_s21 = sadd.s32 1, %s787_s19  ;;  %p672_p0 = scmp.ge.s32.totalorder %s791_s20, 1  ;;  %s791_s20 = sphi %s829_s20, %s15_s20   ;;  %s787_s19 = sphi %s827_s19, %s903_s19   ;;  %s783_s18 = sphi %s825_s18, %s902_s18  }
   0x3   : > { %p36_p1 = scmp.ge.s32.totalorder %s34_s21, 2  ;;  %p262_p2 = scmp.lt.s32.totalorder %s791_s20, 3 }
   0x5   : > { %s905_s21 = smov (%p36_p1, %s34_s21), 0  ;;  %p263_p3 = pnand %p672_p0, %p262_p2 }
   0x6   : > { %v760_v0 = vld [vmem:[%s897_s1] sm:$0xff] (!%p263_p3)   ;;  %v793_v1 = vmov (!%p263_p3), 0.0   ;;  %v761_v2 = vld [vmem:[%s897_s1 + $0x8] sm:$0xff] (!%p263_p3)   ;;  %vm794_vm0 = vmmov (!%p263_p3), 0   ;;  %s673_s26 = sshll.u32 (!%p263_p3), %s783_s18, 1  ;;  %v762_v3 = vld [vmem:[%s897_s1 + $0x10] sm:$0xff] (!%p263_p3)  }
   0x7   : > { %266 = sbr.rel (%p263_p3) target bundleno = 264 (0x108), region = 40  ;;  %714 = vmatprep.subr.bf16.mxu0 (!%p263_p3), %v793_v1  ;;  %730 = vmatprep.mubr.msk.bf16.mxu0 (!%p263_p3), %vm794_vm0, %v793_v1  ;;  %p319_p4 = scmp.lt.s32.totalorder (!%p263_p3), %s673_s26, 3  ;;  %v763_v4 = vld [vmem:[%s897_s1 + $0x18] sm:$0xff] (!%p263_p3)   ;;  %v764_v5 = vld [vmem:[%s897_s1 + $0x20] sm:$0xff] (!%p263_p3)   ;;  %v765_v6 = vld [vmem:[%s897_s1 + $0x28] sm:$0xff] (!%p263_p3)  }
   0x8   : > { %715 = vmatpush3.bf16.msra.mxu0 (!%p263_p3), %v760_v0  ;;  %v766_v7 = vld [vmem:[%s897_s1 + $0x30] sm:$0xff] (!%p263_p3)   ;;  %v767_v8 = vld [vmem:[%s897_s1 + $0x38] sm:$0xff] (!%p263_p3)   ;;  %v688_v10 = vld [vmem:[%s898_s2] ss:$0 sm:$0xff] (!%p263_p3) }
   0x9   : > { %716 = vmatprep.subr.bf16.mxu0 (!%p263_p3), %v793_v1  ;;  %v689_v13 = vld [vmem:[%s899_s3] ss:$0 sm:$0xff] (!%p263_p3) }
   0xc   : > { %717 = vmatpush3.bf16.msra.mxu0 (!%p263_p3), %v761_v2 }
   0xd   : > { %718 = vmatprep.subr.bf16.mxu0 (!%p263_p3), %v793_v1 }
   0xe   : > { %s907_s26 = smov (!%p319_p4, %s673_s26), 3 }
   0xf   : > { %s852_s29 = sshll.u32 %s907_s26, 2 }
  0x10   : > { %s325_s7 = scalar_lea.vmem %s896_s0, %s852_s29  ;;  %719 = vmatpush3.bf16.msra.mxu0 %v762_v3  ;;  %s349_s23 = scalar_lea.vmem %s900_s4, %s852_s29 }
  0x11   : > { %720 = vmatprep.subr.bf16.mxu0 %v793_v1  ;;  %v768_v9 = vld [vmem:[%s325_s7] sm:$0xff]   ;;  %s358_s6 = scalar_lea.vmem %s901_s5, %s852_s29 }
  0x12   : > { %v697_v11 = vld [vmem:[%s349_s23] sm:$0xff]  }
  0x13   : > { %v698_v15 = vunpack.c.l.bf16 %v697_v11  ;;  %v699_v20 = vunpack.c.h.bf16 %v697_v11 }
  0x14   : > { %721 = vmatpush3.bf16.msra.mxu0 %v763_v4 }
  0x15   : > { %722 = vmatprep.subr.bf16.mxu0 %v793_v1 }
  0x18   : > { %723 = vmatpush3.bf16.msra.mxu0 %v764_v5 }
  0x19   : > { %724 = vmatprep.subr.bf16.mxu0 %v793_v1 }
  0x1c   : > { %725 = vmatpush3.bf16.msra.mxu0 %v765_v6 }
  0x1d   : > { %726 = vmatprep.subr.bf16.mxu0 %v793_v1 }
  0x20   : > { %727 = vmatpush3.bf16.msra.mxu0 %v766_v7 }
  0x21   : > { %728 = vmatprep.subr.bf16.mxu0 %v793_v1 }
  0x24   : > { %729 = vmatpush3.bf16.msra.mxu0 %v767_v8 }
  0x27   : > { %731 = vmatmul.mubr.bf16.vlgmr.msra.gmra.mrb[0].mxu0 %v768_v9 }
  0xfa   : > { %v475_v12 = vpop.f32.mrb[0].mxu0 }
  0xfb   : > { %v498_v14 = vmul.f32 %v688_v10, %v475_v12  ;;  %v732_v16 = vpop.f32.mrb[1].mxu0 }
  0xfc   : > { %v478_v17 = vpop.f32.mrb[2].mxu0 }
  0xfd   : > { %v507_v18 = vadd.f32 %v689_v13, %v498_v14  ;;  %v499_v19 = vmul.f32 %v688_v10, %v478_v17  ;;  %v733_v21 = vpop.f32.mrb[3].mxu0 }
  0xff   : > { %v513_v22 = vadd.f32 %v698_v15, %v507_v18  ;;  %v508_v23 = vadd.f32 %v689_v13, %v499_v19 }
 0x101   : > { %v514_v24 = vadd.f32 %v699_v20, %v508_v23  ;;  %v515_v25 = vmax.f32 %v513_v22, 0.0 }
 0x103   : > { %v516_v26 = vmax.f32 %v514_v24, 0.0 }
 0x105   : > { %v703_v27 = vpack.c.bf16 %v516_v26, %v515_v25 }
 0x107   : > { %704 = vst [vmem:[%s358_s6] sm:$0xff] %v703_v27  }
 0x108 PF: > { %s15_s20 = sadd.s32 1, %s791_s20   ;;  %s902_s18 = smov %s787_s19 }
 0x109   : > { %p12_p5 = scmp.ge.s32.totalorder %s15_s20, 4   ;;  %s903_s19 = smov %s905_s21 }
 0x10b   :  { %14 = sbr.rel (!%p12_p5) target bundleno = 2 (0x2), region = 90 }

// kernel: resnext_forward.27
= control target key start
LH: loop header
LB: loop body
LE: loop exit
PB: predicated region body
PF: predicated region fallthrough
CT: control target
= control target key end

     0   :  { %s733_s15 = smov 0   ;;  %s735_s16 = smov 0   ;;  %s803_s0 = inlined_call_operand.vmem [shape: bf16[32,128], index: 0, kind: input, shape index: {}]   ;;  %s804_s1 = inlined_call_operand.vmem [shape: bf16[128,128], index: 1, kind: input, shape index: {}]   ;;  %s805_s2 = inlined_call_operand.vmem [shape: f32[1,128], index: 2, kind: input, shape index: {}]   ;;  %s806_s3 = inlined_call_operand.vmem [shape: f32[1,128], index: 3, kind: input, shape index: {}]   ;;  %s807_s4 = inlined_call_operand.vmem [shape: bf16[32,128], index: 4, kind: output, shape index: {}]  }
   0x1   :  { %s737_s17 = smov 0  }
   0x2 LB: > { %s33_s18 = sadd.s32 1, %s700_s16  ;;  %p591_p0 = scmp.ge.s32.totalorder %s704_s17, 1  ;;  %s704_s17 = sphi %s737_s17, %s14_s17   ;;  %s700_s16 = sphi %s735_s16, %s809_s16   ;;  %s696_s15 = sphi %s733_s15, %s808_s15  }
   0x3   : > { %p35_p1 = scmp.ge.s32.totalorder %s33_s18, 2  ;;  %p221_p2 = scmp.lt.s32.totalorder %s704_s17, 3 }
   0x5   : > { %s811_s18 = smov (%p35_p1, %s33_s18), 0  ;;  %p222_p3 = pnand %p591_p0, %p221_p2 }
   0x6   : > { %v673_v0 = vld [vmem:[%s804_s1] sm:$0xff] (!%p222_p3)   ;;  %v706_v1 = vmov (!%p222_p3), 0.0   ;;  %v674_v2 = vld [vmem:[%s804_s1 + $0x8] sm:$0xff] (!%p222_p3)   ;;  %vm707_vm0 = vmmov (!%p222_p3), 0   ;;  %s592_s23 = sshll.u32 (!%p222_p3), %s696_s15, 1  ;;  %v675_v3 = vld [vmem:[%s804_s1 + $0x10] sm:$0xff] (!%p222_p3)  }
   0x7   : > { %225 = sbr.rel (%p222_p3) target bundleno = 262 (0x106), region = 36  ;;  %627 = vmatprep.subr.bf16.mxu0 (!%p222_p3), %v706_v1  ;;  %643 = vmatprep.mubr.msk.bf16.mxu0 (!%p222_p3), %vm707_vm0, %v706_v1  ;;  %p268_p4 = scmp.lt.s32.totalorder (!%p222_p3), %s592_s23, 3  ;;  %v676_v4 = vld [vmem:[%s804_s1 + $0x18] sm:$0xff] (!%p222_p3)   ;;  %v677_v5 = vld [vmem:[%s804_s1 + $0x20] sm:$0xff] (!%p222_p3)   ;;  %v678_v6 = vld [vmem:[%s804_s1 + $0x28] sm:$0xff] (!%p222_p3)  }
   0x8   : > { %628 = vmatpush3.bf16.msra.mxu0 (!%p222_p3), %v673_v0  ;;  %v679_v7 = vld [vmem:[%s804_s1 + $0x30] sm:$0xff] (!%p222_p3)   ;;  %v680_v8 = vld [vmem:[%s804_s1 + $0x38] sm:$0xff] (!%p222_p3)   ;;  %v605_v10 = vld [vmem:[%s805_s2] ss:$0 sm:$0xff] (!%p222_p3) }
   0x9   : > { %629 = vmatprep.subr.bf16.mxu0 (!%p222_p3), %v706_v1  ;;  %v606_v12 = vld [vmem:[%s806_s3] ss:$0 sm:$0xff] (!%p222_p3) }
   0xc   : > { %630 = vmatpush3.bf16.msra.mxu0 (!%p222_p3), %v674_v2 }
   0xd   : > { %631 = vmatprep.subr.bf16.mxu0 (!%p222_p3), %v706_v1 }
   0xe   : > { %s813_s23 = smov (!%p268_p4, %s592_s23), 3 }
   0xf   : > { %s593_s26 = sshll.u32 %s813_s23, 2 }
  0x10   : > { %s274_s29 = scalar_lea.vmem %s803_s0, %s593_s26  ;;  %632 = vmatpush3.bf16.msra.mxu0 %v675_v3  ;;  %s298_s24 = scalar_lea.vmem %s807_s4, %s593_s26 }
  0x11   : > { %633 = vmatprep.subr.bf16.mxu0 %v706_v1  ;;  %v681_v9 = vld [vmem:[%s274_s29] sm:$0xff]  }
  0x14   : > { %634 = vmatpush3.bf16.msra.mxu0 %v676_v4 }
  0x15   : > { %635 = vmatprep.subr.bf16.mxu0 %v706_v1 }
  0x18   : > { %636 = vmatpush3.bf16.msra.mxu0 %v677_v5 }
  0x19   : > { %637 = vmatprep.subr.bf16.mxu0 %v706_v1 }
  0x1c   : > { %638 = vmatpush3.bf16.msra.mxu0 %v678_v6 }
  0x1d   : > { %639 = vmatprep.subr.bf16.mxu0 %v706_v1 }
  0x20   : > { %640 = vmatpush3.bf16.msra.mxu0 %v679_v7 }
  0x21   : > { %641 = vmatprep.subr.bf16.mxu0 %v706_v1 }
  0x24   : > { %642 = vmatpush3.bf16.msra.mxu0 %v680_v8 }
  0x27   : > { %644 = vmatmul.mubr.bf16.vlgmr.msra.gmra.mrb[0].mxu0 %v681_v9 }
  0xfa   : > { %v415_v11 = vpop.f32.mrb[0].mxu0 }
  0xfb   : > { %v438_v13 = vmul.f32 %v605_v10, %v415_v11  ;;  %v645_v14 = vpop.f32.mrb[1].mxu0 }
  0xfc   : > { %v418_v15 = vpop.f32.mrb[2].mxu0 }
  0xfd   : > { %v447_v16 = vadd.f32 %v606_v12, %v438_v13  ;;  %v439_v17 = vmul.f32 %v605_v10, %v418_v15  ;;  %v646_v18 = vpop.f32.mrb[3].mxu0 }
  0xff   : > { %v448_v19 = vadd.f32 %v606_v12, %v439_v17  ;;  %v449_v20 = vmax.f32 %v447_v16, 0.0 }
 0x101   : > { %v450_v21 = vmax.f32 %v448_v19, 0.0 }
 0x103   : > { %v616_v22 = vpack.c.bf16 %v450_v21, %v449_v20 }
 0x105   : > { %617 = vst [vmem:[%s298_s24] sm:$0xff] %v616_v22  }
 0x106 PF: > { %s14_s17 = sadd.s32 1, %s704_s17   ;;  %s808_s15 = smov %s700_s16 }
 0x107   : > { %p11_p5 = scmp.ge.s32.totalorder %s14_s17, 4   ;;  %s809_s16 = smov %s811_s18 }
 0x109   :  { %13 = sbr.rel (!%p11_p5) target bundleno = 2 (0x2), region = 83 }

// kernel: resnext_forward.28
= control target key start
LH: loop header
LB: loop body
LE: loop exit
PB: predicated region body
PF: predicated region fallthrough
CT: control target
= control target key end

     0   :  { %s697_s15 = smov 0   ;;  %s699_s16 = smov 0   ;;  %s749_s0 = inlined_call_operand.vmem [shape: bf16[8,1152], index: 0, kind: input, shape index: {}]   ;;  %s750_s1 = inlined_call_operand.vmem [shape: bf16[1152,128], index: 1, kind: input, shape index: {}]   ;;  %s751_s2 = inlined_call_operand.vmem [shape: f32[1,128], index: 2, kind: input, shape index: {}]   ;;  %s752_s3 = inlined_call_operand.vmem [shape: f32[1,128], index: 3, kind: input, shape index: {}]   ;;  %s753_s4 = inlined_call_operand.vmem [shape: bf16[8,128], index: 4, kind: output, shape index: {}]  }
   0x1   :  { %s701_s17 = smov 0  }
   0x2 LB: > { %s26_s18 = sadd.s32 1, %s663_s16  ;;  %p562_p0 = scmp.ge.s32.totalorder %s667_s17, 1  ;;  %s667_s17 = sphi %s701_s17, %s14_s17   ;;  %s663_s16 = sphi %s699_s16, %s755_s16   ;;  %s659_s15 = sphi %s697_s15, %s754_s15  }
   0x3   : > { %p27_p1 = scmp.ge.s32.totalorder %s26_s18, 9  ;;  %p224_p2 = scmp.lt.s32.totalorder %s667_s17, 10 }
   0x5   : > { %s757_s18 = smov (%p27_p1, %s26_s18), 0  ;;  %p225_p3 = pnand %p562_p0, %p224_p2 }
   0x6   : > { %p273_p4 = scmp.lt.s32.totalorder (!%p225_p3), %s659_s15, 8  ;;  %s564_s19 = sshll.u32 (!%p225_p3), %s659_s15, 4 }
   0x7   : > { %228 = sbr.rel (%p225_p3) target bundleno = 286 (0x11e), region = 36  ;;  %p281_p5 = scmp.lt.s32.totalorder (!%p225_p3), %s564_s19, 143 }
   0x8   : > { %p566_p6 = scmp.ne.s32.totalorder (!%p225_p3), %s659_s15, 0 }
   0xe   : > { %s274_s20 = scalar_select %p273_p4, %s659_s15, 8 }
   0xf   : > { %s759_s19 = smov (!%p281_p5, %s564_s19), 143  ;;  %306 = sbr.rel (%p566_p6) target bundleno = 22 (0x16), region = 40 }
  0x10   : > { %s563_s21 = sshll.u32 %s274_s20, 2  ;;  %s565_s25 = sshll.u32 %s759_s19, 2  ;;  %v669_v0 = vmov (!%p566_p6), 0.0  }
  0x11   : > { %s723_s24 = scalar_lea.vmem %s749_s0, %s563_s21  ;;  %s287_s28 = scalar_lea.vmem %s750_s1, %s565_s25  ;;  %307 = vst [vmem:[#allocation2] sm:$0xff] (!%p566_p6), %v669_v0 }
  0x16 PF: > { %v637_v1 = vld [vmem:[%s287_s28] sm:$0xff]   ;;  %v670_v2 = vmov 0.0   ;;  %v638_v3 = vld [vmem:[%s287_s28 + $0x8] sm:$0xff]   ;;  %vm671_vm0 = vmmov 0   ;;  %v639_v4 = vld [vmem:[%s287_s28 + $0x10] sm:$0xff]   ;;  %p575_p7 = scmp.ne.s32.totalorder %s659_s15, 8 }
  0x17   : > { %590 = vmatprep.subr.bf16.mxu0 %v670_v2  ;;  %606 = vmatprep.mubr.msk.bf16.mxu0 %vm671_vm0, %v670_v2  ;;  %v640_v5 = vld [vmem:[%s287_s28 + $0x18] sm:$0xff]   ;;  %v641_v6 = vld [vmem:[%s287_s28 + $0x20] sm:$0xff]   ;;  %v642_v7 = vld [vmem:[%s287_s28 + $0x28] sm:$0xff]  }
  0x18   : > { %591 = vmatpush3.bf16.msra.mxu0 %v637_v1  ;;  %v643_v8 = vld [vmem:[%s287_s28 + $0x30] sm:$0xff]   ;;  %v644_v9 = vld [vmem:[%s287_s28 + $0x38] sm:$0xff]   ;;  %v309_v10 = vld [vmem:[%s723_s24] sm:$0xf] }
  0x19   : > { %592 = vmatprep.subr.bf16.mxu0 %v670_v2  ;;  %v308_v11 = vld [vmem:[#allocation2] sm:$0xff] }
  0x1a   : > { %v576_v18 = vld [vmem:[%s751_s2] ss:$0 sm:$0xff] (!%p575_p7) }
  0x1b   : > { %v577_v19 = vld [vmem:[%s752_s3] ss:$0 sm:$0xff] (!%p575_p7) }
  0x1c   : > { %593 = vmatpush3.bf16.msra.mxu0 %v638_v3 }
  0x1d   : > { %594 = vmatprep.subr.bf16.mxu0 %v670_v2 }
  0x20   : > { %595 = vmatpush3.bf16.msra.mxu0 %v639_v4 }
  0x21   : > { %596 = vmatprep.subr.bf16.mxu0 %v670_v2 }
  0x24   : > { %597 = vmatpush3.bf16.msra.mxu0 %v640_v5 }
  0x25   : > { %598 = vmatprep.subr.bf16.mxu0 %v670_v2 }
  0x28   : > { %599 = vmatpush3.bf16.msra.mxu0 %v641_v6 }
  0x29   : > { %600 = vmatprep.subr.bf16.mxu0 %v670_v2 }
  0x2c   : > { %601 = vmatpush3.bf16.msra.mxu0 %v642_v7 }
  0x2d   : > { %602 = vmatprep.subr.bf16.mxu0 %v670_v2 }
  0x30   : > { %603 = vmatpush3.bf16.msra.mxu0 %v643_v8 }
  0x31   : > { %604 = vmatprep.subr.bf16.mxu0 %v670_v2 }
  0x34   : > { %605 = vmatpush3.bf16.msra.mxu0 %v644_v9 }
  0x37   : > { %607 = vmatmul.mubr.bf16.vlgmr.msra.gmra.mrb[0].mxu0 %v309_v10 }
 0x107   : > { %419 = sbr.rel (%p575_p7) target bundleno = 286 (0x11e), region = 44 }
 0x10a   : > { %v408_v12 = vpop.f32.mrb[0].mxu0 }
 0x10b   : > { %v414_v13 = vadd.f32 %v408_v12, %v308_v11  ;;  %v608_v14 = vpop.f32.mrb[1].mxu0 }
 0x10c   : > { %v411_v15 = vpop.f32.mrb[2].mxu0 }
 0x10d   : > { %415 = vst [vmem:[#allocation2] sm:$0xff] %v414_v13  ;;  %v609_v16 = vpop.f32.mrb[3].mxu0 }
 0x114   : > { %v420_v17 = vld [vmem:[#allocation2] sm:$0xff] }
 0x115   : > { %v428_v20 = vmul.f32 %v576_v18, %v420_v17 }
 0x117   : > { %v436_v21 = vadd.f32 %v577_v19, %v428_v20 }
 0x119   : > { %v437_v22 = vmax.f32 %v436_v21, 0.0 }
 0x11b   : > { %v438_v23 = vpack.c.bf16 %v437_v22, %v437_v22 }
 0x11d   : > { %439 = vst [vmem:[%s753_s4] sm:$0xf] %v438_v23 }
 0x11e PF: > { %s14_s17 = sadd.s32 1, %s667_s17   ;;  %s754_s15 = smov %s663_s16 }
 0x11f   : > { %p11_p8 = scmp.ge.s32.totalorder %s14_s17, 11   ;;  %s755_s16 = smov %s757_s18 }
 0x121   :  { %13 = sbr.rel (!%p11_p8) target bundleno = 2 (0x2), region = 83 }

// kernel: resnext_forward.29
= control target key start
LH: loop header
LB: loop body
LE: loop exit
PB: predicated region body
PF: predicated region fallthrough
CT: control target
= control target key end

     0   :  { %v257_v1 = vmov 0   ;;  %v175_v18 = vlaneseq  ;;  %s343_s1 = inlined_call_operand.vmem [shape: bf16[128,256], index: 1, kind: input, shape index: {}]   ;;  %s344_s0 = inlined_call_operand.vmem [shape: bf16[8,128], index: 0, kind: input, shape index: {}]   ;;  %s345_s2 = inlined_call_operand.vmem [shape: f32[1,256], index: 2, kind: input, shape index: {}]   ;;  %s346_s3 = inlined_call_operand.vmem [shape: f32[1,256], index: 3, kind: input, shape index: {}]   ;;  %s347_s4 = inlined_call_operand.vmem [shape: bf16[8,256], index: 4, kind: output, shape index: {}]  }
   0x1   :  { %v233_v0 = vld [vmem:[%s343_s1 + $0x4] ss:$8 sps:$4 sm:$0xff]   ;;  %155 = vmatprep.mubr.bf16.mxu0 %v257_v1  ;;  %v235_v2 = vld [vmem:[%s343_s1] ss:$8 sps:$4 sm:$0xff]   ;;  %v236_v3 = vld [vmem:[%s343_s1 + $0x14] ss:$8 sps:$4 sm:$0xff]  }
   0x2   :  { %123 = vmatprep.subr.bf16.mxu0 %v233_v0  ;;  %v238_v4 = vld [vmem:[%s343_s1 + $0x10] ss:$8 sps:$4 sm:$0xff]   ;;  %v239_v5 = vld [vmem:[%s343_s1 + $0x24] ss:$8 sps:$4 sm:$0xff]   ;;  %v241_v6 = vld [vmem:[%s343_s1 + $0x20] ss:$8 sps:$4 sm:$0xff]  }
   0x3   :  { %124 = vmatpush1.bf16.msra.mxu0 %v235_v2  ;;  %v242_v7 = vld [vmem:[%s343_s1 + $0x34] ss:$8 sps:$4 sm:$0xff]   ;;  %v244_v8 = vld [vmem:[%s343_s1 + $0x30] ss:$8 sps:$4 sm:$0xff]   ;;  %v245_v9 = vld [vmem:[%s343_s1 + $0x44] ss:$8 sps:$4 sm:$0xff]  }
   0x4   :  { %125 = vmatprep.subr.bf16.mxu0 %v236_v3  ;;  %v247_v10 = vld [vmem:[%s343_s1 + $0x40] ss:$8 sps:$4 sm:$0xff]   ;;  %v248_v11 = vld [vmem:[%s343_s1 + $0x54] ss:$8 sps:$4 sm:$0xff]   ;;  %v250_v12 = vld [vmem:[%s343_s1 + $0x50] ss:$8 sps:$4 sm:$0xff]  }
   0x5   :  { %v251_v13 = vld [vmem:[%s343_s1 + $0x64] ss:$8 sps:$4 sm:$0xff]   ;;  %v253_v14 = vld [vmem:[%s343_s1 + $0x60] ss:$8 sps:$4 sm:$0xff]   ;;  %v254_v15 = vld [vmem:[%s343_s1 + $0x74] ss:$8 sps:$4 sm:$0xff]  }
   0x6   :  { %v256_v16 = vld [vmem:[%s343_s1 + $0x70] ss:$8 sps:$4 sm:$0xff]   ;;  %v26_v17 = vld [vmem:[%s344_s0] sm:$0xf]  ;;  %v176_v19 = vshrl.u32 %v175_v18, 7 }
   0x7   :  { %126 = vmatpush1.bf16.msra.mxu0 %v238_v4  ;;  %v173_v21 = vld [vmem:[%s345_s2] sm:$0x3] }
   0x8   :  { %127 = vmatprep.subr.bf16.mxu0 %v239_v5  ;;  %v177_v20 = vsub.s32 0, %v176_v19  ;;  %v181_v22 = vsub.s32 1, %v176_v19  ;;  %v187_v23 = vld [vmem:[%s346_s3] sm:$0x3] }
   0xa   :  { %v178_v24 = vrot.slane %v173_v21, %v177_v20  ;;  %v182_v25 = vrot.slane %v173_v21, %v181_v22  ;;  %v192_v26 = vrot.slane %v187_v23, %v177_v20  ;;  %v196_v28 = vrot.slane %v187_v23, %v181_v22 }
   0xb   :  { %128 = vmatpush1.bf16.msra.mxu0 %v241_v6 }
   0xc   :  { %129 = vmatprep.subr.bf16.mxu0 %v242_v7 }
   0xf   :  { %130 = vmatpush1.bf16.msra.mxu0 %v244_v8 }
  0x10   :  { %131 = vmatprep.subr.bf16.mxu0 %v245_v9 }
  0x13   :  { %132 = vmatpush1.bf16.msra.mxu0 %v247_v10 }
  0x14   :  { %133 = vmatprep.subr.bf16.mxu0 %v248_v11 }
  0x17   :  { %134 = vmatpush1.bf16.msra.mxu0 %v250_v12 }
  0x18   :  { %135 = vmatprep.subr.bf16.mxu0 %v251_v13 }
  0x1b   :  { %136 = vmatpush1.bf16.msra.mxu0 %v253_v14 }
  0x1c   :  { %137 = vmatprep.subr.bf16.mxu0 %v254_v15 }
  0x1f   :  { %138 = vmatpush1.bf16.msra.mxu0 %v256_v16 }
  0x22   :  { %156 = vmatmul.mubr.bf16.vlgmr.msra.gmra.mrb[0].mxu0 %v26_v17 }
  0xf5   :  { %v157_v27 = vpop.f32.mrb[0].mxu0 }
  0xf6   :  { %v185_v29 = vmul.f32 %v178_v24, %v157_v27  ;;  %v159_v30 = vpop.f32.mrb[1].mxu0 }
  0xf7   :  { %v186_v31 = vmul.f32 %v182_v25, %v159_v30  ;;  %v161_v32 = vpop.f32.mrb[2].mxu0 }
  0xf8   :  { %v199_v33 = vadd.f32 %v192_v26, %v185_v29  ;;  %v162_v34 = vpop.f32.mrb[3].mxu0 }
  0xf9   :  { %v200_v35 = vadd.f32 %v196_v28, %v186_v31 }
  0xfb   :  { %v231_v36 = vpack.c.bf16 %v200_v35, %v199_v33 }
  0xfd   :  { %209 = vst [vmem:[%s347_s4] sm:$0xff] %v231_v36 }

// kernel: resnext_forward.30
= control target key start
LH: loop header
LB: loop body
LE: loop exit
PB: predicated region body
PF: predicated region fallthrough
CT: control target
= control target key end

     0   :  { %v267_v1 = vmov 0   ;;  %v178_v18 = vlaneseq  ;;  %s361_s1 = inlined_call_operand.vmem [shape: bf16[128,256], index: 1, kind: input, shape index: {}]   ;;  %s362_s0 = inlined_call_operand.vmem [shape: bf16[8,128], index: 0, kind: input, shape index: {}]   ;;  %s363_s2 = inlined_call_operand.vmem [shape: f32[1,256], index: 2, kind: input, shape index: {}]   ;;  %s364_s3 = inlined_call_operand.vmem [shape: f32[1,256], index: 3, kind: input, shape index: {}]   ;;  %s365_s4 = inlined_call_operand.vmem [shape: bf16[8,256], index: 4, kind: input, shape index: {}]   ;;  %s366_s5 = inlined_call_operand.vmem [shape: bf16[8,256], index: 5, kind: output, shape index: {}]  }
   0x1   :  { %v243_v0 = vld [vmem:[%s361_s1 + $0x4] ss:$8 sps:$4 sm:$0xff]   ;;  %158 = vmatprep.mubr.bf16.mxu0 %v267_v1  ;;  %v245_v2 = vld [vmem:[%s361_s1] ss:$8 sps:$4 sm:$0xff]   ;;  %v246_v3 = vld [vmem:[%s361_s1 + $0x14] ss:$8 sps:$4 sm:$0xff]  }
   0x2   :  { %126 = vmatprep.subr.bf16.mxu0 %v243_v0  ;;  %v248_v4 = vld [vmem:[%s361_s1 + $0x10] ss:$8 sps:$4 sm:$0xff]   ;;  %v249_v5 = vld [vmem:[%s361_s1 + $0x24] ss:$8 sps:$4 sm:$0xff]   ;;  %v251_v6 = vld [vmem:[%s361_s1 + $0x20] ss:$8 sps:$4 sm:$0xff]  }
   0x3   :  { %127 = vmatpush1.bf16.msra.mxu0 %v245_v2  ;;  %v252_v7 = vld [vmem:[%s361_s1 + $0x34] ss:$8 sps:$4 sm:$0xff]   ;;  %v254_v8 = vld [vmem:[%s361_s1 + $0x30] ss:$8 sps:$4 sm:$0xff]   ;;  %v255_v9 = vld [vmem:[%s361_s1 + $0x44] ss:$8 sps:$4 sm:$0xff]  }
   0x4   :  { %128 = vmatprep.subr.bf16.mxu0 %v246_v3  ;;  %v257_v10 = vld [vmem:[%s361_s1 + $0x40] ss:$8 sps:$4 sm:$0xff]   ;;  %v258_v11 = vld [vmem:[%s361_s1 + $0x54] ss:$8 sps:$4 sm:$0xff]   ;;  %v260_v12 = vld [vmem:[%s361_s1 + $0x50] ss:$8 sps:$4 sm:$0xff]  }
   0x5   :  { %v261_v13 = vld [vmem:[%s361_s1 + $0x64] ss:$8 sps:$4 sm:$0xff]   ;;  %v263_v14 = vld [vmem:[%s361_s1 + $0x60] ss:$8 sps:$4 sm:$0xff]   ;;  %v264_v15 = vld [vmem:[%s361_s1 + $0x74] ss:$8 sps:$4 sm:$0xff]  }
   0x6   :  { %v266_v16 = vld [vmem:[%s361_s1 + $0x70] ss:$8 sps:$4 sm:$0xff]   ;;  %v29_v17 = vld [vmem:[%s362_s0] sm:$0xf]  ;;  %v179_v19 = vshrl.u32 %v178_v18, 7 }
   0x7   :  { %129 = vmatpush1.bf16.msra.mxu0 %v248_v4  ;;  %v176_v21 = vld [vmem:[%s363_s2] sm:$0x3] }
   0x8   :  { %130 = vmatprep.subr.bf16.mxu0 %v249_v5  ;;  %v180_v20 = vsub.s32 0, %v179_v19  ;;  %v184_v22 = vsub.s32 1, %v179_v19  ;;  %v190_v23 = vld [vmem:[%s364_s3] sm:$0x3] }
   0x9   :  { %v204_v25 = vld [vmem:[%s365_s4] sm:$0xff] }
   0xa   :  { %v181_v24 = vrot.slane %v176_v21, %v180_v20  ;;  %v185_v26 = vrot.slane %v176_v21, %v184_v22  ;;  %v195_v27 = vrot.slane %v190_v23, %v180_v20  ;;  %v199_v29 = vrot.slane %v190_v23, %v184_v22 }
   0xb   :  { %131 = vmatpush1.bf16.msra.mxu0 %v251_v6  ;;  %v205_v31 = vunpack.c.l.bf16 %v204_v25  ;;  %v206_v34 = vunpack.c.h.bf16 %v204_v25 }
   0xc   :  { %132 = vmatprep.subr.bf16.mxu0 %v252_v7 }
   0xf   :  { %133 = vmatpush1.bf16.msra.mxu0 %v254_v8 }
  0x10   :  { %134 = vmatprep.subr.bf16.mxu0 %v255_v9 }
  0x13   :  { %135 = vmatpush1.bf16.msra.mxu0 %v257_v10 }
  0x14   :  { %136 = vmatprep.subr.bf16.mxu0 %v258_v11 }
  0x17   :  { %137 = vmatpush1.bf16.msra.mxu0 %v260_v12 }
  0x18   :  { %138 = vmatprep.subr.bf16.mxu0 %v261_v13 }
  0x1b   :  { %139 = vmatpush1.bf16.msra.mxu0 %v263_v14 }
  0x1c   :  { %140 = vmatprep.subr.bf16.mxu0 %v264_v15 }
  0x1f   :  { %141 = vmatpush1.bf16.msra.mxu0 %v266_v16 }
  0x22   :  { %159 = vmatmul.mubr.bf16.vlgmr.msra.gmra.mrb[0].mxu0 %v29_v17 }
  0xf5   :  { %v160_v28 = vpop.f32.mrb[0].mxu0 }
  0xf6   :  { %v188_v30 = vmul.f32 %v181_v24, %v160_v28  ;;  %v162_v32 = vpop.f32.mrb[1].mxu0 }
  0xf7   :  { %v189_v33 = vmul.f32 %v185_v26, %v162_v32  ;;  %v164_v35 = vpop.f32.mrb[2].mxu0 }
  0xf8   :  { %v202_v36 = vadd.f32 %v195_v27, %v188_v30  ;;  %v165_v37 = vpop.f32.mrb[3].mxu0 }
  0xf9   :  { %v203_v38 = vadd.f32 %v199_v29, %v189_v33 }
  0xfa   :  { %v207_v39 = vadd.f32 %v205_v31, %v202_v36 }
  0xfb   :  { %v208_v40 = vadd.f32 %v206_v34, %v203_v38 }
  0xfc   :  { %v209_v41 = vmax.f32 %v207_v39, 0.0 }
  0xfd   :  { %v210_v42 = vmax.f32 %v208_v40, 0.0 }
  0xff   :  { %v241_v43 = vpack.c.bf16 %v210_v42, %v209_v41 }
 0x101   :  { %219 = vst [vmem:[%s366_s5] sm:$0xff] %v241_v43 }

// kernel: resnext_forward.31
= control target key start
LH: loop header
LB: loop body
LE: loop exit
PB: predicated region body
PF: predicated region fallthrough
CT: control target
= control target key end

     0   :  { %v277_v35 = vlaneseq  ;;  %s537_s1 = inlined_call_operand.vmem [shape: bf16[256,256], index: 1, kind: input, shape index: {}]   ;;  %s538_s0 = inlined_call_operand.vmem [shape: bf16[8,256], index: 0, kind: input, shape index: {}]   ;;  %s539_s2 = inlined_call_operand.vmem [shape: f32[1,256], index: 2, kind: input, shape index: {}]   ;;  %s540_s3 = inlined_call_operand.vmem [shape: f32[1,256], index: 3, kind: input, shape index: {}]   ;;  %s541_s4 = inlined_call_operand.vmem [shape: bf16[8,256], index: 4, kind: output, shape index: {}]  }
   0x1   :  { %v354_v0 = vld [vmem:[%s537_s1 + $0x4] ss:$8 sps:$4 sm:$0xff]   ;;  %v356_v1 = vld [vmem:[%s537_s1] ss:$8 sps:$4 sm:$0xff]   ;;  %v357_v2 = vld [vmem:[%s537_s1 + $0x14] ss:$8 sps:$4 sm:$0xff]  }
   0x2   :  { %225 = vmatprep.subr.bf16.mxu0 %v354_v0  ;;  %v359_v3 = vld [vmem:[%s537_s1 + $0x10] ss:$8 sps:$4 sm:$0xff]   ;;  %v360_v4 = vld [vmem:[%s537_s1 + $0x24] ss:$8 sps:$4 sm:$0xff]   ;;  %v362_v5 = vld [vmem:[%s537_s1 + $0x20] ss:$8 sps:$4 sm:$0xff]  }
   0x3   :  { %226 = vmatpush1.bf16.msra.mxu0 %v356_v1  ;;  %v363_v6 = vld [vmem:[%s537_s1 + $0x34] ss:$8 sps:$4 sm:$0xff]   ;;  %v365_v7 = vld [vmem:[%s537_s1 + $0x30] ss:$8 sps:$4 sm:$0xff]   ;;  %v366_v8 = vld [vmem:[%s537_s1 + $0x44] ss:$8 sps:$4 sm:$0xff]  }
   0x4   :  { %227 = vmatprep.subr.bf16.mxu0 %v357_v2  ;;  %v368_v9 = vld [vmem:[%s537_s1 + $0x40] ss:$8 sps:$4 sm:$0xff]   ;;  %v369_v10 = vld [vmem:[%s537_s1 + $0x54] ss:$8 sps:$4 sm:$0xff]   ;;  %v371_v11 = vld [vmem:[%s537_s1 + $0x50] ss:$8 sps:$4 sm:$0xff]  }
   0x5   :  { %v372_v12 = vld [vmem:[%s537_s1 + $0x64] ss:$8 sps:$4 sm:$0xff]   ;;  %v374_v15 = vld [vmem:[%s537_s1 + $0x60] ss:$8 sps:$4 sm:$0xff]   ;;  %v375_v16 = vld [vmem:[%s537_s1 + $0x74] ss:$8 sps:$4 sm:$0xff]  }
   0x6   :  { %v25_v13 = vld [vmem:[%s538_s0] sm:$0xff]  ;;  %v377_v17 = vld [vmem:[%s537_s1 + $0x70] ss:$8 sps:$4 sm:$0xff]   ;;  %v381_v20 = vld [vmem:[%s537_s1 + $0x94] ss:$8 sps:$4 sm:$0xff]   ;;  %v278_v36 = vshrl.u32 %v277_v35, 7 }
   0x7   :  { %228 = vmatpush1.bf16.msra.mxu0 %v359_v3  ;;  %v319_v14 = vcombine.high %v25_v13, %v25_v13  ;;  %v378_v18 = vld [vmem:[%s537_s1 + $0x84] ss:$8 sps:$4 sm:$0xff]   ;;  %v380_v19 = vld [vmem:[%s537_s1 + $0x80] ss:$8 sps:$4 sm:$0xff]   ;;  %v383_v21 = vld [vmem:[%s537_s1 + $0x90] ss:$8 sps:$4 sm:$0xff]   ;;  %v318_v34 = vcombine.low %v25_v13, %v25_v13 }
   0x8   :  { %229 = vmatprep.subr.bf16.mxu0 %v360_v4  ;;  %v384_v22 = vld [vmem:[%s537_s1 + $0xa4] ss:$8 sps:$4 sm:$0xff]   ;;  %v386_v23 = vld [vmem:[%s537_s1 + $0xa0] ss:$8 sps:$4 sm:$0xff]   ;;  %v387_v24 = vld [vmem:[%s537_s1 + $0xb4] ss:$8 sps:$4 sm:$0xff]  }
   0x9   :  { %257 = vmatprep.mubr.bf16.mxu0 %v319_v14  ;;  %v389_v25 = vld [vmem:[%s537_s1 + $0xb0] ss:$8 sps:$4 sm:$0xff]   ;;  %v390_v26 = vld [vmem:[%s537_s1 + $0xc4] ss:$8 sps:$4 sm:$0xff]   ;;  %v392_v27 = vld [vmem:[%s537_s1 + $0xc0] ss:$8 sps:$4 sm:$0xff]  }
   0xa   :  { %v393_v28 = vld [vmem:[%s537_s1 + $0xd4] ss:$8 sps:$4 sm:$0xff]   ;;  %v395_v29 = vld [vmem:[%s537_s1 + $0xd0] ss:$8 sps:$4 sm:$0xff]   ;;  %v396_v30 = vld [vmem:[%s537_s1 + $0xe4] ss:$8 sps:$4 sm:$0xff]  }
   0xb   :  { %230 = vmatpush1.bf16.msra.mxu0 %v362_v5  ;;  %v398_v31 = vld [vmem:[%s537_s1 + $0xe0] ss:$8 sps:$4 sm:$0xff]   ;;  %v399_v32 = vld [vmem:[%s537_s1 + $0xf4] ss:$8 sps:$4 sm:$0xff]   ;;  %v401_v33 = vld [vmem:[%s537_s1 + $0xf0] ss:$8 sps:$4 sm:$0xff]  }
   0xc   :  { %231 = vmatprep.subr.bf16.mxu0 %v363_v6  ;;  %v279_v37 = vsub.s32 0, %v278_v36  ;;  %v275_v38 = vld [vmem:[%s539_s2] sm:$0x3]  ;;  %v283_v39 = vsub.s32 1, %v278_v36 }
   0xd   :  { %v289_v40 = vld [vmem:[%s540_s3] sm:$0x3] }
   0xe   :  { %v280_v41 = vrot.slane %v275_v38, %v279_v37  ;;  %v284_v42 = vrot.slane %v275_v38, %v283_v39  ;;  %v294_v43 = vrot.slane %v289_v40, %v279_v37  ;;  %v298_v45 = vrot.slane %v289_v40, %v283_v39 }
   0xf   :  { %232 = vmatpush1.bf16.msra.mxu0 %v365_v7 }
  0x10   :  { %233 = vmatprep.subr.bf16.mxu0 %v366_v8 }
  0x13   :  { %234 = vmatpush1.bf16.msra.mxu0 %v368_v9 }
  0x14   :  { %235 = vmatprep.subr.bf16.mxu0 %v369_v10 }
  0x17   :  { %236 = vmatpush1.bf16.msra.mxu0 %v371_v11 }
  0x18   :  { %237 = vmatprep.subr.bf16.mxu0 %v372_v12 }
  0x1b   :  { %238 = vmatpush1.bf16.msra.mxu0 %v374_v15 }
  0x1c   :  { %239 = vmatprep.subr.bf16.mxu0 %v375_v16 }
  0x1f   :  { %240 = vmatpush1.bf16.msra.mxu0 %v377_v17 }
  0x20   :  { %241 = vmatprep.subr.bf16.mxu0 %v378_v18 }
  0x23   :  { %242 = vmatpush1.bf16.msra.mxu0 %v380_v19 }
  0x24   :  { %243 = vmatprep.subr.bf16.mxu0 %v381_v20 }
  0x27   :  { %244 = vmatpush1.bf16.msra.mxu0 %v383_v21 }
  0x28   :  { %245 = vmatprep.subr.bf16.mxu0 %v384_v22 }
  0x2b   :  { %246 = vmatpush1.bf16.msra.mxu0 %v386_v23 }
  0x2c   :  { %247 = vmatprep.subr.bf16.mxu0 %v387_v24 }
  0x2f   :  { %248 = vmatpush1.bf16.msra.mxu0 %v389_v25 }
  0x30   :  { %249 = vmatprep.subr.bf16.mxu0 %v390_v26 }
  0x33   :  { %250 = vmatpush1.bf16.msra.mxu0 %v392_v27 }
  0x34   :  { %251 = vmatprep.subr.bf16.mxu0 %v393_v28 }
  0x37   :  { %252 = vmatpush1.bf16.msra.mxu0 %v395_v29 }
  0x38   :  { %253 = vmatprep.subr.bf16.mxu0 %v396_v30 }
  0x3b   :  { %254 = vmatpush1.bf16.msra.mxu0 %v398_v31 }
  0x3c   :  { %255 = vmatprep.subr.bf16.mxu0 %v399_v32 }
  0x3f   :  { %256 = vmatpush1.bf16.msra.mxu0 %v401_v33 }
  0x42   :  { %258 = vmatmul.mubr.bf16.vlgmr.msra.gmra.mrb[0].mxu0 %v318_v34 }
 0x115   :  { %v259_v44 = vpop.f32.mrb[0].mxu0 }
 0x116   :  { %v287_v46 = vmul.f32 %v280_v41, %v259_v44  ;;  %v261_v47 = vpop.f32.mrb[1].mxu0 }
 0x117   :  { %v288_v48 = vmul.f32 %v284_v42, %v261_v47  ;;  %v263_v49 = vpop.f32.mrb[2].mxu0 }
 0x118   :  { %v301_v50 = vadd.f32 %v294_v43, %v287_v46  ;;  %v264_v51 = vpop.f32.mrb[3].mxu0 }
 0x119   :  { %v302_v52 = vadd.f32 %v298_v45, %v288_v48 }
 0x11a   :  { %v303_v53 = vmax.f32 %v301_v50, 0.0 }
 0x11b   :  { %v304_v54 = vmax.f32 %v302_v52, 0.0 }
 0x11d   :  { %v353_v55 = vpack.c.bf16 %v304_v54, %v303_v53 }
 0x11f   :  { %313 = vst [vmem:[%s541_s4] sm:$0xff] %v353_v55 }

// kernel: resnext_forward.32
= control target key start
LH: loop header
LB: loop body
LE: loop exit
PB: predicated region body
PF: predicated region fallthrough
CT: control target
= control target key end

     0   :  { %s936_s15 = smov 0   ;;  %s938_s16 = smov 0   ;;  %s1021_s0 = inlined_call_operand.vmem [shape: bf16[8,2304], index: 0, kind: input, shape index: {}]   ;;  %s1022_s1 = inlined_call_operand.vmem [shape: bf16[2304,256], index: 1, kind: input, shape index: {}]   ;;  %s1023_s2 = inlined_call_operand.vmem [shape: f32[1,256], index: 2, kind: input, shape index: {}]   ;;  %s1024_s3 = inlined_call_operand.vmem [shape: f32[1,256], index: 3, kind: input, shape index: {}]   ;;  %s1025_s4 = inlined_call_operand.vmem [shape: bf16[8,256], index: 4, kind: output, shape index: {}]  }
   0x1   :  { %s940_s17 = smov 0  }
   0x2 LB: > { %s26_s18 = sadd.s32 1, %s904_s16  ;;  %p762_p0 = scmp.ge.s32.totalorder %s908_s17, 1  ;;  %s908_s17 = sphi %s940_s17, %s14_s17   ;;  %s904_s16 = sphi %s938_s16, %s1027_s16   ;;  %s900_s15 = sphi %s936_s15, %s1026_s15  }
   0x3   : > { %p27_p1 = scmp.ge.s32.totalorder %s26_s18, 9  ;;  %p233_p2 = scmp.lt.s32.totalorder %s908_s17, 10 }
   0x5   : > { %s1029_s18 = smov (%p27_p1, %s26_s18), 0  ;;  %p234_p3 = pnand %p762_p0, %p233_p2 }
   0x6   : > { %s763_s19 = sshll.u32 (!%p234_p3), %s900_s15, 1  ;;  %s765_s20 = sshll.u32 (!%p234_p3), %s900_s15, 5 }
   0x7   : > { %237 = sbr.rel (%p234_p3) target bundleno = 321 (0x141), region = 36  ;;  %p290_p4 = scmp.lt.s32.totalorder (!%p234_p3), %s763_s19, 17 }
   0x8   : > { %p300_p5 = scmp.lt.s32.totalorder (!%p234_p3), %s765_s20, 287  ;;  %p768_p6 = scmp.ne.s32.totalorder (!%p234_p3), %s900_s15, 0 }
   0xe   : > { %s1031_s19 = smov (!%p290_p4, %s763_s19), 17  ;;  %s1033_s20 = smov (!%p300_p5, %s765_s20), 287 }
   0xf   : > { %s764_s21 = sshll.u32 %s1031_s19, 2  ;;  %s809_s25 = sshll.u32 %s1033_s20, 3  ;;  %v910_v0 = vmov (!%p768_p6), 0.0  }
  0x10   : > { %s961_s24 = scalar_lea.vmem %s1021_s0, %s764_s21  ;;  %s966_s28 = scalar_lea.vmem %s1022_s1, %s809_s25  ;;  %334 = vst [vmem:[#allocation2] sm:$0xff] (!%p768_p6), %v910_v0  ;;  %335 = vst [vmem:[#allocation2 + $0x8] sm:$0xff] (!%p768_p6), %v910_v0 }
  0x11   : > { %333 = sbr.rel (%p768_p6) target bundleno = 24 (0x18), region = 40 }
  0x18 PF: > { %v836_v1 = vld [vmem:[%s966_s28 + $0x4] ss:$8 sps:$4 sm:$0xff]   ;;  %v838_v2 = vld [vmem:[%s966_s28] ss:$8 sps:$4 sm:$0xff]   ;;  %v839_v3 = vld [vmem:[%s966_s28 + $0x14] ss:$8 sps:$4 sm:$0xff]  }
  0x19   : > { %538 = vmatprep.subr.bf16.mxu0 %v836_v1  ;;  %v841_v4 = vld [vmem:[%s966_s28 + $0x10] ss:$8 sps:$4 sm:$0xff]   ;;  %v842_v5 = vld [vmem:[%s966_s28 + $0x24] ss:$8 sps:$4 sm:$0xff]   ;;  %v844_v6 = vld [vmem:[%s966_s28 + $0x20] ss:$8 sps:$4 sm:$0xff]  }
  0x1a   : > { %539 = vmatpush1.bf16.msra.mxu0 %v838_v2  ;;  %v845_v7 = vld [vmem:[%s966_s28 + $0x34] ss:$8 sps:$4 sm:$0xff]   ;;  %v847_v8 = vld [vmem:[%s966_s28 + $0x30] ss:$8 sps:$4 sm:$0xff]   ;;  %v848_v9 = vld [vmem:[%s966_s28 + $0x44] ss:$8 sps:$4 sm:$0xff]  }
  0x1b   : > { %540 = vmatprep.subr.bf16.mxu0 %v839_v3  ;;  %v850_v10 = vld [vmem:[%s966_s28 + $0x40] ss:$8 sps:$4 sm:$0xff]   ;;  %v851_v11 = vld [vmem:[%s966_s28 + $0x54] ss:$8 sps:$4 sm:$0xff]   ;;  %v853_v12 = vld [vmem:[%s966_s28 + $0x50] ss:$8 sps:$4 sm:$0xff]  }
  0x1c   : > { %v854_v13 = vld [vmem:[%s966_s28 + $0x64] ss:$8 sps:$4 sm:$0xff]   ;;  %v856_v16 = vld [vmem:[%s966_s28 + $0x60] ss:$8 sps:$4 sm:$0xff]   ;;  %v857_v17 = vld [vmem:[%s966_s28 + $0x74] ss:$8 sps:$4 sm:$0xff]  }
  0x1d   : > { %v338_v14 = vld [vmem:[%s961_s24] sm:$0xff]  ;;  %v859_v18 = vld [vmem:[%s966_s28 + $0x70] ss:$8 sps:$4 sm:$0xff]   ;;  %v863_v21 = vld [vmem:[%s966_s28 + $0x94] ss:$8 sps:$4 sm:$0xff]   ;;  %p803_p7 = scmp.ne.s32.totalorder %s900_s15, 8 }
  0x1e   : > { %541 = vmatpush1.bf16.msra.mxu0 %v841_v4  ;;  %v770_v15 = vcombine.high %v338_v14, %v338_v14  ;;  %v860_v19 = vld [vmem:[%s966_s28 + $0x84] ss:$8 sps:$4 sm:$0xff]   ;;  %v862_v20 = vld [vmem:[%s966_s28 + $0x80] ss:$8 sps:$4 sm:$0xff]   ;;  %v865_v22 = vld [vmem:[%s966_s28 + $0x90] ss:$8 sps:$4 sm:$0xff]   ;;  %v769_v35 = vcombine.low %v338_v14, %v338_v14  ;;  %v591_v44 = vlaneseq (!%p803_p7) }
  0x1f   : > { %542 = vmatprep.subr.bf16.mxu0 %v842_v5  ;;  %v866_v23 = vld [vmem:[%s966_s28 + $0xa4] ss:$8 sps:$4 sm:$0xff]   ;;  %v868_v24 = vld [vmem:[%s966_s28 + $0xa0] ss:$8 sps:$4 sm:$0xff]   ;;  %v869_v25 = vld [vmem:[%s966_s28 + $0xb4] ss:$8 sps:$4 sm:$0xff]  }
  0x20   : > { %570 = vmatprep.mubr.bf16.mxu0 %v770_v15  ;;  %v871_v26 = vld [vmem:[%s966_s28 + $0xb0] ss:$8 sps:$4 sm:$0xff]   ;;  %v872_v27 = vld [vmem:[%s966_s28 + $0xc4] ss:$8 sps:$4 sm:$0xff]   ;;  %v874_v28 = vld [vmem:[%s966_s28 + $0xc0] ss:$8 sps:$4 sm:$0xff]  }
  0x21   : > { %v875_v29 = vld [vmem:[%s966_s28 + $0xd4] ss:$8 sps:$4 sm:$0xff]   ;;  %v877_v30 = vld [vmem:[%s966_s28 + $0xd0] ss:$8 sps:$4 sm:$0xff]   ;;  %v878_v31 = vld [vmem:[%s966_s28 + $0xe4] ss:$8 sps:$4 sm:$0xff]  }
  0x22   : > { %543 = vmatpush1.bf16.msra.mxu0 %v844_v6  ;;  %v880_v32 = vld [vmem:[%s966_s28 + $0xe0] ss:$8 sps:$4 sm:$0xff]   ;;  %v881_v33 = vld [vmem:[%s966_s28 + $0xf4] ss:$8 sps:$4 sm:$0xff]   ;;  %v883_v34 = vld [vmem:[%s966_s28 + $0xf0] ss:$8 sps:$4 sm:$0xff]  }
  0x23   : > { %544 = vmatprep.subr.bf16.mxu0 %v845_v7  ;;  %v336_v36 = vld [vmem:[#allocation2] sm:$0xff]  ;;  %v337_v37 = vld [vmem:[#allocation2 + $0x8] sm:$0xff]  ;;  %v592_v45 = vshrl.u32 (!%p803_p7), %v591_v44, 7 }
  0x24   : > { %v589_v46 = vld [vmem:[%s1023_s2] sm:$0x3] (!%p803_p7) }
  0x25   : > { %v603_v47 = vld [vmem:[%s1024_s3] sm:$0x3] (!%p803_p7)  ;;  %v593_v48 = vsub.s32 (!%p803_p7), 0, %v592_v45  ;;  %v597_v49 = vsub.s32 (!%p803_p7), 1, %v592_v45 }
  0x26   : > { %545 = vmatpush1.bf16.msra.mxu0 %v847_v8 }
  0x27   : > { %546 = vmatprep.subr.bf16.mxu0 %v848_v9  ;;  %v594_v52 = vrot.slane (!%p803_p7), %v589_v46, %v593_v48  ;;  %v598_v53 = vrot.slane (!%p803_p7), %v589_v46, %v597_v49  ;;  %v608_v54 = vrot.slane (!%p803_p7), %v603_v47, %v593_v48  ;;  %v612_v55 = vrot.slane (!%p803_p7), %v603_v47, %v597_v49 }
  0x2a   : > { %547 = vmatpush1.bf16.msra.mxu0 %v850_v10 }
  0x2b   : > { %548 = vmatprep.subr.bf16.mxu0 %v851_v11 }
  0x2e   : > { %549 = vmatpush1.bf16.msra.mxu0 %v853_v12 }
  0x2f   : > { %550 = vmatprep.subr.bf16.mxu0 %v854_v13 }
  0x32   : > { %551 = vmatpush1.bf16.msra.mxu0 %v856_v16 }
  0x33   : > { %552 = vmatprep.subr.bf16.mxu0 %v857_v17 }
  0x36   : > { %553 = vmatpush1.bf16.msra.mxu0 %v859_v18 }
  0x37   : > { %554 = vmatprep.subr.bf16.mxu0 %v860_v19 }
  0x3a   : > { %555 = vmatpush1.bf16.msra.mxu0 %v862_v20 }
  0x3b   : > { %556 = vmatprep.subr.bf16.mxu0 %v863_v21 }
  0x3e   : > { %557 = vmatpush1.bf16.msra.mxu0 %v865_v22 }
  0x3f   : > { %558 = vmatprep.subr.bf16.mxu0 %v866_v23 }
  0x42   : > { %559 = vmatpush1.bf16.msra.mxu0 %v868_v24 }
  0x43   : > { %560 = vmatprep.subr.bf16.mxu0 %v869_v25 }
  0x46   : > { %561 = vmatpush1.bf16.msra.mxu0 %v871_v26 }
  0x47   : > { %562 = vmatprep.subr.bf16.mxu0 %v872_v27 }
  0x4a   : > { %563 = vmatpush1.bf16.msra.mxu0 %v874_v28 }
  0x4b   : > { %564 = vmatprep.subr.bf16.mxu0 %v875_v29 }
  0x4e   : > { %565 = vmatpush1.bf16.msra.mxu0 %v877_v30 }
  0x4f   : > { %566 = vmatprep.subr.bf16.mxu0 %v878_v31 }
  0x52   : > { %567 = vmatpush1.bf16.msra.mxu0 %v880_v32 }
  0x53   : > { %568 = vmatprep.subr.bf16.mxu0 %v881_v33 }
  0x56   : > { %569 = vmatpush1.bf16.msra.mxu0 %v883_v34 }
  0x59   : > { %571 = vmatmul.mubr.bf16.vlgmr.msra.gmra.mrb[0].mxu0 %v769_v35 }
 0x12a   : > { %586 = sbr.rel (%p803_p7) target bundleno = 321 (0x141), region = 44 }
 0x12c   : > { %v572_v38 = vpop.f32.mrb[0].mxu0 }
 0x12d   : > { %v579_v39 = vadd.f32 %v572_v38, %v336_v36  ;;  %v574_v40 = vpop.f32.mrb[1].mxu0 }
 0x12e   : > { %v580_v41 = vadd.f32 %v574_v40, %v337_v37  ;;  %v576_v42 = vpop.f32.mrb[2].mxu0 }
 0x12f   : > { %581 = vst [vmem:[#allocation2] sm:$0xff] %v579_v39  ;;  %v577_v43 = vpop.f32.mrb[3].mxu0 }
 0x130   : > { %582 = vst [vmem:[#allocation2 + $0x8] sm:$0xff] %v580_v41 }
 0x136   : > { %v587_v50 = vld [vmem:[#allocation2] sm:$0xff] }
 0x137   : > { %v588_v51 = vld [vmem:[#allocation2 + $0x8] sm:$0xff]  ;;  %v601_v56 = vmul.f32 %v594_v52, %v587_v50 }
 0x138   : > { %v602_v57 = vmul.f32 %v598_v53, %v588_v51 }
 0x139   : > { %v615_v58 = vadd.f32 %v608_v54, %v601_v56 }
 0x13a   : > { %v616_v59 = vadd.f32 %v612_v55, %v602_v57 }
 0x13b   : > { %v617_v60 = vmax.f32 %v615_v58, 0.0 }
 0x13c   : > { %v618_v61 = vmax.f32 %v616_v59, 0.0 }
 0x13e   : > { %v810_v62 = vpack.c.bf16 %v618_v61, %v617_v60 }
 0x140   : > { %627 = vst [vmem:[%s1025_s4] sm:$0xff] %v810_v62 }
 0x141 PF: > { %s14_s17 = sadd.s32 1, %s908_s17   ;;  %s1026_s15 = smov %s904_s16 }
 0x142   : > { %p11_p8 = scmp.ge.s32.totalorder %s14_s17, 11   ;;  %s1027_s16 = smov %s1029_s18 }
 0x144   :  { %13 = sbr.rel (!%p11_p8) target bundleno = 2 (0x2), region = 83 }

// kernel: resnext_forward.33
= control target key start
LH: loop header
LB: loop body
LE: loop exit
PB: predicated region body
PF: predicated region fallthrough
CT: control target
= control target key end

     0   :  { %s992_s1 = inlined_call_operand.vmem [shape: bf16[256,512], index: 1, kind: input, shape index: {}]   ;;  %s993_s0 = inlined_call_operand.vmem [shape: bf16[8,256], index: 0, kind: input, shape index: {}]   ;;  %s994_s2 = inlined_call_operand.vmem [shape: f32[1,512], index: 2, kind: input, shape index: {}]   ;;  %s995_s3 = inlined_call_operand.vmem [shape: f32[1,512], index: 3, kind: input, shape index: {}]   ;;  %s996_s4 = inlined_call_operand.vmem [shape: bf16[8,512], index: 4, kind: output, shape index: {}]  }
   0x1   :  { %v662_v0 = vld [vmem:[%s992_s1 + $0x4] ss:$16 sps:$4 sm:$0xff]   ;;  %v664_v1 = vld [vmem:[%s992_s1 + $0xc] ss:$16 sps:$4 sm:$0xff]   ;;  %v666_v2 = vld [vmem:[%s992_s1] ss:$16 sps:$4 sm:$0xff]  }
   0x2   :  { %421 = vmatprep.subr.bf16.mxu0 %v662_v0  ;;  %v667_v3 = vld [vmem:[%s992_s1 + $0x8] ss:$16 sps:$4 sm:$0xff]   ;;  %462 = vmatprep.subr.bf16.mxu1 %v664_v1  ;;  %v668_v4 = vld [vmem:[%s992_s1 + $0x24] ss:$16 sps:$4 sm:$0xff]   ;;  %v670_v5 = vld [vmem:[%s992_s1 + $0x2c] ss:$16 sps:$4 sm:$0xff]  }
   0x3   :  { %422 = vmatpush1.bf16.msra.mxu0 %v666_v2  ;;  %463 = vmatpush1.bf16.msra.mxu1 %v667_v3  ;;  %v672_v6 = vld [vmem:[%s992_s1 + $0x20] ss:$16 sps:$4 sm:$0xff]   ;;  %v673_v7 = vld [vmem:[%s992_s1 + $0x28] ss:$16 sps:$4 sm:$0xff]   ;;  %v674_v8 = vld [vmem:[%s992_s1 + $0x44] ss:$16 sps:$4 sm:$0xff]   ;;  %v520_v3 = vlaneseq }
   0x4   :  { %423 = vmatprep.subr.bf16.mxu0 %v668_v4  ;;  %464 = vmatprep.subr.bf16.mxu1 %v670_v5  ;;  %v676_v9 = vld [vmem:[%s992_s1 + $0x4c] ss:$16 sps:$4 sm:$0xff]   ;;  %v678_v10 = vld [vmem:[%s992_s1 + $0x40] ss:$16 sps:$4 sm:$0xff]   ;;  %v679_v11 = vld [vmem:[%s992_s1 + $0x48] ss:$16 sps:$4 sm:$0xff]  }
   0x5   :  { %v680_v12 = vld [vmem:[%s992_s1 + $0x64] ss:$16 sps:$4 sm:$0xff]   ;;  %v682_v13 = vld [vmem:[%s992_s1 + $0x6c] ss:$16 sps:$4 sm:$0xff]   ;;  %v684_v14 = vld [vmem:[%s992_s1 + $0x60] ss:$16 sps:$4 sm:$0xff]  }
   0x6   :  { %v685_v15 = vld [vmem:[%s992_s1 + $0x68] ss:$16 sps:$4 sm:$0xff]   ;;  %v686_v16 = vld [vmem:[%s992_s1 + $0x84] ss:$16 sps:$4 sm:$0xff]   ;;  %v688_v17 = vld [vmem:[%s992_s1 + $0x8c] ss:$16 sps:$4 sm:$0xff]  }
   0x7   :  { %424 = vmatpush1.bf16.msra.mxu0 %v672_v6  ;;  %465 = vmatpush1.bf16.msra.mxu1 %v673_v7  ;;  %v690_v18 = vld [vmem:[%s992_s1 + $0x80] ss:$16 sps:$4 sm:$0xff]   ;;  %v691_v19 = vld [vmem:[%s992_s1 + $0x88] ss:$16 sps:$4 sm:$0xff]   ;;  %v692_v20 = vld [vmem:[%s992_s1 + $0xa4] ss:$16 sps:$4 sm:$0xff]  }
   0x8   :  { %425 = vmatprep.subr.bf16.mxu0 %v674_v8  ;;  %466 = vmatprep.subr.bf16.mxu1 %v676_v9  ;;  %v694_v21 = vld [vmem:[%s992_s1 + $0xac] ss:$16 sps:$4 sm:$0xff]   ;;  %v696_v22 = vld [vmem:[%s992_s1 + $0xa0] ss:$16 sps:$4 sm:$0xff]   ;;  %v697_v23 = vld [vmem:[%s992_s1 + $0xa8] ss:$16 sps:$4 sm:$0xff]  }
   0x9   :  { %v698_v24 = vld [vmem:[%s992_s1 + $0xc4] ss:$16 sps:$4 sm:$0xff]   ;;  %v700_v25 = vld [vmem:[%s992_s1 + $0xcc] ss:$16 sps:$4 sm:$0xff]   ;;  %v702_v26 = vld [vmem:[%s992_s1 + $0xc0] ss:$16 sps:$4 sm:$0xff]  }
   0xa   :  { %v703_v27 = vld [vmem:[%s992_s1 + $0xc8] ss:$16 sps:$4 sm:$0xff]   ;;  %v704_v28 = vld [vmem:[%s992_s1 + $0xe4] ss:$16 sps:$4 sm:$0xff]   ;;  %v706_v29 = vld [vmem:[%s992_s1 + $0xec] ss:$16 sps:$4 sm:$0xff]  }
   0xb   :  { %426 = vmatpush1.bf16.msra.mxu0 %v678_v10  ;;  %467 = vmatpush1.bf16.msra.mxu1 %v679_v11  ;;  %v708_v30 = vld [vmem:[%s992_s1 + $0xe0] ss:$16 sps:$4 sm:$0xff]   ;;  %v709_v31 = vld [vmem:[%s992_s1 + $0xe8] ss:$16 sps:$4 sm:$0xff]   ;;  %v710_v32 = vld [vmem:[%s992_s1 + $0x104] ss:$16 sps:$4 sm:$0xff]  }
   0xc   :  { %427 = vmatprep.subr.bf16.mxu0 %v680_v12  ;;  %468 = vmatprep.subr.bf16.mxu1 %v682_v13  ;;  %v712_v33 = vld [vmem:[%s992_s1 + $0x10c] ss:$16 sps:$4 sm:$0xff]   ;;  %v714_v34 = vld [vmem:[%s992_s1 + $0x100] ss:$16 sps:$4 sm:$0xff]   ;;  %v715_v35 = vld [vmem:[%s992_s1 + $0x108] ss:$16 sps:$4 sm:$0xff]  }
   0xd   :  { %v716_v36 = vld [vmem:[%s992_s1 + $0x124] ss:$16 sps:$4 sm:$0xff]   ;;  %v718_v37 = vld [vmem:[%s992_s1 + $0x12c] ss:$16 sps:$4 sm:$0xff]   ;;  %v720_v38 = vld [vmem:[%s992_s1 + $0x120] ss:$16 sps:$4 sm:$0xff]  }
   0xe   :  { %v721_v39 = vld [vmem:[%s992_s1 + $0x128] ss:$16 sps:$4 sm:$0xff]   ;;  %v722_v40 = vld [vmem:[%s992_s1 + $0x144] ss:$16 sps:$4 sm:$0xff]   ;;  %v724_v41 = vld [vmem:[%s992_s1 + $0x14c] ss:$16 sps:$4 sm:$0xff]  }
   0xf   :  { %428 = vmatpush1.bf16.msra.mxu0 %v684_v14  ;;  %469 = vmatpush1.bf16.msra.mxu1 %v685_v15  ;;  %v726_v42 = vld [vmem:[%s992_s1 + $0x140] ss:$16 sps:$4 sm:$0xff]   ;;  %v727_v43 = vld [vmem:[%s992_s1 + $0x148] ss:$16 sps:$4 sm:$0xff]   ;;  %v728_v44 = vld [vmem:[%s992_s1 + $0x164] ss:$16 sps:$4 sm:$0xff]  }
  0x10   :  { %429 = vmatprep.subr.bf16.mxu0 %v686_v16  ;;  %470 = vmatprep.subr.bf16.mxu1 %v688_v17  ;;  %v730_v45 = vld [vmem:[%s992_s1 + $0x16c] ss:$16 sps:$4 sm:$0xff]   ;;  %v29_v46 = vld [vmem:[%s993_s0] sm:$0xff]  ;;  %v733_v49 = vld [vmem:[%s992_s1 + $0x168] ss:$16 sps:$4 sm:$0xff]   ;;  %v521_v4 = vshrl.u32 %v520_v3, 7 }
  0x11   :  { %v593_v47 = vcombine.high %v29_v46, %v29_v46  ;;  %v732_v48 = vld [vmem:[%s992_s1 + $0x160] ss:$16 sps:$4 sm:$0xff]   ;;  %v734_v50 = vld [vmem:[%s992_s1 + $0x184] ss:$16 sps:$4 sm:$0xff]   ;;  %v736_v51 = vld [vmem:[%s992_s1 + $0x18c] ss:$16 sps:$4 sm:$0xff]   ;;  %v592_v2 = vcombine.low %v29_v46, %v29_v46 }
  0x12   :  { %v738_v52 = vld [vmem:[%s992_s1 + $0x180] ss:$16 sps:$4 sm:$0xff]   ;;  %v739_v53 = vld [vmem:[%s992_s1 + $0x188] ss:$16 sps:$4 sm:$0xff]   ;;  %v740_v54 = vld [vmem:[%s992_s1 + $0x1a4] ss:$16 sps:$4 sm:$0xff]  }
  0x13   :  { %430 = vmatpush1.bf16.msra.mxu0 %v690_v18  ;;  %471 = vmatpush1.bf16.msra.mxu1 %v691_v19  ;;  %v742_v55 = vld [vmem:[%s992_s1 + $0x1ac] ss:$16 sps:$4 sm:$0xff]   ;;  %v744_v56 = vld [vmem:[%s992_s1 + $0x1a0] ss:$16 sps:$4 sm:$0xff]   ;;  %v745_v57 = vld [vmem:[%s992_s1 + $0x1a8] ss:$16 sps:$4 sm:$0xff]  }
  0x14   :  { %431 = vmatprep.subr.bf16.mxu0 %v692_v20  ;;  %472 = vmatprep.subr.bf16.mxu1 %v694_v21  ;;  %v746_v58 = vld [vmem:[%s992_s1 + $0x1c4] ss:$16 sps:$4 sm:$0xff]   ;;  %v748_v59 = vld [vmem:[%s992_s1 + $0x1cc] ss:$16 sps:$4 sm:$0xff]   ;;  %v750_v60 = vld [vmem:[%s992_s1 + $0x1c0] ss:$16 sps:$4 sm:$0xff]  }
  0x15   :  { %453 = vmatprep.mubr.bf16.mxu0 %v593_v47  ;;  %494 = vmatprep.mubr.bf16.mxu1 %v593_v47  ;;  %v751_v61 = vld [vmem:[%s992_s1 + $0x1c8] ss:$16 sps:$4 sm:$0xff]   ;;  %v752_v62 = vld [vmem:[%s992_s1 + $0x1e4] ss:$16 sps:$4 sm:$0xff]   ;;  %v754_v63 = vld [vmem:[%s992_s1 + $0x1ec] ss:$16 sps:$4 sm:$0xff]  }
  0x16   :  { %v756_v0 = vld [vmem:[%s992_s1 + $0x1e0] ss:$16 sps:$4 sm:$0xff]   ;;  %v757_v1 = vld [vmem:[%s992_s1 + $0x1e8] ss:$16 sps:$4 sm:$0xff]   ;;  %v522_v5 = vsub.s32 0, %v521_v4  ;;  %v530_v6 = vsub.s32 2, %v521_v4 }
  0x17   :  { %432 = vmatpush1.bf16.msra.mxu0 %v696_v22  ;;  %473 = vmatpush1.bf16.msra.mxu1 %v697_v23  ;;  %v518_v7 = vld [vmem:[%s994_s2] sm:$0xf]  ;;  %v526_v8 = vsub.s32 1, %v521_v4  ;;  %v534_v9 = vsub.s32 3, %v521_v4 }
  0x18   :  { %433 = vmatprep.subr.bf16.mxu0 %v698_v24  ;;  %474 = vmatprep.subr.bf16.mxu1 %v700_v25  ;;  %v544_v10 = vld [vmem:[%s995_s3] sm:$0xf]  ;;  %v523_v11 = vrot.slane %v518_v7, %v522_v5  ;;  %v531_v12 = vrot.slane %v518_v7, %v530_v6 }
  0x19   :  { %v527_v13 = vrot.slane %v518_v7, %v526_v8  ;;  %v535_v14 = vrot.slane %v518_v7, %v534_v9  ;;  %v549_v15 = vrot.slane %v544_v10, %v522_v5  ;;  %v557_v16 = vrot.slane %v544_v10, %v530_v6 }
  0x1a   :  { %v553_v19 = vrot.slane %v544_v10, %v526_v8  ;;  %v561_v20 = vrot.slane %v544_v10, %v534_v9 }
  0x1b   :  { %434 = vmatpush1.bf16.msra.mxu0 %v702_v26  ;;  %475 = vmatpush1.bf16.msra.mxu1 %v703_v27 }
  0x1c   :  { %435 = vmatprep.subr.bf16.mxu0 %v704_v28  ;;  %476 = vmatprep.subr.bf16.mxu1 %v706_v29 }
  0x1f   :  { %436 = vmatpush1.bf16.msra.mxu0 %v708_v30  ;;  %477 = vmatpush1.bf16.msra.mxu1 %v709_v31 }
  0x20   :  { %437 = vmatprep.subr.bf16.mxu0 %v710_v32  ;;  %478 = vmatprep.subr.bf16.mxu1 %v712_v33 }
  0x23   :  { %438 = vmatpush1.bf16.msra.mxu0 %v714_v34  ;;  %479 = vmatpush1.bf16.msra.mxu1 %v715_v35 }
  0x24   :  { %439 = vmatprep.subr.bf16.mxu0 %v716_v36  ;;  %480 = vmatprep.subr.bf16.mxu1 %v718_v37 }
  0x27   :  { %440 = vmatpush1.bf16.msra.mxu0 %v720_v38  ;;  %481 = vmatpush1.bf16.msra.mxu1 %v721_v39 }
  0x28   :  { %441 = vmatprep.subr.bf16.mxu0 %v722_v40  ;;  %482 = vmatprep.subr.bf16.mxu1 %v724_v41 }
  0x2b   :  { %442 = vmatpush1.bf16.msra.mxu0 %v726_v42  ;;  %483 = vmatpush1.bf16.msra.mxu1 %v727_v43 }
  0x2c   :  { %443 = vmatprep.subr.bf16.mxu0 %v728_v44  ;;  %484 = vmatprep.subr.bf16.mxu1 %v730_v45 }
  0x2f   :  { %444 = vmatpush1.bf16.msra.mxu0 %v732_v48  ;;  %485 = vmatpush1.bf16.msra.mxu1 %v733_v49 }
  0x30   :  { %445 = vmatprep.subr.bf16.mxu0 %v734_v50  ;;  %486 = vmatprep.subr.bf16.mxu1 %v736_v51 }
  0x33   :  { %446 = vmatpush1.bf16.msra.mxu0 %v738_v52  ;;  %487 = vmatpush1.bf16.msra.mxu1 %v739_v53 }
  0x34   :  { %447 = vmatprep.subr.bf16.mxu0 %v740_v54  ;;  %488 = vmatprep.subr.bf16.mxu1 %v742_v55 }
  0x37   :  { %448 = vmatpush1.bf16.msra.mxu0 %v744_v56  ;;  %489 = vmatpush1.bf16.msra.mxu1 %v745_v57 }
  0x38   :  { %449 = vmatprep.subr.bf16.mxu0 %v746_v58  ;;  %490 = vmatprep.subr.bf16.mxu1 %v748_v59 }
  0x3b   :  { %450 = vmatpush1.bf16.msra.mxu0 %v750_v60  ;;  %491 = vmatpush1.bf16.msra.mxu1 %v751_v61 }
  0x3c   :  { %451 = vmatprep.subr.bf16.mxu0 %v752_v62  ;;  %492 = vmatprep.subr.bf16.mxu1 %v754_v63 }
  0x3f   :  { %452 = vmatpush1.bf16.msra.mxu0 %v756_v0  ;;  %493 = vmatpush1.bf16.msra.mxu1 %v757_v1 }
  0x42   :  { %454 = vmatmul.mubr.bf16.vlgmr.msra.gmra.mrb[0].mxu0 %v592_v2  ;;  %495 = vmatmul.mubr.bf16.vlgmr.msra.gmra.mrb[0].mxu1 %v592_v2 }
 0x115   :  { %v455_v17 = vpop.f32.mrb[0].mxu0  ;;  %v496_v18 = vpop.f32.mrb[0].mxu1 }
 0x116   :  { %v540_v21 = vmul.f32 %v523_v11, %v455_v17  ;;  %v542_v22 = vmul.f32 %v531_v12, %v496_v18  ;;  %v457_v23 = vpop.f32.mrb[1].mxu0  ;;  %v498_v24 = vpop.f32.mrb[1].mxu1 }
 0x117   :  { %v541_v25 = vmul.f32 %v527_v13, %v457_v23  ;;  %v543_v26 = vmul.f32 %v535_v14, %v498_v24  ;;  %v459_v27 = vpop.f32.mrb[2].mxu0  ;;  %v500_v28 = vpop.f32.mrb[2].mxu1 }
 0x118   :  { %v566_v29 = vadd.f32 %v549_v15, %v540_v21  ;;  %v568_v30 = vadd.f32 %v557_v16, %v542_v22  ;;  %v460_v31 = vpop.f32.mrb[3].mxu0  ;;  %v501_v32 = vpop.f32.mrb[3].mxu1 }
 0x119   :  { %v567_v33 = vadd.f32 %v553_v19, %v541_v25  ;;  %v569_v34 = vadd.f32 %v561_v20, %v543_v26 }
 0x11b   :  { %v660_v35 = vpack.c.bf16 %v567_v33, %v566_v29  ;;  %v661_v36 = vpack.c.bf16 %v569_v34, %v568_v30 }
 0x11d   :  { %586 = vst [vmem:[%s996_s4] sm:$0xff] %v660_v35  ;;  %587 = vst [vmem:[%s996_s4 + $0x8] sm:$0xff] %v661_v36 }

// kernel: resnext_forward.34
= control target key start
LH: loop header
LB: loop body
LE: loop exit
PB: predicated region body
PF: predicated region fallthrough
CT: control target
= control target key end

     0   :  { %s1020_s1 = inlined_call_operand.vmem [shape: bf16[256,512], index: 1, kind: input, shape index: {}]   ;;  %s1021_s0 = inlined_call_operand.vmem [shape: bf16[8,256], index: 0, kind: input, shape index: {}]   ;;  %s1022_s2 = inlined_call_operand.vmem [shape: f32[1,512], index: 2, kind: input, shape index: {}]   ;;  %s1023_s3 = inlined_call_operand.vmem [shape: f32[1,512], index: 3, kind: input, shape index: {}]   ;;  %s1024_s4 = inlined_call_operand.vmem [shape: bf16[8,512], index: 4, kind: input, shape index: {}]   ;;  %s1025_s5 = inlined_call_operand.vmem [shape: bf16[8,512], index: 5, kind: output, shape index: {}]  }
   0x1   :  { %v679_v0 = vld [vmem:[%s1020_s1 + $0x4] ss:$16 sps:$4 sm:$0xff]   ;;  %v681_v1 = vld [vmem:[%s1020_s1 + $0xc] ss:$16 sps:$4 sm:$0xff]   ;;  %v683_v2 = vld [vmem:[%s1020_s1] ss:$16 sps:$4 sm:$0xff]  }
   0x2   :  { %424 = vmatprep.subr.bf16.mxu0 %v679_v0  ;;  %v684_v3 = vld [vmem:[%s1020_s1 + $0x8] ss:$16 sps:$4 sm:$0xff]   ;;  %465 = vmatprep.subr.bf16.mxu1 %v681_v1  ;;  %v685_v4 = vld [vmem:[%s1020_s1 + $0x24] ss:$16 sps:$4 sm:$0xff]   ;;  %v687_v5 = vld [vmem:[%s1020_s1 + $0x2c] ss:$16 sps:$4 sm:$0xff]  }
   0x3   :  { %425 = vmatpush1.bf16.msra.mxu0 %v683_v2  ;;  %466 = vmatpush1.bf16.msra.mxu1 %v684_v3  ;;  %v689_v6 = vld [vmem:[%s1020_s1 + $0x20] ss:$16 sps:$4 sm:$0xff]   ;;  %v690_v7 = vld [vmem:[%s1020_s1 + $0x28] ss:$16 sps:$4 sm:$0xff]   ;;  %v691_v8 = vld [vmem:[%s1020_s1 + $0x44] ss:$16 sps:$4 sm:$0xff]   ;;  %v523_v3 = vlaneseq }
   0x4   :  { %426 = vmatprep.subr.bf16.mxu0 %v685_v4  ;;  %467 = vmatprep.subr.bf16.mxu1 %v687_v5  ;;  %v693_v9 = vld [vmem:[%s1020_s1 + $0x4c] ss:$16 sps:$4 sm:$0xff]   ;;  %v695_v10 = vld [vmem:[%s1020_s1 + $0x40] ss:$16 sps:$4 sm:$0xff]   ;;  %v696_v11 = vld [vmem:[%s1020_s1 + $0x48] ss:$16 sps:$4 sm:$0xff]  }
   0x5   :  { %v697_v12 = vld [vmem:[%s1020_s1 + $0x64] ss:$16 sps:$4 sm:$0xff]   ;;  %v699_v13 = vld [vmem:[%s1020_s1 + $0x6c] ss:$16 sps:$4 sm:$0xff]   ;;  %v701_v14 = vld [vmem:[%s1020_s1 + $0x60] ss:$16 sps:$4 sm:$0xff]  }
   0x6   :  { %v702_v15 = vld [vmem:[%s1020_s1 + $0x68] ss:$16 sps:$4 sm:$0xff]   ;;  %v703_v16 = vld [vmem:[%s1020_s1 + $0x84] ss:$16 sps:$4 sm:$0xff]   ;;  %v705_v17 = vld [vmem:[%s1020_s1 + $0x8c] ss:$16 sps:$4 sm:$0xff]  }
   0x7   :  { %427 = vmatpush1.bf16.msra.mxu0 %v689_v6  ;;  %468 = vmatpush1.bf16.msra.mxu1 %v690_v7  ;;  %v707_v18 = vld [vmem:[%s1020_s1 + $0x80] ss:$16 sps:$4 sm:$0xff]   ;;  %v708_v19 = vld [vmem:[%s1020_s1 + $0x88] ss:$16 sps:$4 sm:$0xff]   ;;  %v709_v20 = vld [vmem:[%s1020_s1 + $0xa4] ss:$16 sps:$4 sm:$0xff]  }
   0x8   :  { %428 = vmatprep.subr.bf16.mxu0 %v691_v8  ;;  %469 = vmatprep.subr.bf16.mxu1 %v693_v9  ;;  %v711_v21 = vld [vmem:[%s1020_s1 + $0xac] ss:$16 sps:$4 sm:$0xff]   ;;  %v713_v22 = vld [vmem:[%s1020_s1 + $0xa0] ss:$16 sps:$4 sm:$0xff]   ;;  %v714_v23 = vld [vmem:[%s1020_s1 + $0xa8] ss:$16 sps:$4 sm:$0xff]  }
   0x9   :  { %v715_v24 = vld [vmem:[%s1020_s1 + $0xc4] ss:$16 sps:$4 sm:$0xff]   ;;  %v717_v25 = vld [vmem:[%s1020_s1 + $0xcc] ss:$16 sps:$4 sm:$0xff]   ;;  %v719_v26 = vld [vmem:[%s1020_s1 + $0xc0] ss:$16 sps:$4 sm:$0xff]  }
   0xa   :  { %v720_v27 = vld [vmem:[%s1020_s1 + $0xc8] ss:$16 sps:$4 sm:$0xff]   ;;  %v721_v28 = vld [vmem:[%s1020_s1 + $0xe4] ss:$16 sps:$4 sm:$0xff]   ;;  %v723_v29 = vld [vmem:[%s1020_s1 + $0xec] ss:$16 sps:$4 sm:$0xff]  }
   0xb   :  { %429 = vmatpush1.bf16.msra.mxu0 %v695_v10  ;;  %470 = vmatpush1.bf16.msra.mxu1 %v696_v11  ;;  %v725_v30 = vld [vmem:[%s1020_s1 + $0xe0] ss:$16 sps:$4 sm:$0xff]   ;;  %v726_v31 = vld [vmem:[%s1020_s1 + $0xe8] ss:$16 sps:$4 sm:$0xff]   ;;  %v727_v32 = vld [vmem:[%s1020_s1 + $0x104] ss:$16 sps:$4 sm:$0xff]  }
   0xc   :  { %430 = vmatprep.subr.bf16.mxu0 %v697_v12  ;;  %471 = vmatprep.subr.bf16.mxu1 %v699_v13  ;;  %v729_v33 = vld [vmem:[%s1020_s1 + $0x10c] ss:$16 sps:$4 sm:$0xff]   ;;  %v731_v34 = vld [vmem:[%s1020_s1 + $0x100] ss:$16 sps:$4 sm:$0xff]   ;;  %v732_v35 = vld [vmem:[%s1020_s1 + $0x108] ss:$16 sps:$4 sm:$0xff]  }
   0xd   :  { %v733_v36 = vld [vmem:[%s1020_s1 + $0x124] ss:$16 sps:$4 sm:$0xff]   ;;  %v735_v37 = vld [vmem:[%s1020_s1 + $0x12c] ss:$16 sps:$4 sm:$0xff]   ;;  %v737_v38 = vld [vmem:[%s1020_s1 + $0x120] ss:$16 sps:$4 sm:$0xff]  }
   0xe   :  { %v738_v39 = vld [vmem:[%s1020_s1 + $0x128] ss:$16 sps:$4 sm:$0xff]   ;;  %v739_v40 = vld [vmem:[%s1020_s1 + $0x144] ss:$16 sps:$4 sm:$0xff]   ;;  %v741_v41 = vld [vmem:[%s1020_s1 + $0x14c] ss:$16 sps:$4 sm:$0xff]  }
   0xf   :  { %431 = vmatpush1.bf16.msra.mxu0 %v701_v14  ;;  %472 = vmatpush1.bf16.msra.mxu1 %v702_v15  ;;  %v743_v42 = vld [vmem:[%s1020_s1 + $0x140] ss:$16 sps:$4 sm:$0xff]   ;;  %v744_v43 = vld [vmem:[%s1020_s1 + $0x148] ss:$16 sps:$4 sm:$0xff]   ;;  %v745_v44 = vld [vmem:[%s1020_s1 + $0x164] ss:$16 sps:$4 sm:$0xff]  }
  0x10   :  { %432 = vmatprep.subr.bf16.mxu0 %v703_v16  ;;  %473 = vmatprep.subr.bf16.mxu1 %v705_v17  ;;  %v747_v45 = vld [vmem:[%s1020_s1 + $0x16c] ss:$16 sps:$4 sm:$0xff]   ;;  %v32_v46 = vld [vmem:[%s1021_s0] sm:$0xff]  ;;  %v750_v49 = vld [vmem:[%s1020_s1 + $0x168] ss:$16 sps:$4 sm:$0xff]   ;;  %v524_v4 = vshrl.u32 %v523_v3, 7 }
  0x11   :  { %v610_v47 = vcombine.high %v32_v46, %v32_v46  ;;  %v749_v48 = vld [vmem:[%s1020_s1 + $0x160] ss:$16 sps:$4 sm:$0xff]   ;;  %v751_v50 = vld [vmem:[%s1020_s1 + $0x184] ss:$16 sps:$4 sm:$0xff]   ;;  %v753_v51 = vld [vmem:[%s1020_s1 + $0x18c] ss:$16 sps:$4 sm:$0xff]   ;;  %v609_v2 = vcombine.low %v32_v46, %v32_v46 }
  0x12   :  { %v755_v52 = vld [vmem:[%s1020_s1 + $0x180] ss:$16 sps:$4 sm:$0xff]   ;;  %v756_v53 = vld [vmem:[%s1020_s1 + $0x188] ss:$16 sps:$4 sm:$0xff]   ;;  %v757_v54 = vld [vmem:[%s1020_s1 + $0x1a4] ss:$16 sps:$4 sm:$0xff]  }
  0x13   :  { %433 = vmatpush1.bf16.msra.mxu0 %v707_v18  ;;  %474 = vmatpush1.bf16.msra.mxu1 %v708_v19  ;;  %v759_v55 = vld [vmem:[%s1020_s1 + $0x1ac] ss:$16 sps:$4 sm:$0xff]   ;;  %v761_v56 = vld [vmem:[%s1020_s1 + $0x1a0] ss:$16 sps:$4 sm:$0xff]   ;;  %v762_v57 = vld [vmem:[%s1020_s1 + $0x1a8] ss:$16 sps:$4 sm:$0xff]  }
  0x14   :  { %434 = vmatprep.subr.bf16.mxu0 %v709_v20  ;;  %475 = vmatprep.subr.bf16.mxu1 %v711_v21  ;;  %v763_v58 = vld [vmem:[%s1020_s1 + $0x1c4] ss:$16 sps:$4 sm:$0xff]   ;;  %v765_v59 = vld [vmem:[%s1020_s1 + $0x1cc] ss:$16 sps:$4 sm:$0xff]   ;;  %v767_v60 = vld [vmem:[%s1020_s1 + $0x1c0] ss:$16 sps:$4 sm:$0xff]  }
  0x15   :  { %456 = vmatprep.mubr.bf16.mxu0 %v610_v47  ;;  %497 = vmatprep.mubr.bf16.mxu1 %v610_v47  ;;  %v768_v61 = vld [vmem:[%s1020_s1 + $0x1c8] ss:$16 sps:$4 sm:$0xff]   ;;  %v769_v62 = vld [vmem:[%s1020_s1 + $0x1e4] ss:$16 sps:$4 sm:$0xff]   ;;  %v771_v63 = vld [vmem:[%s1020_s1 + $0x1ec] ss:$16 sps:$4 sm:$0xff]  }
  0x16   :  { %v773_v0 = vld [vmem:[%s1020_s1 + $0x1e0] ss:$16 sps:$4 sm:$0xff]   ;;  %v774_v1 = vld [vmem:[%s1020_s1 + $0x1e8] ss:$16 sps:$4 sm:$0xff]   ;;  %v525_v5 = vsub.s32 0, %v524_v4  ;;  %v533_v6 = vsub.s32 2, %v524_v4 }
  0x17   :  { %435 = vmatpush1.bf16.msra.mxu0 %v713_v22  ;;  %476 = vmatpush1.bf16.msra.mxu1 %v714_v23  ;;  %v521_v7 = vld [vmem:[%s1022_s2] sm:$0xf]  ;;  %v529_v8 = vsub.s32 1, %v524_v4  ;;  %v537_v9 = vsub.s32 3, %v524_v4  ;;  %v574_v14 = vld [vmem:[%s1024_s4 + $0x8] sm:$0xff] }
  0x18   :  { %436 = vmatprep.subr.bf16.mxu0 %v715_v24  ;;  %477 = vmatprep.subr.bf16.mxu1 %v717_v25  ;;  %v547_v10 = vld [vmem:[%s1023_s3] sm:$0xf]  ;;  %v526_v11 = vrot.slane %v521_v7, %v525_v5  ;;  %v534_v12 = vrot.slane %v521_v7, %v533_v6 }
  0x19   :  { %v573_v13 = vld [vmem:[%s1024_s4] sm:$0xff]  ;;  %v530_v15 = vrot.slane %v521_v7, %v529_v8  ;;  %v538_v16 = vrot.slane %v521_v7, %v537_v9  ;;  %v552_v17 = vrot.slane %v547_v10, %v525_v5  ;;  %v560_v18 = vrot.slane %v547_v10, %v533_v6 }
  0x1a   :  { %v556_v21 = vrot.slane %v547_v10, %v529_v8  ;;  %v564_v22 = vrot.slane %v547_v10, %v537_v9  ;;  %v575_v24 = vunpack.c.l.bf16 %v573_v13 }
  0x1b   :  { %437 = vmatpush1.bf16.msra.mxu0 %v719_v26  ;;  %478 = vmatpush1.bf16.msra.mxu1 %v720_v27  ;;  %v577_v26 = vunpack.c.l.bf16 %v574_v14 }
  0x1c   :  { %438 = vmatprep.subr.bf16.mxu0 %v721_v28  ;;  %479 = vmatprep.subr.bf16.mxu1 %v723_v29 }
  0x1f   :  { %439 = vmatpush1.bf16.msra.mxu0 %v725_v30  ;;  %480 = vmatpush1.bf16.msra.mxu1 %v726_v31  ;;  %v576_v30 = vunpack.c.h.bf16 %v573_v13 }
  0x20   :  { %440 = vmatprep.subr.bf16.mxu0 %v727_v32  ;;  %481 = vmatprep.subr.bf16.mxu1 %v729_v33  ;;  %v578_v32 = vunpack.c.h.bf16 %v574_v14 }
  0x23   :  { %441 = vmatpush1.bf16.msra.mxu0 %v731_v34  ;;  %482 = vmatpush1.bf16.msra.mxu1 %v732_v35 }
  0x24   :  { %442 = vmatprep.subr.bf16.mxu0 %v733_v36  ;;  %483 = vmatprep.subr.bf16.mxu1 %v735_v37 }
  0x27   :  { %443 = vmatpush1.bf16.msra.mxu0 %v737_v38  ;;  %484 = vmatpush1.bf16.msra.mxu1 %v738_v39 }
  0x28   :  { %444 = vmatprep.subr.bf16.mxu0 %v739_v40  ;;  %485 = vmatprep.subr.bf16.mxu1 %v741_v41 }
  0x2b   :  { %445 = vmatpush1.bf16.msra.mxu0 %v743_v42  ;;  %486 = vmatpush1.bf16.msra.mxu1 %v744_v43 }
  0x2c   :  { %446 = vmatprep.subr.bf16.mxu0 %v745_v44  ;;  %487 = vmatprep.subr.bf16.mxu1 %v747_v45 }
  0x2f   :  { %447 = vmatpush1.bf16.msra.mxu0 %v749_v48  ;;  %488 = vmatpush1.bf16.msra.mxu1 %v750_v49 }
  0x30   :  { %448 = vmatprep.subr.bf16.mxu0 %v751_v50  ;;  %489 = vmatprep.subr.bf16.mxu1 %v753_v51 }
  0x33   :  { %449 = vmatpush1.bf16.msra.mxu0 %v755_v52  ;;  %490 = vmatpush1.bf16.msra.mxu1 %v756_v53 }
  0x34   :  { %450 = vmatprep.subr.bf16.mxu0 %v757_v54  ;;  %491 = vmatprep.subr.bf16.mxu1 %v759_v55 }
  0x37   :  { %451 = vmatpush1.bf16.msra.mxu0 %v761_v56  ;;  %492 = vmatpush1.bf16.msra.mxu1 %v762_v57 }
  0x38   :  { %452 = vmatprep.subr.bf16.mxu0 %v763_v58  ;;  %493 = vmatprep.subr.bf16.mxu1 %v765_v59 }
  0x3b   :  { %453 = vmatpush1.bf16.msra.mxu0 %v767_v60  ;;  %494 = vmatpush1.bf16.msra.mxu1 %v768_v61 }
  0x3c   :  { %454 = vmatprep.subr.bf16.mxu0 %v769_v62  ;;  %495 = vmatprep.subr.bf16.mxu1 %v771_v63 }
  0x3f   :  { %455 = vmatpush1.bf16.msra.mxu0 %v773_v0  ;;  %496 = vmatpush1.bf16.msra.mxu1 %v774_v1 }
  0x42   :  { %457 = vmatmul.mubr.bf16.vlgmr.msra.gmra.mrb[0].mxu0 %v609_v2  ;;  %498 = vmatmul.mubr.bf16.vlgmr.msra.gmra.mrb[0].mxu1 %v609_v2 }
 0x115   :  { %v458_v19 = vpop.f32.mrb[0].mxu0  ;;  %v499_v20 = vpop.f32.mrb[0].mxu1 }
 0x116   :  { %v543_v23 = vmul.f32 %v526_v11, %v458_v19  ;;  %v545_v25 = vmul.f32 %v534_v12, %v499_v20  ;;  %v460_v27 = vpop.f32.mrb[1].mxu0  ;;  %v501_v28 = vpop.f32.mrb[1].mxu1 }
 0x117   :  { %v544_v29 = vmul.f32 %v530_v15, %v460_v27  ;;  %v546_v31 = vmul.f32 %v538_v16, %v501_v28  ;;  %v462_v33 = vpop.f32.mrb[2].mxu0  ;;  %v503_v34 = vpop.f32.mrb[2].mxu1 }
 0x118   :  { %v569_v35 = vadd.f32 %v552_v17, %v543_v23  ;;  %v571_v36 = vadd.f32 %v560_v18, %v545_v25  ;;  %v463_v37 = vpop.f32.mrb[3].mxu0  ;;  %v504_v38 = vpop.f32.mrb[3].mxu1 }
 0x119   :  { %v570_v39 = vadd.f32 %v556_v21, %v544_v29  ;;  %v572_v40 = vadd.f32 %v564_v22, %v546_v31 }
 0x11a   :  { %v579_v41 = vadd.f32 %v575_v24, %v569_v35  ;;  %v581_v42 = vadd.f32 %v577_v26, %v571_v36 }
 0x11b   :  { %v580_v43 = vadd.f32 %v576_v30, %v570_v39  ;;  %v582_v44 = vadd.f32 %v578_v32, %v572_v40 }
 0x11c   :  { %v583_v45 = vmax.f32 %v579_v41, 0.0  ;;  %v585_v46 = vmax.f32 %v581_v42, 0.0 }
 0x11d   :  { %v584_v47 = vmax.f32 %v580_v43, 0.0  ;;  %v586_v48 = vmax.f32 %v582_v44, 0.0 }
 0x11f   :  { %v677_v49 = vpack.c.bf16 %v584_v47, %v583_v45  ;;  %v678_v50 = vpack.c.bf16 %v586_v48, %v585_v46 }
 0x121   :  { %603 = vst [vmem:[%s1025_s5] sm:$0xff] %v677_v49  ;;  %604 = vst [vmem:[%s1025_s5 + $0x8] sm:$0xff] %v678_v50 }

// kernel: resnext_forward.35
= control target key start
LH: loop header
LB: loop body
LE: loop exit
PB: predicated region body
PF: predicated region fallthrough
CT: control target
= control target key end

     0   :  { %s657_s1 = inlined_call_operand.vmem [shape: bf16[512,128], index: 1, kind: input, shape index: {}]   ;;  %s658_s0 = inlined_call_operand.vmem [shape: bf16[8,512], index: 0, kind: input, shape index: {}]   ;;  %s659_s2 = inlined_call_operand.vmem [shape: f32[1,128], index: 2, kind: input, shape index: {}]   ;;  %s660_s3 = inlined_call_operand.vmem [shape: f32[1,128], index: 3, kind: input, shape index: {}]   ;;  %s661_s4 = inlined_call_operand.vmem [shape: f32[8,128], index: 4, kind: output, shape index: {}]  }
   0x1   :  { %v485_v0 = vld [vmem:[%s657_s1 + $0x40] sm:$0xff]   ;;  %v489_v4 = vld [vmem:[%s657_s1 + $0x48] sm:$0xff]   ;;  %v493_v8 = vld [vmem:[%s657_s1 + $0x50] sm:$0xff]  }
   0x2   :  { %v486_v1 = vld [vmem:[%s657_s1 + $0xc0] sm:$0xff]   ;;  %441 = vmatprep.subr.bf16.mxu0 %v485_v0  ;;  %v490_v5 = vld [vmem:[%s657_s1 + $0xc8] sm:$0xff]   ;;  %v494_v9 = vld [vmem:[%s657_s1 + $0xd0] sm:$0xff]  }
   0x3   :  { %v487_v2 = vld [vmem:[%s657_s1] sm:$0xff]   ;;  %463 = vmatprep.subr.bf16.mxu1 %v486_v1  ;;  %v491_v6 = vld [vmem:[%s657_s1 + $0x8] sm:$0xff]   ;;  %v495_v10 = vld [vmem:[%s657_s1 + $0x10] sm:$0xff]  }
   0x4   :  { %v488_v3 = vld [vmem:[%s657_s1 + $0x80] sm:$0xff]   ;;  %442 = vmatpush3.bf16.msra.mxu0 %v487_v2  ;;  %v492_v7 = vld [vmem:[%s657_s1 + $0x88] sm:$0xff]   ;;  %v496_v11 = vld [vmem:[%s657_s1 + $0x90] sm:$0xff]  }
   0x5   :  { %464 = vmatpush3.bf16.msra.mxu1 %v488_v3  ;;  %443 = vmatprep.subr.bf16.mxu0 %v489_v4  ;;  %v497_v12 = vld [vmem:[%s657_s1 + $0x58] sm:$0xff]   ;;  %v501_v16 = vld [vmem:[%s657_s1 + $0x60] sm:$0xff]   ;;  %v505_v20 = vld [vmem:[%s657_s1 + $0x68] sm:$0xff]  }
   0x6   :  { %465 = vmatprep.subr.bf16.mxu1 %v490_v5  ;;  %v498_v13 = vld [vmem:[%s657_s1 + $0xd8] sm:$0xff]   ;;  %v502_v17 = vld [vmem:[%s657_s1 + $0xe0] sm:$0xff]   ;;  %v506_v21 = vld [vmem:[%s657_s1 + $0xe8] sm:$0xff]  }
   0x7   :  { %v499_v14 = vld [vmem:[%s657_s1 + $0x18] sm:$0xff]   ;;  %v503_v18 = vld [vmem:[%s657_s1 + $0x20] sm:$0xff]   ;;  %v507_v22 = vld [vmem:[%s657_s1 + $0x28] sm:$0xff]  }
   0x8   :  { %444 = vmatpush3.bf16.msra.mxu0 %v491_v6  ;;  %v500_v15 = vld [vmem:[%s657_s1 + $0x98] sm:$0xff]   ;;  %v504_v19 = vld [vmem:[%s657_s1 + $0xa0] sm:$0xff]   ;;  %v508_v23 = vld [vmem:[%s657_s1 + $0xa8] sm:$0xff]  }
   0x9   :  { %466 = vmatpush3.bf16.msra.mxu1 %v492_v7  ;;  %445 = vmatprep.subr.bf16.mxu0 %v493_v8  ;;  %v509_v24 = vld [vmem:[%s657_s1 + $0x70] sm:$0xff]   ;;  %v513_v28 = vld [vmem:[%s657_s1 + $0x78] sm:$0xff]   ;;  %v24_v32 = vld [vmem:[%s658_s0] sm:$0xff] }
   0xa   :  { %467 = vmatprep.subr.bf16.mxu1 %v494_v9  ;;  %v510_v25 = vld [vmem:[%s657_s1 + $0xf0] sm:$0xff]   ;;  %v514_v29 = vld [vmem:[%s657_s1 + $0xf8] sm:$0xff]   ;;  %v25_v33 = vld [vmem:[%s658_s0 + $0x8] sm:$0xff]  ;;  %v403_v34 = vcombine.low %v24_v32, %v24_v32  ;;  %v404_v35 = vcombine.high %v24_v32, %v24_v32 }
   0xb   :  { %v511_v26 = vld [vmem:[%s657_s1 + $0x30] sm:$0xff]   ;;  %v515_v30 = vld [vmem:[%s657_s1 + $0x38] sm:$0xff]   ;;  %v405_v36 = vcombine.low %v25_v33, %v25_v33  ;;  %v406_v37 = vcombine.high %v25_v33, %v25_v33  ;;  %v439_v46 = vld [vmem:[%s659_s2] ss:$0 sm:$0xff] }
   0xc   :  { %446 = vmatpush3.bf16.msra.mxu0 %v495_v10  ;;  %v512_v27 = vld [vmem:[%s657_s1 + $0xb0] sm:$0xff]   ;;  %v516_v31 = vld [vmem:[%s657_s1 + $0xb8] sm:$0xff]   ;;  %328 = vmatprep.mubr.bf16.mxu0 %v404_v35  ;;  %v440_v50 = vld [vmem:[%s660_s3] ss:$0 sm:$0xff] }
   0xd   :  { %468 = vmatpush3.bf16.msra.mxu1 %v496_v11  ;;  %447 = vmatprep.subr.bf16.mxu0 %v497_v12 }
   0xe   :  { %469 = vmatprep.subr.bf16.mxu1 %v498_v13  ;;  %368 = vmatprep.mubr.bf16.mxu1 %v406_v37 }
  0x10   :  { %448 = vmatpush3.bf16.msra.mxu0 %v499_v14 }
  0x11   :  { %470 = vmatpush3.bf16.msra.mxu1 %v500_v15  ;;  %449 = vmatprep.subr.bf16.mxu0 %v501_v16 }
  0x12   :  { %471 = vmatprep.subr.bf16.mxu1 %v502_v17 }
  0x14   :  { %450 = vmatpush3.bf16.msra.mxu0 %v503_v18 }
  0x15   :  { %472 = vmatpush3.bf16.msra.mxu1 %v504_v19  ;;  %451 = vmatprep.subr.bf16.mxu0 %v505_v20 }
  0x16   :  { %473 = vmatprep.subr.bf16.mxu1 %v506_v21 }
  0x18   :  { %452 = vmatpush3.bf16.msra.mxu0 %v507_v22 }
  0x19   :  { %474 = vmatpush3.bf16.msra.mxu1 %v508_v23  ;;  %453 = vmatprep.subr.bf16.mxu0 %v509_v24 }
  0x1a   :  { %475 = vmatprep.subr.bf16.mxu1 %v510_v25 }
  0x1c   :  { %454 = vmatpush3.bf16.msra.mxu0 %v511_v26 }
  0x1d   :  { %476 = vmatpush3.bf16.msra.mxu1 %v512_v27  ;;  %455 = vmatprep.subr.bf16.mxu0 %v513_v28 }
  0x1e   :  { %477 = vmatprep.subr.bf16.mxu1 %v514_v29 }
  0x20   :  { %456 = vmatpush3.bf16.msra.mxu0 %v515_v30 }
  0x21   :  { %478 = vmatpush3.bf16.msra.mxu1 %v516_v31 }
  0x23   :  { %329 = vmatmul.mubr.bf16.vlgmr.msra.gmra.mrb[0].mxu0 %v403_v34 }
  0x24   :  { %369 = vmatmul.mubr.bf16.vlgmr.msra.gmra.mrb[0].mxu1 %v405_v36 }
  0xf6   :  { %v457_v38 = vpop.f32.mrb[0].mxu0 }
  0xf7   :  { %v479_v39 = vpop.f32.mrb[0].mxu1  ;;  %v458_v40 = vpop.f32.mrb[1].mxu0 }
  0xf8   :  { %v480_v41 = vpop.f32.mrb[1].mxu1  ;;  %v459_v42 = vadd.f32 %v458_v40, %v457_v38  ;;  %v460_v44 = vpop.f32.mrb[2].mxu0 }
  0xf9   :  { %v481_v43 = vadd.f32 %v480_v41, %v479_v39  ;;  %v482_v45 = vpop.f32.mrb[2].mxu1  ;;  %v461_v47 = vpop.f32.mrb[3].mxu0 }
  0xfa   :  { %v483_v48 = vpop.f32.mrb[3].mxu1 }
  0xfb   :  { %v371_v49 = vadd.f32 %v481_v43, %v459_v42 }
  0xfd   :  { %v389_v51 = vmul.f32 %v439_v46, %v371_v49 }
  0xff   :  { %v397_v52 = vadd.f32 %v440_v50, %v389_v51 }
 0x101   :  { %398 = vst [vmem:[%s661_s4] sm:$0xff] %v397_v52 }

</bundles_post_ra>
